<compile_context>
chip_gen: v7x
topology: tpu7x:2x2x1
jax: 0.10.0
libtpu: 0.0.40
codegen_flags: <defaults>
</compile_context>

<pallas_src>
import math
import functools

import jax
import jax.numpy as jnp
from jax.experimental import pallas as pl
from jax.experimental.pallas import tpu as pltpu


def _round_up(x, m):
    return ((x + m - 1) // m) * m


# ----------------------------------------------------------------------------
# Pallas kernel: one (TILE, 4) event tile -> one (TILE, D) output tile
# ----------------------------------------------------------------------------
def _event_tokenizer_kernel(ev_ref, emb_hi_ref, emb_lo_ref, gamma_ref, beta_ref,
                            freq_ref, phase_ref, out_ref, *, patch_size, eps):
    ev = ev_ref[...]                                    # (TILE, 4) int32
    tile = ev.shape[0]
    vocab = emb_hi_ref.shape[0]

    # Fused event-id / timestamp arithmetic.
    t = ev[:, 0:1].astype(jnp.float32)                  # (TILE, 1)
    x_c = ev[:, 1:2]
    y_c = ev[:, 2:3]
    p_c = ev[:, 3:4]
    # Exact reproduction of the reference formula (p*P + y*P + x).
    ids = p_c * patch_size + y_c * patch_size + x_c     # (TILE, 1) int32

    # Embedding gather as one-hot MXU matmul.  one-hot is exact in bf16
    # (values 0/1); hi + lo bf16 table halves reconstruct the f32 gather.
    vocab_iota = jax.lax.broadcasted_iota(jnp.int32, (tile, vocab), 1)
    one_hot = (ids == vocab_iota).astype(jnp.bfloat16)  # (TILE, V)
    x = jnp.dot(one_hot, emb_hi_ref[...], preferred_element_type=jnp.float32)
    x = x + jnp.dot(one_hot, emb_lo_ref[...], preferred_element_type=jnp.float32)

    # LayerNorm over d_embed: sum(x) and sum(x*x) are independent reductions.
    inv_d = jnp.float32(1.0 / x.shape[-1])
    mean = jnp.sum(x, axis=-1, keepdims=True) * inv_d
    ex2 = jnp.sum(x * x, axis=-1, keepdims=True) * inv_d
    var = ex2 - mean * mean
    inv = jax.lax.rsqrt(var + eps)
    xn = (x - mean) * (inv * gamma_ref[...]) + beta_ref[...]

    # Sinusoidal temporal embedding: even dims sin(t*w), odd dims cos(t*w)
    # expressed as sin(t*w + pi/2) via the precomputed phase table.
    sinus = jnp.sin(t * freq_ref[...] + phase_ref[...])

    out_ref[...] = (xn + sinus).astype(out_ref.dtype)


# ----------------------------------------------------------------------------
# Wrapper
# ----------------------------------------------------------------------------
class EventTokenizerPallas:
    def __init__(self, patch_size, d_embed, key):
        self.patch_size = patch_size
        self.d_embed = d_embed
        self.vocab_size = 2 * patch_size * patch_size
        self.eps = 1e-5  # nn.LayerNorm default

        # nn.Embedding default init ~ N(0, 1)
        self.embedding = jax.random.normal(
            key, (self.vocab_size, d_embed), dtype=jnp.float32)
        # bf16 hi/lo split of the table: emb ≈ hi + lo to ~16 mantissa bits,
        # so two single-pass bf16 MXU matmuls reproduce the f32 gather.
        emb_hi = self.embedding.astype(jnp.bfloat16)
        self.emb_hi = emb_hi
        self.emb_lo = (self.embedding - emb_hi.astype(jnp.float32)).astype(jnp.bfloat16)

        # nn.LayerNorm default init: gamma=1, beta=0
        self.gamma = jnp.ones((1, d_embed), dtype=jnp.float32)
        self.beta = jnp.zeros((1, d_embed), dtype=jnp.float32)

        # Sinusoidal embedding tables (interleaved sin/cos, standard
        # transformer convention).
        # TODO(synk): SinusoidalEmbedding is not defined in the reference
        # file; the standard sin/cos convention is assumed.
        dims = jnp.arange(d_embed)
        pair = (dims // 2).astype(jnp.float32)            # 0,0,1,1,2,2,...
        freq = jnp.exp(-math.log(10000.0) * 2.0 * pair / d_embed)
        phase = jnp.where(dims % 2 == 1, jnp.float32(math.pi / 2.0),
                          jnp.float32(0.0))
        self.freq = freq.reshape(1, d_embed).astype(jnp.float32)
        self.phase = phase.reshape(1, d_embed).astype(jnp.float32)

    def __call__(self, events, tile_rows=512, out_dtype=jnp.float32):
        """events: int32 [B, N, 4] (timestamp, x, y, p) -> [B, N, d_embed].

        out_dtype=jnp.bfloat16 halves the dominant HBM write traffic if the
        downstream consumer tolerates it (default f32 matches the reference).
        """
        B, N, _ = events.shape
        D = self.d_embed
        V = self.vocab_size
        rows = B * N

        ev = events.reshape(rows, 4).astype(jnp.int32)

        # Tile selection: big tiles amortize the ~0.35us per-grid-step
        # overhead; clamp so the grid stays >= 2 when possible (v7x has two
        # TensorCores to shard the "parallel" axis across).
        half = _round_up(pl.cdiv(rows, 2), 8)
        tile = max(8, min(tile_rows, half))
        rows_p = _round_up(rows, tile)
        if rows_p != rows:
            # Ragged B*N: pad with zero events (id 0, t 0); padded rows are
            # sliced off below.
            ev = jnp.pad(ev, ((0, rows_p - rows), (0, 0)))
        grid = (rows_p // tile,)

        # VMEM budget (double-buffered): events 2*tile*4*4 B, output
        # 2*tile*D*4 B, plus resident tables 2*(2*V*D*2) B and 4*(D*4) B
        # params, plus the tile*V bf16 one-hot.  At V=D=128, tile=512 this is
        # well under the 16/32 MiB scoped defaults on all generations; set
        # vmem_limit_bytes in CompilerParams if patch_size / d_embed grow
        # (v7x only has 64 MiB physical VMEM).
        kernel = functools.partial(_event_tokenizer_kernel,
                                   patch_size=self.patch_size, eps=self.eps)

        out_flat = pl.pallas_call(
            kernel,
            out_shape=jax.ShapeDtypeStruct((rows_p, D), out_dtype),
            grid_spec=pltpu.PrefetchScalarGridSpec(
                num_scalar_prefetch=0,
                grid=grid,
                in_specs=[
                    pl.BlockSpec((tile, 4), lambda i: (i, 0)),   # raw events
                    pl.BlockSpec((V, D), lambda i: (0, 0)),      # emb hi (bf16)
                    pl.BlockSpec((V, D), lambda i: (0, 0)),      # emb lo (bf16)
                    pl.BlockSpec((1, D), lambda i: (0, 0)),      # gamma
                    pl.BlockSpec((1, D), lambda i: (0, 0)),      # beta
                    pl.BlockSpec((1, D), lambda i: (0, 0)),      # freq
                    pl.BlockSpec((1, D), lambda i: (0, 0)),      # phase
                ],
                out_specs=pl.BlockSpec((tile, D), lambda i: (i, 0)),
            ),
            compiler_params=pltpu.CompilerParams(
                dimension_semantics=("parallel",)),
        )(ev, self.emb_hi, self.emb_lo, self.gamma, self.beta,
          self.freq, self.phase)

        return out_flat[:rows].reshape(B, N, D)


# ----------------------------------------------------------------------------
# Pure-JAX reference (mirrors the PyTorch forward)
# ----------------------------------------------------------------------------
def reference_forward(tok: EventTokenizerPallas, events):
    timestamps = events[:, :, 0].astype(jnp.float32)
    x = events[:, :, 1].astype(jnp.int32)
    y = events[:, :, 2].astype(jnp.int32)
    p = events[:, :, 3].astype(jnp.int32)
    event_ids = p * tok.patch_size + y * tok.patch_size + x
    emb = tok.embedding[event_ids]                       # exact gather
    mean = jnp.mean(emb, axis=-1, keepdims=True)
    var = jnp.mean((emb - mean) ** 2, axis=-1, keepdims=True)
    ln = (emb - mean) * jax.lax.rsqrt(var + tok.eps) * tok.gamma[0] + tok.beta[0]
    sinus = jnp.sin(timestamps[..., None] * tok.freq[0] + tok.phase[0])
    return ln + sinus


if __name__ == "__main__":
    key = jax.random.PRNGKey(0)
    k_w, k_t, kx, ky, kp = jax.random.split(key, 5)

    batch = 2
    n_events = 128
    patch_size = 8           # vocab = 2 * 8 * 8 = 128
    d_embed = 128

    tok = EventTokenizerPallas(patch_size, d_embed, k_w)

    ts = jax.random.randint(k_t, (batch, n_events, 1), 0, 512, dtype=jnp.int32)
    xs = jax.random.randint(kx, (batch, n_events, 1), 0, patch_size, dtype=jnp.int32)
    ys = jax.random.randint(ky, (batch, n_events, 1), 0, patch_size, dtype=jnp.int32)
    ps = jax.random.randint(kp, (batch, n_events, 1), 0, 2, dtype=jnp.int32)
    events = jnp.concatenate([ts, xs, ys, ps], axis=-1)   # [B, N, 4] int32

    out = jax.block_until_ready(tok(events))
    ref = reference_forward(tok, events)

    assert out.shape == (batch, n_events, d_embed)
    max_err = float(jnp.max(jnp.abs(out - ref)))
    assert jnp.allclose(out, ref, atol=1e-3, rtol=1e-3), (
        f"mismatch vs reference (max abs err {max_err})")

    print("KERNEL_OK")
</pallas_src>

<mosaic_0001>
module attributes {stable_mosaic.version = 11 : i64} {
  func.func @_event_tokenizer_kernel(%arg0: i32, %arg1: memref<128x4xi32, #tpu.memory_space<vmem>>, %arg2: memref<128x128xbf16, #tpu.memory_space<vmem>>, %arg3: memref<128x128xbf16, #tpu.memory_space<vmem>>, %arg4: memref<1x128xf32, #tpu.memory_space<vmem>>, %arg5: memref<1x128xf32, #tpu.memory_space<vmem>>, %arg6: memref<1x128xf32, #tpu.memory_space<vmem>>, %arg7: memref<1x128xf32, #tpu.memory_space<vmem>>, %arg8: memref<128x128xf32, #tpu.memory_space<vmem>>) attributes {dimension_semantics = [#tpu.dimension_semantics<parallel>], iteration_bounds = array<i64: 2>, scalar_prefetch = 0 : i64, scratch_operands = 0 : i64, tpu.core_type = #tpu.core_type<tc>, window_params = [{transform_indices = @transform_0, window_bounds = array<i64: 128, 4>}, {pipeline_mode = #tpu.pipeline_mode<synchronous>, transform_indices = @transform_1, window_bounds = array<i64: 128, 128>}, {pipeline_mode = #tpu.pipeline_mode<synchronous>, transform_indices = @transform_2, window_bounds = array<i64: 128, 128>}, {pipeline_mode = #tpu.pipeline_mode<synchronous>, transform_indices = @transform_3, window_bounds = array<i64: 1, 128>}, {pipeline_mode = #tpu.pipeline_mode<synchronous>, transform_indices = @transform_4, window_bounds = array<i64: 1, 128>}, {pipeline_mode = #tpu.pipeline_mode<synchronous>, transform_indices = @transform_5, window_bounds = array<i64: 1, 128>}, {pipeline_mode = #tpu.pipeline_mode<synchronous>, transform_indices = @transform_6, window_bounds = array<i64: 1, 128>}, {transform_indices = @transform_7, window_bounds = array<i64: 128, 128>}]} {
    %c0 = arith.constant 0 : index
    %c0_0 = arith.constant 0 : index
    %0 = vector.load %arg1[%c0, %c0_0] : memref<128x4xi32, #tpu.memory_space<vmem>>, vector<128x4xi32>
    %1 = vector.extract_strided_slice %0 {offsets = [0, 0], sizes = [128, 1], strides = [1, 1]} : vector<128x4xi32> to vector<128x1xi32>
    %2 = arith.sitofp %1 : vector<128x1xi32> to vector<128x1xf32>
    %3 = vector.extract_strided_slice %0 {offsets = [0, 1], sizes = [128, 1], strides = [1, 1]} : vector<128x4xi32> to vector<128x1xi32>
    %4 = vector.extract_strided_slice %0 {offsets = [0, 2], sizes = [128, 1], strides = [1, 1]} : vector<128x4xi32> to vector<128x1xi32>
    %5 = vector.extract_strided_slice %0 {offsets = [0, 3], sizes = [128, 1], strides = [1, 1]} : vector<128x4xi32> to vector<128x1xi32>
    %c8_i32 = arith.constant 8 : i32
    %6 = vector.broadcast %c8_i32 : i32 to vector<128x1xi32>
    %7 = arith.muli %5, %6 : vector<128x1xi32>
    %c8_i32_1 = arith.constant 8 : i32
    %8 = vector.broadcast %c8_i32_1 : i32 to vector<128x1xi32>
    %9 = arith.muli %4, %8 : vector<128x1xi32>
    %10 = arith.addi %7, %9 : vector<128x1xi32>
    %11 = arith.addi %10, %3 : vector<128x1xi32>
    %12 = tpu.iota {dimensions = array<i32: 1>} : vector<128x128xi32>
    %13 = vector.broadcast %11 : vector<128x1xi32> to vector<128x128xi32>
    %14 = arith.cmpi eq, %13, %12 : vector<128x128xi32>
    %15 = arith.extui %14 : vector<128x128xi1> to vector<128x128xi32>
    %16 = arith.sitofp %15 : vector<128x128xi32> to vector<128x128xf32>
    %17 = arith.truncf %16 : vector<128x128xf32> to vector<128x128xbf16>
    %c0_2 = arith.constant 0 : index
    %c0_3 = arith.constant 0 : index
    %18 = vector.load %arg2[%c0_2, %c0_3] : memref<128x128xbf16, #tpu.memory_space<vmem>>, vector<128x128xbf16>
    %cst = arith.constant dense<0.000000e+00> : vector<128x128xf32>
    %19 = tpu.matmul %17, %18, %cst {dimension_numbers = #tpu.dot_dimension_numbers<[1], [0], [0], [1], [0, 0, 1, 1], [], []>} : vector<128x128xbf16>, vector<128x128xbf16>, vector<128x128xf32> -> vector<128x128xf32>
    %c0_4 = arith.constant 0 : index
    %c0_5 = arith.constant 0 : index
    %20 = vector.load %arg3[%c0_4, %c0_5] : memref<128x128xbf16, #tpu.memory_space<vmem>>, vector<128x128xbf16>
    %cst_6 = arith.constant dense<0.000000e+00> : vector<128x128xf32>
    %21 = tpu.matmul %17, %20, %cst_6 {dimension_numbers = #tpu.dot_dimension_numbers<[1], [0], [0], [1], [0, 0, 1, 1], [], []>} : vector<128x128xbf16>, vector<128x128xbf16>, vector<128x128xf32> -> vector<128x128xf32>
    %22 = arith.addf %19, %21 : vector<128x128xf32>
    %cst_7 = arith.constant dense<0.000000e+00> : vector<128xf32>
    %23 = vector.multi_reduction <add>, %22, %cst_7 [1] : vector<128x128xf32> to vector<128xf32>
    %24 = vector.shape_cast %23 : vector<128xf32> to vector<128x1xf32>
    %cst_8 = arith.constant 7.812500e-03 : f32
    %25 = vector.broadcast %cst_8 : f32 to vector<128x1xf32>
    %26 = arith.mulf %24, %25 : vector<128x1xf32>
    %27 = arith.mulf %22, %22 : vector<128x128xf32>
    %cst_9 = arith.constant dense<0.000000e+00> : vector<128xf32>
    %28 = vector.multi_reduction <add>, %27, %cst_9 [1] : vector<128x128xf32> to vector<128xf32>
    %29 = vector.shape_cast %28 : vector<128xf32> to vector<128x1xf32>
    %cst_10 = arith.constant 7.812500e-03 : f32
    %30 = vector.broadcast %cst_10 : f32 to vector<128x1xf32>
    %31 = arith.mulf %29, %30 : vector<128x1xf32>
    %32 = arith.mulf %26, %26 : vector<128x1xf32>
    %33 = arith.subf %31, %32 : vector<128x1xf32>
    %cst_11 = arith.constant 9.99999974E-6 : f32
    %34 = vector.broadcast %cst_11 : f32 to vector<128x1xf32>
    %35 = arith.addf %33, %34 : vector<128x1xf32>
    %36 = math.rsqrt %35 : vector<128x1xf32>
    %37 = vector.broadcast %26 : vector<128x1xf32> to vector<128x128xf32>
    %38 = arith.subf %22, %37 : vector<128x128xf32>
    %c0_12 = arith.constant 0 : index
    %c0_13 = arith.constant 0 : index
    %39 = vector.load %arg4[%c0_12, %c0_13] : memref<1x128xf32, #tpu.memory_space<vmem>>, vector<1x128xf32>
    %40 = vector.broadcast %36 : vector<128x1xf32> to vector<128x128xf32>
    %41 = vector.broadcast %39 : vector<1x128xf32> to vector<128x128xf32>
    %42 = arith.mulf %40, %41 : vector<128x128xf32>
    %43 = arith.mulf %38, %42 : vector<128x128xf32>
    %c0_14 = arith.constant 0 : index
    %c0_15 = arith.constant 0 : index
    %44 = vector.load %arg5[%c0_14, %c0_15] : memref<1x128xf32, #tpu.memory_space<vmem>>, vector<1x128xf32>
    %45 = vector.broadcast %44 : vector<1x128xf32> to vector<128x128xf32>
    %46 = arith.addf %43, %45 : vector<128x128xf32>
    %c0_16 = arith.constant 0 : index
    %c0_17 = arith.constant 0 : index
    %47 = vector.load %arg6[%c0_16, %c0_17] : memref<1x128xf32, #tpu.memory_space<vmem>>, vector<1x128xf32>
    %48 = vector.broadcast %2 : vector<128x1xf32> to vector<128x128xf32>
    %49 = vector.broadcast %47 : vector<1x128xf32> to vector<128x128xf32>
    %50 = arith.mulf %48, %49 : vector<128x128xf32>
    %c0_18 = arith.constant 0 : index
    %c0_19 = arith.constant 0 : index
    %51 = vector.load %arg7[%c0_18, %c0_19] : memref<1x128xf32, #tpu.memory_space<vmem>>, vector<1x128xf32>
    %52 = vector.broadcast %51 : vector<1x128xf32> to vector<128x128xf32>
    %53 = arith.addf %50, %52 : vector<128x128xf32>
    %54 = math.sin %53 : vector<128x128xf32>
    %55 = arith.addf %46, %54 : vector<128x128xf32>
    %c0_20 = arith.constant 0 : index
    %c0_21 = arith.constant 0 : index
    %56 = vector.load %arg8[%c0_20, %c0_21] : memref<128x128xf32, #tpu.memory_space<vmem>>, vector<128x128xf32>
    tpu.vector_store %arg8[%c0_20, %c0_21], %55 {strides = array<i32>} : memref<128x128xf32, #tpu.memory_space<vmem>>, vector<128x128xf32>,
    return
  }
  func.func @transform_0(%arg0: i32) -> (i32, i32) {
    %c0_i32 = arith.constant 0 : i32
    %c0_i32_0 = arith.constant 0 : i32
    return %arg0, %c0_i32 : i32, i32
  }
  func.func @transform_1(%arg0: i32) -> (i32, i32) {
    %c0_i32 = arith.constant 0 : i32
    %c0_i32_0 = arith.constant 0 : i32
    %c0_i32_1 = arith.constant 0 : i32
    return %c0_i32, %c0_i32_0 : i32, i32
  }
  func.func @transform_2(%arg0: i32) -> (i32, i32) {
    %c0_i32 = arith.constant 0 : i32
    %c0_i32_0 = arith.constant 0 : i32
    %c0_i32_1 = arith.constant 0 : i32
    return %c0_i32, %c0_i32_0 : i32, i32
  }
  func.func @transform_3(%arg0: i32) -> (i32, i32) {
    %c0_i32 = arith.constant 0 : i32
    %c0_i32_0 = arith.constant 0 : i32
    %c0_i32_1 = arith.constant 0 : i32
    return %c0_i32, %c0_i32_0 : i32, i32
  }
  func.func @transform_4(%arg0: i32) -> (i32, i32) {
    %c0_i32 = arith.constant 0 : i32
    %c0_i32_0 = arith.constant 0 : i32
    %c0_i32_1 = arith.constant 0 : i32
    return %c0_i32, %c0_i32_0 : i32, i32
  }
  func.func @transform_5(%arg0: i32) -> (i32, i32) {
    %c0_i32 = arith.constant 0 : i32
    %c0_i32_0 = arith.constant 0 : i32
    %c0_i32_1 = arith.constant 0 : i32
    return %c0_i32, %c0_i32_0 : i32, i32
  }
  func.func @transform_6(%arg0: i32) -> (i32, i32) {
    %c0_i32 = arith.constant 0 : i32
    %c0_i32_0 = arith.constant 0 : i32
    %c0_i32_1 = arith.constant 0 : i32
    return %c0_i32, %c0_i32_0 : i32, i32
  }
  func.func @transform_7(%arg0: i32) -> (i32, i32) {
    %c0_i32 = arith.constant 0 : i32
    %c0_i32_0 = arith.constant 0 : i32
    return %arg0, %c0_i32 : i32, i32
  }
}

</mosaic_0001>

<bundles_post_ra>
// kernel: tpu_custom_call.1
= control target key start
LH: loop header
LB: loop body
LE: loop exit
PB: predicated region body
PF: predicated region fallthrough
CT: control target
= control target key end

     0   :  { %12 = vsyncpa [#allocation3], 0  ;;  %s6593_s0 = inlined_call_operand.vmem [shape: s32[256,4], index: 0, kind: input, shape index: {}]   ;;  %s6594_s1 = inlined_call_operand.vmem [shape: bf16[128,128], index: 1, kind: input, shape index: {}]   ;;  %s6595_s2 = inlined_call_operand.vmem [shape: bf16[128,128], index: 2, kind: input, shape index: {}]   ;;  %s6596_s3 = inlined_call_operand.vmem [shape: f32[1,128], index: 3, kind: input, shape index: {}]   ;;  %s6597_s4 = inlined_call_operand.vmem [shape: f32[1,128], index: 4, kind: input, shape index: {}]   ;;  %s6598_s5 = inlined_call_operand.vmem [shape: f32[1,128], index: 5, kind: input, shape index: {}]   ;;  %s6599_s6 = inlined_call_operand.vmem [shape: f32[1,128], index: 6, kind: input, shape index: {}]   ;;  %s6600_s7 = inlined_call_operand.hbm [shape: f32[256,128], index: 7, kind: output, shape index: {}]  }
   0x1   :  { %14 = vsyncpa [#allocation3 + $0x1], 0  ;;  %s3616_s24 = smov 0   ;;  %s3618_s25 = smov 0  }
   0x2   :  { %s3620_s26 = smov 0   ;;  %s3622_s27 = smov 0  }
   0x3 LB: > { %s3637_s28 = sadd.s32 4294967295, %s3560_s27   ;;  %s3005_s29 = sadd.s32 4294967294, %s3560_s27   ;;  %s3560_s27 = sphi %s3622_s27, %s6921_s27   ;;  %s3556_s26 = sphi %s3620_s26, %s6920_s26   ;;  %s3552_s25 = sphi %s3618_s25, %s6919_s25   ;;  %s3548_s24 = sphi %s3616_s24, %s6918_s24  }
   0x4   : > { %s3641_s30 = sadd.s32 1, %s3560_s27   ;;  %s179_s8 = sadd.s32 1, %s3556_s26 }
   0x5   : > { %s176_s9 = ssub.s32 %s3560_s27, %s3641_s30  ;;  %p189_p0 = scmp.ne.s32.totalorder %s3556_s26, %s3552_s25 }
   0x6   : > { %p177_p1 = scmp.eq.s32.totalorder %s176_s9, 0  ;;  %p190_p2 = scmp.eq.s32.totalorder %s3637_s28, 1 }
   0x7   : > { %p195_p3 = scmp.ne.s32.totalorder %s3552_s25, %s3548_s24  ;;  %p196_p4 = scmp.eq.s32.totalorder %s3005_s29, 1 }
   0x8   : > { %s3652_s10 = scalar_select %p177_p1, %s3556_s26, %s179_s8  }
   0x9   : > { %p3654_p5 = por %p190_p2, %p189_p0  ;;  %p3658_p6 = por %p196_p4, %p195_p3 }
   0xa   : > { %p3008_p7 = scmp.ge.s32.totalorder %s3560_s27, 1  ;;  %p241_p8 = scmp.lt.s32.totalorder %s3560_s27, 3 }
   0xc   : > { %p242_p9 = pnand %p3008_p7, %p241_p8 }
   0xe   : > { %245 = sbr.rel (%p242_p9) target bundleno = 889 (0x379), region = 48 }
  0x15   : > { %s3010_s13 = sshll.u32 %s3637_s28, 4  ;;  %v3562_v0 = vmov 3   ;;  %s3563_s18 = smov 2   ;;  %v3382_v33 = vld [vmem:[%s6595_s2] sm:$0xff]   ;;  %v3384_v35 = vld [vmem:[%s6595_s2 + $0x8] sm:$0xff]   ;;  %v3386_v37 = vld [vmem:[%s6595_s2 + $0x10] sm:$0xff]  }
  0x16   : > { %p274_p10 = scmp.lt.s32.totalorder %s3010_s13, 31  ;;  %3378 = vset.pattern.permute.xlu0 %v3562_v0  ;;  %3379 = vset.pattern.permute.xlu1 %v3562_v0  ;;  %s3564_s19 = smov 1   ;;  %v3383_v34 = vld [vmem:[%s6594_s1] sm:$0xff]   ;;  %v3385_v36 = vld [vmem:[%s6594_s1 + $0x8] sm:$0xff]   ;;  %v3387_v38 = vld [vmem:[%s6594_s1 + $0x10] sm:$0xff]  }
  0x17   : > { %3182 = vmatprep.subr.bf16.mxu1 %v3382_v33  ;;  %3214 = vmatprep.subr.bf16.mxu0 %v3383_v34  ;;  %v3388_v39 = vld [vmem:[%s6595_s2 + $0x18] sm:$0xff]   ;;  %v3390_v41 = vld [vmem:[%s6595_s2 + $0x20] sm:$0xff]   ;;  %v3392_v43 = vld [vmem:[%s6595_s2 + $0x28] sm:$0xff]   ;;  %s270_s8 = sand.u32 1, %s3552_s25   ;;  %s3149_s15 = sshll.u32 %s3637_s28, 11 }
  0x18   : > { %s6923_s13 = smov (!%p274_p10, %s3010_s13), 31  ;;  %3183 = vmatpush3.bf16.msra.mxu1 %v3382_v33  ;;  %3215 = vmatpush3.bf16.msra.mxu0 %v3383_v34  ;;  %v3389_v40 = vld [vmem:[%s6594_s1 + $0x18] sm:$0xff]   ;;  %v3391_v42 = vld [vmem:[%s6594_s1 + $0x20] sm:$0xff]   ;;  %v3393_v44 = vld [vmem:[%s6594_s1 + $0x28] sm:$0xff]   ;;  %s6545_s20 = scalar_lea.hbm %s6600_s7, %s3149_s15 }
  0x19   : > { %s3011_s14 = sshll.u32 %s6923_s13, 3  ;;  %3184 = vmatprep.subr.bf16.mxu1 %v3384_v35  ;;  %3216 = vmatprep.subr.bf16.mxu0 %v3385_v36  ;;  %v3394_v55 = vld [vmem:[%s6595_s2 + $0x30] sm:$0xff]   ;;  %v3396_v62 = vld [vmem:[%s6595_s2 + $0x38] sm:$0xff]   ;;  %s6552_s21 = scalar_lea.sflag [#allocation3], %s270_s8 }
  0x1a   : > { %s3668_s17 = scalar_lea.vmem %s6593_s0, %s3011_s14  ;;  %v3395_v56 = vld [vmem:[%s6594_s1 + $0x30] sm:$0xff]   ;;  %v3397_v63 = vld [vmem:[%s6594_s1 + $0x38] sm:$0xff]   ;;  %s3009_s14 = sshll.u32 %s270_s8, 7 }
  0x1b   : > { %v3671_v1 = vld [vmem:[%s3668_s17 + $0x8] sm:$0xff]  ;;  %v3674_v2 = vld [vmem:[%s3668_s17] sm:$0xff]  ;;  %v3677_v3 = vld [vmem:[%s3668_s17 + $0x10] sm:$0xff]  ;;  %s3573_s22 = smov [#allocation2]  }
  0x1c   : > { %379 = vrot.lane.b32.xlu1 %v3671_v1, %s3563_s18  ;;  %377 = vrot.lane.b32.xlu0 %v3674_v2, %s3563_s18  ;;  %v315_v4 = vmul.u32 8, %v3677_v3  ;;  %v313_v5 = vmul.u32 8, %v3674_v2  ;;  %v3686_v6 = vld [vmem:[%s3668_s17 + $0x18] sm:$0xff]  ;;  %v3697_v9 = vld [vmem:[%s3668_s17 + $0x28] sm:$0xff]  ;;  %s3502_s23 = sshll.u32 %s3573_s22, 4  ;;  %s3503_s23 = int_to_ptr.vmem [resolvable:$false] %s3502_s23 }
  0x1d   : > { %v316_v7 = vmul.u32 8, %v3686_v6  ;;  %v314_v8 = vmul.u32 8, %v3671_v1  ;;  %v3700_v10 = vld [vmem:[%s3668_s17 + $0x20] sm:$0xff]  ;;  %v3715_v13 = vld [vmem:[%s3668_s17 + $0x38] sm:$0xff]  ;;  %v3718_v14 = vld [vmem:[%s3668_s17 + $0x30] sm:$0xff]  ;;  %3185 = vmatpush3.bf16.msra.mxu1 %v3384_v35  ;;  %3217 = vmatpush3.bf16.msra.mxu0 %v3385_v36  ;;  %s3504_s29 = scalar_lea.vmem %s3503_s23, 4096 }
  0x1e   : > { %v318_v11 = vmul.u32 8, %v3697_v9  ;;  %v317_v12 = vmul.u32 8, %v3700_v10  ;;  %v3739_v17 = vld [vmem:[%s3668_s17 + $0x48] sm:$0xff]  ;;  %v3742_v18 = vld [vmem:[%s3668_s17 + $0x40] sm:$0xff]  ;;  %v3751_v21 = vld [vmem:[%s3668_s17 + $0x58] sm:$0xff]  ;;  %3186 = vmatprep.subr.bf16.mxu1 %v3386_v37  ;;  %3218 = vmatprep.subr.bf16.mxu0 %v3387_v38 }
  0x1f   : > { %v320_v15 = vmul.u32 8, %v3715_v13  ;;  %v319_v16 = vmul.u32 8, %v3718_v14  ;;  %v3754_v22 = vld [vmem:[%s3668_s17 + $0x50] sm:$0xff]  ;;  %v3775_v25 = vld [vmem:[%s3668_s17 + $0x68] sm:$0xff]  ;;  %v3778_v26 = vld [vmem:[%s3668_s17 + $0x60] sm:$0xff] }
  0x20   : > { %333 = vrot.lane.b32.xlu1 %v315_v4, %s3564_s19  ;;  %329 = vrot.lane.b32.xlu0 %v313_v5, %s3564_s19  ;;  %v322_v19 = vmul.u32 8, %v3739_v17  ;;  %v321_v20 = vmul.u32 8, %v3742_v18  ;;  %v3787_v29 = vld [vmem:[%s3668_s17 + $0x78] sm:$0xff]  ;;  %v3790_v30 = vld [vmem:[%s3668_s17 + $0x70] sm:$0xff] }
  0x21   : > { %v324_v23 = vmul.u32 8, %v3751_v21  ;;  %v323_v24 = vmul.u32 8, %v3754_v22  ;;  %3187 = vmatpush3.bf16.msra.mxu1 %v3386_v37  ;;  %3219 = vmatpush3.bf16.msra.mxu0 %v3387_v38 }
  0x22   : > { %v326_v27 = vmul.u32 8, %v3775_v25  ;;  %v325_v28 = vmul.u32 8, %v3778_v26  ;;  %3188 = vmatprep.subr.bf16.mxu1 %v3388_v39  ;;  %3220 = vmatprep.subr.bf16.mxu0 %v3389_v40 }
  0x23   : > { %v328_v31 = vmul.u32 8, %v3787_v29  ;;  %v327_v32 = vmul.u32 8, %v3790_v30 }
  0x24   : > { %335 = vrot.lane.b32.xlu1 %v316_v7, %s3564_s19  ;;  %331 = vrot.lane.b32.xlu0 %v314_v8, %s3564_s19 }
  0x25   : > { %3189 = vmatpush3.bf16.msra.mxu1 %v3388_v39  ;;  %3221 = vmatpush3.bf16.msra.mxu0 %v3389_v40 }
  0x26   : > { %3190 = vmatprep.subr.bf16.mxu1 %v3390_v41  ;;  %3222 = vmatprep.subr.bf16.mxu0 %v3391_v42 }
  0x28   : > { %383 = vrot.lane.b32.xlu1 %v3686_v6, %s3563_s18  ;;  %381 = vrot.lane.b32.xlu0 %v3677_v3, %s3563_s18 }
  0x29   : > { %3191 = vmatpush3.bf16.msra.mxu1 %v3390_v41  ;;  %3223 = vmatpush3.bf16.msra.mxu0 %v3391_v42 }
  0x2a   : > { %3192 = vmatprep.subr.bf16.mxu1 %v3392_v43  ;;  %3224 = vmatprep.subr.bf16.mxu0 %v3393_v44 }
  0x2c   : > { %339 = vrot.lane.b32.xlu1 %v318_v11, %s3564_s19  ;;  %337 = vrot.lane.b32.xlu0 %v317_v12, %s3564_s19 }
  0x2d   : > { %3193 = vmatpush3.bf16.msra.mxu1 %v3392_v43  ;;  %3225 = vmatpush3.bf16.msra.mxu0 %v3393_v44 }
  0x2e   : > { %3194 = vmatprep.subr.bf16.mxu1 %v3394_v55  ;;  %3226 = vmatprep.subr.bf16.mxu0 %v3395_v56 }
  0x30   : > { %343 = vrot.lane.b32.xlu1 %v320_v15, %s3564_s19  ;;  %341 = vrot.lane.b32.xlu0 %v319_v16, %s3564_s19 }
  0x31   : > { %3195 = vmatpush3.bf16.msra.mxu1 %v3394_v55  ;;  %3227 = vmatpush3.bf16.msra.mxu0 %v3395_v56 }
  0x32   : > { %3196 = vmatprep.subr.bf16.mxu1 %v3396_v62  ;;  %3228 = vmatprep.subr.bf16.mxu0 %v3397_v63 }
  0x34   : > { %387 = vrot.lane.b32.xlu1 %v3697_v9, %s3563_s18  ;;  %385 = vrot.lane.b32.xlu0 %v3700_v10, %s3563_s18 }
  0x35   : > { %3197 = vmatpush3.bf16.msra.mxu1 %v3396_v62  ;;  %3229 = vmatpush3.bf16.msra.mxu0 %v3397_v63 }
  0x38   : > { %391 = vrot.lane.b32.xlu1 %v3715_v13, %s3563_s18  ;;  %389 = vrot.lane.b32.xlu0 %v3718_v14, %s3563_s18 }
  0x3c   : > { %347 = vrot.lane.b32.xlu1 %v322_v19, %s3564_s19  ;;  %345 = vrot.lane.b32.xlu0 %v321_v20, %s3564_s19 }
  0x40   : > { %351 = vrot.lane.b32.xlu1 %v324_v23, %s3564_s19  ;;  %349 = vrot.lane.b32.xlu0 %v323_v24, %s3564_s19 }
  0x44   : > { %395 = vrot.lane.b32.xlu1 %v3739_v17, %s3563_s18  ;;  %393 = vrot.lane.b32.xlu0 %v3742_v18, %s3563_s18 }
  0x48   : > { %399 = vrot.lane.b32.xlu1 %v3751_v21, %s3563_s18  ;;  %397 = vrot.lane.b32.xlu0 %v3754_v22, %s3563_s18 }
  0x4c   : > { %355 = vrot.lane.b32.xlu1 %v326_v27, %s3564_s19  ;;  %353 = vrot.lane.b32.xlu0 %v325_v28, %s3564_s19 }
  0x50   : > { %359 = vrot.lane.b32.xlu1 %v328_v31, %s3564_s19  ;;  %357 = vrot.lane.b32.xlu0 %v327_v32, %s3564_s19 }
  0x54   : > { %403 = vrot.lane.b32.xlu1 %v3775_v25, %s3563_s18  ;;  %401 = vrot.lane.b32.xlu0 %v3778_v26, %s3563_s18 }
  0x58   : > { %407 = vrot.lane.b32.xlu1 %v3787_v29, %s3563_s18  ;;  %405 = vrot.lane.b32.xlu0 %v3790_v30, %s3563_s18  ;;  %s6149_s18 = scalar_lea.vmem [#allocation2], %s3009_s14 }
  0x59   : > { %s2943_s16 = sshll.u32 %s6149_s18, 4  ;;  %s6547_s16 = int_to_ptr.vmem [resolvable:$true] %s2943_s16 }
  0x5a   : > { %s3498_s28 = scalar_lea.vmem %s6547_s16, 2048  ;;  %p3505_p0 = scmp.lt.s32.totalorder %s6547_s16, %s3503_s23 }
  0x5b   : > { %p3499_p11 = scmp.ne.s32.totalorder %s6547_s16, %s3498_s28  ;;  %p3506_p1 = scmp.lt.s32.totalorder %s3504_s29, %s3498_s28 }
  0x5d   : > { %p3500_p12 = pnand %p3499_p11, %p3654_p5  ;;  %p3507_p2 = por %p3506_p1, %p3505_p0 }
  0x5f   : > { %p3501_p13 = pneg %p3500_p12 }
  0x61   : > { %p3508_p3 = pnand %p3507_p2, %p3501_p13 }
  0x8e   : > { %v380_v45 = vpop.permute.xlu1 %379  ;;  %v378_v46 = vpop.permute.xlu0 %377 }
  0x92   : > { %v334_v47 = vpop.permute.xlu1 %333  ;;  %v330_v48 = vpop.permute.xlu0 %329 }
  0x93   : > { %v361_v49 = vadd.s32 %v330_v48, %v313_v5  ;;  %v363_v60 = vadd.s32 %v334_v47, %v315_v4 }
  0x95   : > { %v409_v50 = vadd.s32 %v378_v46, %v361_v49 }
  0x96   : > { %v336_v51 = vpop.permute.xlu1 %335  ;;  %v332_v52 = vpop.permute.xlu0 %331 }
  0x97   : > { %v364_v53 = vadd.s32 %v336_v51, %v316_v7  ;;  %v362_v54 = vadd.s32 %v332_v52, %v314_v8  ;;  %428 = vperm.xlu0 %3378, %v409_v50  }
  0x99   : > { %v410_v57 = vadd.s32 %v380_v45, %v362_v54 }
  0x9a   : > { %v384_v58 = vpop.permute.xlu1 %383  ;;  %v382_v59 = vpop.permute.xlu0 %381 }
  0x9b   : > { %v412_v61 = vadd.s32 %v384_v58, %v364_v53  ;;  %431 = vperm.xlu1 %3379, %v410_v57   ;;  %v411_v0 = vadd.s32 %v382_v59, %v363_v60 }
  0x9d   : > { %437 = vperm.xlu0 %3378, %v412_v61  }
  0x9e   : > { %v340_v5 = vpop.permute.xlu1 %339  ;;  %v338_v7 = vpop.permute.xlu0 %337 }
  0x9f   : > { %434 = vperm.xlu1 %3379, %v411_v0   ;;  %v366_v33 = vadd.s32 %v340_v5, %v318_v11  ;;  %v365_v34 = vadd.s32 %v338_v7, %v317_v12 }
  0xa2   : > { %v344_v4 = vpop.permute.xlu1 %343  ;;  %v342_v8 = vpop.permute.xlu0 %341 }
  0xa3   : > { %v368_v39 = vadd.s32 %v344_v4, %v320_v15  ;;  %v367_v40 = vadd.s32 %v342_v8, %v319_v16 }
  0xa6   : > { %v388_v35 = vpop.permute.xlu1 %387  ;;  %v386_v36 = vpop.permute.xlu0 %385 }
  0xa7   : > { %v414_v37 = vadd.s32 %v388_v35, %v366_v33  ;;  %v413_v38 = vadd.s32 %v386_v36, %v365_v34  ;;  %v3565_v33 = vmov 0   ;;  %v299_v34 = vcvt.s32.f32 %v3677_v3 }
  0xa8   : > { %v312_v35 = vcvt.s32.f32 %v3787_v29  ;;  %v302_v36 = vcvt.s32.f32 %v3697_v9  ;;  %v306_v3 = vcvt.s32.f32 %v3739_v17  ;;  %v307_v29 = vcvt.s32.f32 %v3754_v22 }
  0xa9   : > { %443 = vperm.xlu0 %3378, %v414_v37   ;;  %440 = vperm.xlu1 %3379, %v413_v38   ;;  %v311_v9 = vcvt.s32.f32 %v3790_v30 }
  0xaa   : > { %v392_v41 = vpop.permute.xlu1 %391  ;;  %v390_v42 = vpop.permute.xlu0 %389 }
  0xab   : > { %v416_v43 = vadd.s32 %v392_v41, %v368_v39  ;;  %v415_v44 = vadd.s32 %v390_v42, %v367_v40  ;;  %v3566_v39 = vmov 1.0|1.0  }
  0xad   : > { %449 = vperm.xlu0 %3378, %v416_v43   ;;  %446 = vperm.xlu1 %3379, %v415_v44  }
  0xae   : > { %v348_v11 = vpop.permute.xlu1 %347  ;;  %v346_v12 = vpop.permute.xlu0 %345 }
  0xaf   : > { %v370_v47 = vadd.s32 %v348_v11, %v322_v19  ;;  %v369_v15 = vadd.s32 %v346_v12, %v321_v20 }
  0xb2   : > { %v352_v45 = vpop.permute.xlu1 %351  ;;  %v350_v46 = vpop.permute.xlu0 %349 }
  0xb3   : > { %v372_v51 = vadd.s32 %v352_v45, %v324_v23  ;;  %v371_v52 = vadd.s32 %v350_v46, %v323_v24 }
  0xb6   : > { %v396_v48 = vpop.permute.xlu1 %395  ;;  %v394_v16 = vpop.permute.xlu0 %393 }
  0xb7   : > { %v418_v49 = vadd.s32 %v396_v48, %v370_v47  ;;  %v417_v50 = vadd.s32 %v394_v16, %v369_v15  ;;  %v3913_v47 = vld [vmem:[%s6598_s5] ss:$0 sm:$0xff] }
  0xb8   : > { %v3919_v16 = vld [vmem:[%s6599_s6] ss:$0 sm:$0xff] }
  0xb9   : > { %455 = vperm.xlu0 %3378, %v418_v49   ;;  %452 = vperm.xlu1 %3379, %v417_v50  }
  0xba   : > { %v400_v53 = vpop.permute.xlu1 %399  ;;  %v398_v54 = vpop.permute.xlu0 %397 }
  0xbb   : > { %v420_v55 = vadd.s32 %v400_v53, %v372_v51  ;;  %v419_v56 = vadd.s32 %v398_v54, %v371_v52 }
  0xbd   : > { %461 = vperm.xlu0 %3378, %v420_v55   ;;  %458 = vperm.xlu1 %3379, %v419_v56  }
  0xbe   : > { %v356_v19 = vpop.permute.xlu1 %355  ;;  %v354_v20 = vpop.permute.xlu0 %353 }
  0xbf   : > { %v374_v59 = vadd.s32 %v356_v19, %v326_v27  ;;  %v373_v23 = vadd.s32 %v354_v20, %v325_v28  ;;  %v297_v27 = vcvt.s32.f32 %v3674_v2  ;;  %v305_v28 = vcvt.s32.f32 %v3742_v18 }
  0xc0   : > { %v300_v2 = vcvt.s32.f32 %v3686_v6  ;;  %v301_v18 = vcvt.s32.f32 %v3700_v10  ;;  %v308_v6 = vcvt.s32.f32 %v3751_v21  ;;  %v309_v10 = vcvt.s32.f32 %v3778_v26 }
  0xc2   : > { %v360_v57 = vpop.permute.xlu1 %359  ;;  %v358_v58 = vpop.permute.xlu0 %357 }
  0xc3   : > { %v376_v63 = vadd.s32 %v360_v57, %v328_v31  ;;  %v375_v0 = vadd.s32 %v358_v58, %v327_v32  ;;  %v298_v31 = vcvt.s32.f32 %v3671_v1  ;;  %v310_v32 = vcvt.s32.f32 %v3775_v25 }
  0xc4   : > { %v303_v1 = vcvt.s32.f32 %v3718_v14  ;;  %v304_v25 = vcvt.s32.f32 %v3715_v13  ;;  %v425_v14 = vlaneseq }
  0xc6   : > { %v404_v60 = vpop.permute.xlu1 %403  ;;  %v402_v24 = vpop.permute.xlu0 %401  ;;  %v426_v37 = vand.u32 127, %v425_v14 }
  0xc7   : > { %v422_v61 = vadd.s32 %v404_v60, %v374_v59  ;;  %v421_v62 = vadd.s32 %v402_v24, %v373_v23  ;;  %v6616_v24 = vmov 2102212464  }
  0xc9   : > { %467 = vperm.xlu0 %3378, %v422_v61   ;;  %464 = vperm.xlu1 %3379, %v421_v62   ;;  %v6611_v62 = vmov 920167782  }
  0xca   : > { %v408_v5 = vpop.permute.xlu1 %407  ;;  %v406_v7 = vpop.permute.xlu0 %405 }
  0xcb   : > { %v424_v4 = vadd.s32 %v408_v5, %v376_v63  ;;  %v423_v8 = vadd.s32 %v406_v7, %v375_v0 }
  0xcd   : > { %473 = vperm.xlu0 %3378, %v424_v4   ;;  %470 = vperm.xlu1 %3379, %v423_v8   ;;  %v6609_v4 = vmov 1326507024  }
  0xd1   : > { %3380 = vset.pattern.permute.xlu0 %v3565_v33  ;;  %3381 = vset.pattern.permute.xlu1 %v3565_v33  ;;  %v6605_v33 = vmov 2475754826  }
  0xd2   : > { %1110 = vperm.xlu0 %3380, %v297_v27   ;;  %1150 = vperm.xlu1 %3381, %v305_v28   ;;  %v6614_v27 = vmov 683565275  }
  0xd6   : > { %1115 = vperm.xlu0 %3380, %v298_v31   ;;  %1175 = vperm.xlu1 %3381, %v310_v32  }
  0xda   : > { %1120 = vperm.xlu0 %3380, %v299_v34   ;;  %1185 = vperm.xlu1 %3381, %v312_v35  }
  0xde   : > { %1125 = vperm.xlu0 %3380, %v300_v2   ;;  %v6607_v2 = vmov 2131351028  }
  0xe2   : > { %1130 = vperm.xlu0 %3380, %v301_v18  }
  0xe6   : > { %1135 = vperm.xlu0 %3380, %v302_v36  }
  0xea   : > { %1140 = vperm.xlu0 %3380, %v303_v1  }
  0xee   : > { %1145 = vperm.xlu0 %3380, %v304_v25  }
  0xf2   : > { %1155 = vperm.xlu0 %3380, %v306_v3  }
  0xf6   : > { %1160 = vperm.xlu0 %3380, %v307_v29  }
  0xfa   : > { %1165 = vperm.xlu0 %3380, %v308_v6  }
  0xfe   : > { %1170 = vperm.xlu0 %3380, %v309_v10  }
 0x102   : > { %1180 = vperm.xlu0 %3380, %v311_v9  }
 0x116   : > { %v429_v38 = vpop.permute.xlu0 %428 }
 0x117   : > { %vm475_vm0 = vcmp.eq.s32.totalorder %v429_v38, %v426_v37 }
 0x11a   : > { %v432_v13 = vpop.permute.xlu1 %431 }
 0x11b   : > { %vm476_vm1 = vcmp.eq.s32.totalorder %v432_v13, %v426_v37 }
 0x11c   : > { %v438_v17 = vpop.permute.xlu0 %437  ;;  %vm3036_vm2 = vmpackc.low %vm476_vm1, %vm475_vm0 }
 0x11d   : > { %3198 = vmatprep.mubr.msk.bf16.mxu1 %vm3036_vm2, %v3566_v39  ;;  %3230 = vmatprep.mubr.msk.bf16.mxu0 %vm3036_vm2, %v3566_v39  ;;  %vm478_vm3 = vcmp.eq.s32.totalorder %v438_v17, %v426_v37 }
 0x11e   : > { %v435_v22 = vpop.permute.xlu1 %434 }
 0x11f   : > { %vm477_vm4 = vcmp.eq.s32.totalorder %v435_v22, %v426_v37 }
 0x120   : > { %vm3038_vm5 = vmpackc.low %vm478_vm3, %vm477_vm4 }
 0x121   : > { %3199 = vmatmul.mubr.msk.bf16.vlgmr.msra.gmra.mrb[0].mxu1 %vm3038_vm5, %v3566_v39  ;;  %3231 = vmatmul.mubr.msk.bf16.vlgmr.msra.gmra.mrb[0].mxu0 %vm3038_vm5, %v3566_v39 }
 0x128   : > { %v441_v21 = vpop.permute.xlu1 %440  ;;  %v444_v26 = vpop.permute.xlu0 %443 }
 0x129   : > { %vm479_vm6 = vcmp.eq.s32.totalorder %v441_v21, %v426_v37  ;;  %vm480_vm7 = vcmp.eq.s32.totalorder %v444_v26, %v426_v37 }
 0x12a   : > { %vm3040_vm8 = vmpackc.low %vm480_vm7, %vm479_vm6 }
 0x12b   : > { %3202 = vmatprep.mubr.msk.bf16.mxu1 %vm3040_vm8, %v3566_v39  ;;  %3234 = vmatprep.mubr.msk.bf16.mxu0 %vm3040_vm8, %v3566_v39 }
 0x12c   : > { %v447_v30 = vpop.permute.xlu1 %446  ;;  %v450_v40 = vpop.permute.xlu0 %449 }
 0x12d   : > { %vm481_vm9 = vcmp.eq.s32.totalorder %v447_v30, %v426_v37  ;;  %vm482_vm10 = vcmp.eq.s32.totalorder %v450_v40, %v426_v37 }
 0x12e   : > { %vm3042_vm11 = vmpackc.low %vm482_vm10, %vm481_vm9 }
 0x12f   : > { %3203 = vmatmul.mubr.msk.bf16.gmra.mrb[4].mxu1 %vm3042_vm11, %v3566_v39  ;;  %3235 = vmatmul.mubr.msk.bf16.gmra.mrb[4].mxu0 %vm3042_vm11, %v3566_v39 }
 0x138   : > { %v453_v41 = vpop.permute.xlu1 %452  ;;  %v456_v42 = vpop.permute.xlu0 %455 }
 0x139   : > { %vm483_vm12 = vcmp.eq.s32.totalorder %v453_v41, %v426_v37  ;;  %vm484_vm13 = vcmp.eq.s32.totalorder %v456_v42, %v426_v37 }
 0x13a   : > { %vm3044_vm14 = vmpackc.low %vm484_vm13, %vm483_vm12 }
 0x13b   : > { %3206 = vmatprep.mubr.msk.bf16.mxu1 %vm3044_vm14, %v3566_v39  ;;  %3238 = vmatprep.mubr.msk.bf16.mxu0 %vm3044_vm14, %v3566_v39 }
 0x13c   : > { %v459_v43 = vpop.permute.xlu1 %458  ;;  %v462_v44 = vpop.permute.xlu0 %461 }
 0x13d   : > { %vm485_vm15 = vcmp.eq.s32.totalorder %v459_v43, %v426_v37  ;;  %vm486_vm0 = vcmp.eq.s32.totalorder %v462_v44, %v426_v37 }
 0x13e   : > { %vm3046_vm1 = vmpackc.low %vm486_vm0, %vm485_vm15 }
 0x13f   : > { %3207 = vmatmul.mubr.msk.bf16.gmra.mrb[8].mxu1 %vm3046_vm1, %v3566_v39  ;;  %3239 = vmatmul.mubr.msk.bf16.gmra.mrb[8].mxu0 %vm3046_vm1, %v3566_v39 }
 0x148   : > { %v465_v11 = vpop.permute.xlu1 %464  ;;  %v468_v12 = vpop.permute.xlu0 %467 }
 0x149   : > { %vm487_vm2 = vcmp.eq.s32.totalorder %v465_v11, %v426_v37  ;;  %vm488_vm3 = vcmp.eq.s32.totalorder %v468_v12, %v426_v37 }
 0x14a   : > { %vm3048_vm4 = vmpackc.low %vm488_vm3, %vm487_vm2 }
 0x14b   : > { %3210 = vmatprep.mubr.msk.bf16.mxu1 %vm3048_vm4, %v3566_v39  ;;  %3242 = vmatprep.mubr.msk.bf16.mxu0 %vm3048_vm4, %v3566_v39 }
 0x14c   : > { %v471_v45 = vpop.permute.xlu1 %470  ;;  %v474_v46 = vpop.permute.xlu0 %473 }
 0x14d   : > { %vm489_vm5 = vcmp.eq.s32.totalorder %v471_v45, %v426_v37  ;;  %vm490_vm6 = vcmp.eq.s32.totalorder %v474_v46, %v426_v37 }
 0x14e   : > { %vm3050_vm7 = vmpackc.low %vm490_vm6, %vm489_vm5 }
 0x14f   : > { %3211 = vmatmul.mubr.msk.bf16.gmra.mrb[12].mxu1 %vm3050_vm7, %v3566_v39  ;;  %3243 = vmatmul.mubr.msk.bf16.gmra.mrb[12].mxu0 %vm3050_vm7, %v3566_v39 }
 0x151   : > { %v1111_v15 = vpop.permute.xlu0 %1110 }
 0x152   : > { %v1194_v48 = vmul.f32 %v3913_v47, %v1111_v15 }
 0x154   : > { %v3922_v49 = vadd.f32 %v3919_v16, %v1194_v48 }
 0x155   : > { %v1116_v54 = vpop.permute.xlu0 %1115 }
 0x156   : > { %v1236_v50 = vand.u32 2139095040, %v3922_v49  ;;  %v1195_v55 = vmul.f32 %v3913_v47, %v1116_v54  ;;  %v6604_v0 = vand.u32 2147483647, %v3922_v49 }
 0x158   : > { %v1237_v51 = vshrl.u32 %v1236_v50, 23  ;;  %v3927_v19 = vadd.f32 %v3919_v16, %v1195_v55  ;;  %v1240_v3 = vand.u32 8388607, %v6604_v0 }
 0x159   : > { %v1121_v59 = vpop.permute.xlu0 %1120 }
 0x15a   : > { %v3080_v52 = vadd.s32 4294967169, %v1237_v51  ;;  %v1340_v57 = vand.u32 2139095040, %v3927_v19  ;;  %v1196_v60 = vmul.f32 %v3913_v47, %v1121_v59  ;;  %v1241_v13 = vor.u32 8388608, %v1240_v3 }
 0x15c   : > { %v1243_v53 = vadd.s32 1, %v3080_v52  ;;  %v1341_v23 = vshrl.u32 %v1340_v57, 23  ;;  %v3939_v34 = vadd.f32 %v3919_v16, %v1196_v60  ;;  %v1281_v40 = vshll.u32 %v1241_v13, 8 }
 0x15d   : > { %v6603_v52 = vand.u32 2147483647, %v3927_v19 }
 0x15e   : > { %vm1244_vm8 = vcmp.gt.s32.totalorder %v1243_v53, 0  ;;  %v3084_v32 = vadd.s32 4294967169, %v1341_v23  ;;  %6694 = vst [vmem:[#allocation5_spill] sm:$0xff] %v3939_v34  ;;  %v1444_v10 = vand.u32 2139095040, %v3939_v34 }
 0x15f   : > { %v1245_v56 = vsel %vm1244_vm8, %v1243_v53, 0 }
 0x160   : > { %v1247_v20 = vand.u32 31, %v1245_v56  ;;  %v1246_v5 = vshrl.u32 %v1245_v56, 5  ;;  %v1347_v6 = vadd.s32 1, %v3084_v32  ;;  %v1445_v39 = vshrl.u32 %v1444_v10, 23 }
 0x161   : > { %v1344_v56 = vand.u32 8388607, %v6603_v52 }
 0x162   : > { %v1248_v58 = vsub.s32 32, %v1247_v20  ;;  %v1259_v61 = vshll.u32 %v6616_v24, %v1247_v20  ;;  %v1262_v7 = vshll.u32 %v6611_v62, %v1247_v20  ;;  %v1250_v28 = vshll.u32 %v6614_v27, %v1247_v20 }
 0x163   : > { %v1253_v31 = vshll.u32 %v6605_v33, %v1247_v20  ;;  %v1256_v36 = vshll.u32 %v6607_v2, %v1247_v20  ;;  %vm1268_vm9 = vcmp.lt.s32.totalorder %v1246_v5, 4  ;;  %vm1265_vm10 = vcmp.lt.s32.totalorder %v1246_v5, 1  ;;  %v1126_v20 = vpop.permute.xlu0 %1125 }
 0x164   : > { %v1260_v63 = vshrl.u32 %v6611_v62, %v1248_v58  ;;  %v1263_v8 = vshrl.u32 %v6609_v4, %v1248_v58  ;;  %v1251_v35 = vshrl.u32 %v6605_v33, %v1248_v58  ;;  %v1254_v18 = vshrl.u32 %v6607_v2, %v1248_v58 }
 0x165   : > { %v1257_v1 = vshrl.u32 %v6616_v24, %v1248_v58  ;;  %vm1267_vm11 = vcmp.lt.s32.totalorder %v1246_v5, 3  ;;  %vm1348_vm12 = vcmp.gt.s32.totalorder %v1347_v6, 0  ;;  %vm1266_vm13 = vcmp.lt.s32.totalorder %v1246_v5, 2 }
 0x166   : > { %v1261_v25 = vor.u32 %v1260_v63, %v1259_v61  ;;  %v1264_v29 = vor.u32 %v1263_v8, %v1262_v7  ;;  %v1252_v9 = vor.u32 %v1251_v35, %v1250_v28  ;;  %v1255_v14 = vor.u32 %v1254_v18, %v1253_v31 }
 0x167   : > { %v1258_v37 = vor.u32 %v1257_v1, %v1256_v36  ;;  %v1349_v41 = vsel %vm1348_vm12, %v1347_v6, 0  ;;  %v3088_v43 = vadd.s32 4294967169, %v1445_v39  ;;  %v1249_v46 = vshrl.u32 %v6614_v27, %v1248_v58 }
 0x168   : > { %v1274_v38 = vsel %vm1268_vm9, %v1261_v25, 920167782  ;;  %v1278_v17 = vsel %vm1268_vm9, %v1264_v29, 1326507024  ;;  %v1273_v22 = vsel %vm1265_vm10, %v1252_v9, %v1255_v14  ;;  %v1351_v11 = vand.u32 31, %v1349_v41 }
 0x169   : > { %v1275_v21 = vsel %vm1267_vm11, %v1258_v37, %v1274_v38  ;;  %v1277_v26 = vsel %vm1265_vm10, %v1255_v14, %v1258_v37  ;;  %v1279_v30 = vsel %vm1267_vm11, %v1261_v25, %v1278_v17  ;;  %v1451_v50 = vadd.s32 1, %v3088_v43 }
 0x16a   : > { %v1276_v42 = vsel %vm1266_vm13, %v1273_v22, %v1275_v21  ;;  %v1280_v44 = vsel %vm1266_vm13, %v1277_v26, %v1279_v30  ;;  %v1270_v51 = vsel %vm1268_vm9, %v1258_v37, 2102212464  ;;  %v3966_v53 = vsub.s32 32, %v1351_v11 }
 0x16b   : > { %v3956_v12 = vmul.u32.u64.low %v1281_v40, %v1276_v42  ;;  %v3957_v45 = vmul.u32.u64.high %v1281_v40, %v1276_v42, %v3956_v12  ;;  %v3961_v15 = vmul.u32.u64.low %v1281_v40, %v1280_v44  ;;  %v3962_v48 = vmul.u32.u64.high %v1281_v40, %v1280_v44, %v3961_v15 }
 0x16c   : > { %v1269_v54 = vsel %vm1265_vm10, %v1249_v46, %v1252_v9  ;;  %v1271_v55 = vsel %vm1267_vm11, %v1255_v14, %v1270_v51  ;;  %vm1452_vm14 = vcmp.gt.s32.totalorder %v1451_v50, 0  ;;  %v3972_v57 = vshrl.u32 %v1349_v41, 5 }
 0x16d   : > { %v1363_v58 = vshll.u32 %v6616_v24, %v1351_v11  ;;  %v1364_v59 = vshrl.u32 %v6611_v62, %v3966_v53  ;;  %v1197_v23 = vmul.f32 %v3913_v47, %v1126_v20  ;;  %v1272_v60 = vsel %vm1266_vm13, %v1269_v54, %v1271_v55 }
 0x16e   : > { %v1291_v61 = vadd.s32 1, %v3957_v45  ;;  %v1354_v63 = vshll.u32 %v6614_v27, %v1351_v11  ;;  %v1453_v7 = vsel %vm1452_vm14, %v1451_v50, 0  ;;  %vm1290_vm15 = vc.u32 %v3962_v48, %v3956_v12 }
 0x16f   : > { %v1357_v8 = vshll.u32 %v6605_v33, %v1351_v11  ;;  %v1360_v28 = vshll.u32 %v6607_v2, %v1351_v11  ;;  %v1366_v31 = vshll.u32 %v6611_v62, %v1351_v11  ;;  %v1355_v32 = vshrl.u32 %v6605_v33, %v3966_v53 }
 0x170   : > { %v1358_v5 = vshrl.u32 %v6607_v2, %v3966_v53  ;;  %v1361_v35 = vshrl.u32 %v6616_v24, %v3966_v53  ;;  %v1367_v18 = vshrl.u32 %v6609_v4, %v3966_v53  ;;  %v1288_v36 = vmul.u32 %v1281_v40, %v1272_v60 }
 0x171   : > { %v1365_v1 = vor.u32 %v1364_v59, %v1363_v58  ;;  %v1455_v25 = vand.u32 31, %v1453_v7  ;;  %v1292_v3 = vsel %vm1290_vm15, %v1291_v61, %v3957_v45  ;;  %vm1372_vm0 = vcmp.lt.s32.totalorder %v3972_v57, 4 }
 0x172   : > { %v3997_v29 = vadd.f32 %v3919_v16, %v1197_v23  ;;  %v1345_v6 = vor.u32 8388608, %v1344_v56  ;;  %vm1369_vm1 = vcmp.lt.s32.totalorder %v3972_v57, 1  ;;  %v1356_v10 = vor.u32 %v1355_v32, %v1354_v63 }
 0x173   : > { %v1359_v9 = vor.u32 %v1358_v5, %v1357_v8  ;;  %v1362_v14 = vor.u32 %v1361_v35, %v1360_v28  ;;  %v1368_v37 = vor.u32 %v1367_v18, %v1366_v31  ;;  %v4000_v38 = vadd.s32 %v1292_v3, %v1288_v36 }
 0x174   : > { %vm1371_vm2 = vcmp.lt.s32.totalorder %v3972_v57, 3  ;;  %v1378_v13 = vsel %vm1372_vm0, %v1365_v1, 920167782  ;;  %v4005_v17 = vsub.s32 32, %v1455_v25  ;;  %v1548_v39 = vand.u32 2139095040, %v3997_v29 }
 0x175   : > { %v4008_v22 = vshll.u32 %v1345_v6, 8  ;;  %v6602_v21 = vand.u32 2147483647, %v3939_v34  ;;  %vm1370_vm3 = vcmp.lt.s32.totalorder %v3972_v57, 2  ;;  %v1377_v26 = vsel %vm1369_vm1, %v1356_v10, %v1359_v9 }
 0x176   : > { %v1379_v30 = vsel %vm1371_vm2, %v1362_v14, %v1378_v13  ;;  %v1382_v40 = vsel %vm1372_vm0, %v1368_v37, 1326507024  ;;  %v1294_v41 = vadd.s32 536870912, %v4000_v38  ;;  %v1381_v42 = vsel %vm1369_vm1, %v1359_v9, %v1362_v14  ;;  %v1131_v37 = vpop.permute.xlu0 %1130 }
 0x177   : > { %v1467_v43 = vshll.u32 %v6616_v24, %v1455_v25  ;;  %v1468_v44 = vshrl.u32 %v6611_v62, %v4005_v17  ;;  %v4024_v11 = vshrl.u32 %v1453_v7, 5  ;;  %v1470_v45 = vshll.u32 %v6611_v62, %v1455_v25 }
 0x178   : > { %v1471_v46 = vshrl.u32 %v6609_v4, %v4005_v17  ;;  %v1549_v15 = vshrl.u32 %v1548_v39, 23  ;;  %v1380_v50 = vsel %vm1370_vm3, %v1377_v26, %v1379_v30  ;;  %v1383_v51 = vsel %vm1371_vm2, %v1365_v1, %v1382_v40 }
 0x179   : > { %v1458_v54 = vshll.u32 %v6614_v27, %v1455_v25  ;;  %v1459_v55 = vshrl.u32 %v6605_v33, %v4005_v17  ;;  %v1461_v56 = vshll.u32 %v6605_v33, %v1455_v25  ;;  %v1462_v20 = vshrl.u32 %v6607_v2, %v4005_v17 }
 0x17a   : > { %v1464_v58 = vshll.u32 %v6607_v2, %v1455_v25  ;;  %v1465_v59 = vshrl.u32 %v6616_v24, %v4005_v17  ;;  %v1448_v23 = vand.u32 8388607, %v6602_v21  ;;  %v1469_v60 = vor.u32 %v1468_v44, %v1467_v43 }
 0x17b   : > { %v1472_v61 = vor.u32 %v1471_v46, %v1470_v45  ;;  %vm1476_vm4 = vcmp.lt.s32.totalorder %v4024_v11, 4  ;;  %v3092_v63 = vadd.s32 4294967169, %v1549_v15  ;;  %v1353_v7 = vshrl.u32 %v6614_v27, %v3966_v53 }
 0x17c   : > { %v1384_v8 = vsel %vm1370_vm3, %v1381_v42, %v1383_v51  ;;  %v4050_v28 = vmul.u32.u64.low %v4008_v22, %v1380_v50  ;;  %v4051_v31 = vmul.u32.u64.high %v4008_v22, %v1380_v50, %v4050_v28  ;;  %v4054_v32 = vshrl.u32 %v1294_v41, 30 }
 0x17d   : > { %v1460_v5 = vor.u32 %v1459_v55, %v1458_v54  ;;  %v1463_v35 = vor.u32 %v1462_v20, %v1461_v56  ;;  %v1466_v18 = vor.u32 %v1465_v59, %v1464_v58  ;;  %v1449_v36 = vor.u32 8388608, %v1448_v23 }
 0x17e   : > { %vm1473_vm5 = vcmp.lt.s32.totalorder %v4024_v11, 1  ;;  %vm1475_vm6 = vcmp.lt.s32.totalorder %v4024_v11, 3  ;;  %v1482_v53 = vsel %vm1476_vm4, %v1469_v60, 920167782  ;;  %v1486_v3 = vsel %vm1476_vm4, %v1472_v61, 1326507024 }
 0x17f   : > { %v4061_v1 = vmul.u32.u64.low %v4008_v22, %v1384_v8  ;;  %v4062_v25 = vmul.u32.u64.high %v4008_v22, %v1384_v8, %v4061_v1  ;;  %v1555_v6 = vadd.s32 1, %v3092_v63  ;;  %v1374_v13 = vsel %vm1372_vm0, %v1362_v14, 2102212464 }
 0x180   : > { %v1198_v39 = vmul.f32 %v3913_v47, %v1131_v37  ;;  %v1296_v26 = vshll.u32 %v4054_v32, 30  ;;  %vm1474_vm7 = vcmp.lt.s32.totalorder %v4024_v11, 2  ;;  %v1481_v30 = vsel %vm1473_vm5, %v1460_v5, %v1463_v35 }
 0x181   : > { %v1483_v40 = vsel %vm1475_vm6, %v1466_v18, %v1482_v53  ;;  %v1485_v41 = vsel %vm1473_vm5, %v1463_v35, %v1466_v18  ;;  %v1487_v42 = vsel %vm1475_vm6, %v1469_v60, %v1486_v3  ;;  %v1373_v14 = vsel %vm1369_vm1, %v1353_v7, %v1356_v10 }
 0x182   : > { %v1375_v43 = vsel %vm1371_vm2, %v1359_v9, %v1374_v13  ;;  %v1489_v44 = vshll.u32 %v1449_v36, 8  ;;  %vm1556_vm8 = vcmp.gt.s32.totalorder %v1555_v6, 0  ;;  %v1484_v45 = vsel %vm1474_vm7, %v1481_v30, %v1483_v40 }
 0x183   : > { %v4086_v46 = vadd.f32 %v3919_v16, %v1198_v39  ;;  %v4089_v15 = vsub.s32 %v4000_v38, %v1296_v26  ;;  %v1488_v50 = vsel %vm1474_vm7, %v1485_v41, %v1487_v42  ;;  %v1376_v10 = vsel %vm1370_vm3, %v1373_v14, %v1375_v43 }
 0x184   : > { %v1395_v51 = vadd.s32 1, %v4051_v31  ;;  %v1557_v9 = vsel %vm1556_vm8, %v1555_v6, 0  ;;  %vm1394_vm9 = vc.u32 %v4062_v25, %v4050_v28  ;;  %v1457_v38 = vshrl.u32 %v6614_v27, %v4005_v17 }
 0x185   : > { %6695 = vst [vmem:[#allocation6_spill] sm:$0xff] %v4086_v46  ;;  %v4098_v54 = vmul.u32.u64.low %v1489_v44, %v1484_v45  ;;  %v4099_v55 = vmul.u32.u64.high %v1489_v44, %v1484_v45, %v4098_v54  ;;  %v4104_v56 = vmul.u32.u64.low %v1489_v44, %v1488_v50  ;;  %v4105_v20 = vmul.u32.u64.high %v1489_v44, %v1488_v50, %v4104_v56 }
 0x186   : > { %v1652_v58 = vand.u32 2139095040, %v4086_v46  ;;  %v1299_v57 = vsub.s32 0, %v4089_v15  ;;  %v1392_v59 = vmul.u32 %v4008_v22, %v1376_v10  ;;  %v1478_v23 = vsel %vm1476_vm4, %v1466_v18, 2102212464 }
 0x187   : > { %v1559_v60 = vand.u32 31, %v1557_v9  ;;  %v1396_v61 = vsel %vm1394_vm9, %v1395_v51, %v4051_v31  ;;  %v1477_v63 = vsel %vm1473_vm5, %v1457_v38, %v1460_v5  ;;  %v1479_v17 = vsel %vm1475_vm6, %v1463_v35, %v1478_v23 }
 0x188   : > { %v1653_v7 = vshrl.u32 %v1652_v58, 23  ;;  %v3081_v8 = vmin.u32 %v1299_v57, %v4089_v15  ;;  %v4118_v36 = vadd.s32 %v1396_v61, %v1392_v59  ;;  %v1480_v22 = vsel %vm1474_vm7, %v1477_v63, %v1479_v17 }
 0x189   : > { %v4120_v53 = vsub.s32 32, %v1559_v60  ;;  %v1499_v18 = vadd.s32 1, %v4099_v55  ;;  %vm1498_vm10 = vc.u32 %v4105_v20, %v4098_v54  ;;  %v6601_v31 = vand.u32 2147483647, %v3997_v29 }
 0x18a   : > { %v3096_v5 = vadd.s32 4294967169, %v1653_v7  ;;  %v1301_v1 = vclz %v3081_v8  ;;  %v1398_v35 = vadd.s32 536870912, %v4118_v36  ;;  %v1571_v3 = vshll.u32 %v6616_v24, %v1559_v60 }
 0x18b   : > { %v1572_v6 = vshrl.u32 %v6611_v62, %v4120_v53  ;;  %v1496_v37 = vmul.u32 %v1489_v44, %v1480_v22  ;;  %v4132_v13 = vshrl.u32 %v1557_v9, 5  ;;  %v1574_v11 = vshll.u32 %v6611_v62, %v1559_v60 }
 0x18c   : > { %v1575_v39 = vshrl.u32 %v6609_v4, %v4120_v53  ;;  %v1500_v26 = vsel %vm1498_vm10, %v1499_v18, %v4099_v55  ;;  %v1562_v30 = vshll.u32 %v6614_v27, %v1559_v60  ;;  %v1565_v40 = vshll.u32 %v6605_v33, %v1559_v60 }
 0x18d   : > { %v1568_v41 = vshll.u32 %v6607_v2, %v1559_v60  ;;  %v1563_v43 = vshrl.u32 %v6605_v33, %v4120_v53  ;;  %v1566_v44 = vshrl.u32 %v6607_v2, %v4120_v53  ;;  %v1569_v45 = vshrl.u32 %v6616_v24, %v4120_v53 }
 0x18e   : > { %v1659_v50 = vadd.s32 1, %v3096_v5  ;;  %v1573_v9 = vor.u32 %v1572_v6, %v1571_v3  ;;  %v1552_v38 = vand.u32 8388607, %v6601_v31  ;;  %v1576_v56 = vor.u32 %v1575_v39, %v1574_v11  ;;  %v1136_v5 = vpop.permute.xlu0 %1135 }
 0x18f   : > { %vm1580_vm11 = vcmp.lt.s32.totalorder %v4132_v13, 4  ;;  %v3082_v59 = vadd.s32 4294967294, %v1301_v1  ;;  %v4164_v23 = vshrl.u32 %v1398_v35, 30  ;;  %v1501_v60 = vadd.s32 %v1500_v26, %v1496_v37 }
 0x190   : > { %v1564_v63 = vor.u32 %v1563_v43, %v1562_v30  ;;  %v1567_v17 = vor.u32 %v1566_v44, %v1565_v40  ;;  %v1570_v7 = vor.u32 %v1569_v45, %v1568_v41  ;;  %vm1660_vm12 = vcmp.gt.s32.totalorder %v1659_v50, 0 }
 0x191   : > { %vm1577_vm13 = vcmp.lt.s32.totalorder %v4132_v13, 1  ;;  %vm1579_vm14 = vcmp.lt.s32.totalorder %v4132_v13, 3  ;;  %v1586_v8 = vsel %vm1580_vm11, %v1573_v9, 920167782  ;;  %v1553_v22 = vor.u32 8388608, %v1552_v38 }
 0x192   : > { %v1590_v18 = vsel %vm1580_vm11, %v1576_v56, 1326507024  ;;  %vm3083_vm15 = vcmp.lt.s32.totalorder %v3082_v59, 0  ;;  %v1400_v1 = vshll.u32 %v4164_v23, 30  ;;  %v1661_v35 = vsel %vm1660_vm12, %v1659_v50, 0 }
 0x193   : > { %v1199_v3 = vmul.f32 %v3913_v47, %v1136_v5  ;;  %v1502_v6 = vadd.s32 536870912, %v1501_v60  ;;  %vm1578_vm0 = vcmp.lt.s32.totalorder %v4132_v13, 2  ;;  %v1585_v37 = vsel %vm1577_vm13, %v1564_v63, %v1567_v17 }
 0x194   : > { %v1587_v11 = vsel %vm1579_vm14, %v1570_v7, %v1586_v8  ;;  %v1589_v39 = vsel %vm1577_vm13, %v1567_v17, %v1570_v7  ;;  %v1591_v26 = vsel %vm1579_vm14, %v1573_v9, %v1590_v18  ;;  %v4185_v30 = vsel %vm3083_vm15, 0, %v3082_v59 }
 0x195   : > { %v4187_v40 = vshll.u32 %v1553_v22, 8  ;;  %v1663_v41 = vand.u32 31, %v1661_v35  ;;  %v1588_v43 = vsel %vm1578_vm0, %v1585_v37, %v1587_v11  ;;  %v4192_v44 = vadd.f32 %v3919_v16, %v1199_v3 }
 0x196   : > { %v4195_v45 = vsub.s32 %v4118_v36, %v1400_v1  ;;  %v4197_v50 = vshrl.u32 %v1502_v6, 30  ;;  %v1592_v38 = vsel %vm1578_vm0, %v1589_v39, %v1591_v26  ;;  %v1309_v9 = vsub.s32 4294967266, %v4185_v30 }
 0x197   : > { %6698 = vst [vmem:[#allocation9_spill] sm:$0xff] %v4192_v44  ;;  %v1561_v56 = vshrl.u32 %v6614_v27, %v4120_v53  ;;  %v4205_v59 = vmul.u32.u64.low %v4187_v40, %v1588_v43  ;;  %v4206_v8 = vmul.u32.u64.high %v4187_v40, %v1588_v43, %v4205_v59  ;;  %v4209_v22 = vsub.s32 32, %v1663_v41 }
 0x198   : > { %v1582_v36 = vsel %vm1580_vm11, %v1570_v7, 2102212464  ;;  %v4214_v18 = vmul.u32.u64.low %v4187_v40, %v1592_v38  ;;  %v4215_v5 = vmul.u32.u64.high %v4187_v40, %v1592_v38, %v4214_v18  ;;  %v1756_v1 = vand.u32 2139095040, %v4192_v44 }
 0x199   : > { %v1403_v3 = vsub.s32 0, %v4195_v45  ;;  %v1504_v53 = vshll.u32 %v4197_v50, 30  ;;  %v1289_v6 = vadd.s32 %v3956_v12, %v3962_v48  ;;  %v1305_v37 = vsub.s32 32, %v4185_v30 }
 0x19a   : > { %v1310_v11 = vadd.s32 127, %v1309_v9  ;;  %v6613_v39 = vand.u32 2147483647, %v4086_v46  ;;  %v1581_v7 = vsel %vm1577_vm13, %v1561_v56, %v1564_v63  ;;  %v1583_v26 = vsel %vm1579_vm14, %v1567_v17, %v1582_v36 }
 0x19b   : > { %v1675_v43 = vshll.u32 %v6616_v24, %v1663_v41  ;;  %v1676_v38 = vshrl.u32 %v6611_v62, %v4209_v22  ;;  %v4231_v18 = vshrl.u32 %v1661_v35, 5  ;;  %v1678_v12 = vshll.u32 %v6611_v62, %v1663_v41 }
 0x19c   : > { %v1679_v48 = vshrl.u32 %v6609_v4, %v4209_v22  ;;  %v1757_v9 = vshrl.u32 %v1756_v1, 23  ;;  %v3085_v31 = vmin.u32 %v1403_v3, %v4195_v45  ;;  %v4237_v21 = vsub.s32 %v1501_v60, %v1504_v53 }
 0x19d   : > { %v1666_v63 = vshll.u32 %v6614_v27, %v1663_v41  ;;  %v1669_v17 = vshll.u32 %v6605_v33, %v1663_v41  ;;  %v1667_v56 = vshrl.u32 %v6605_v33, %v4209_v22  ;;  %v1670_v35 = vshrl.u32 %v6607_v2, %v4209_v22 }
 0x19e   : > { %v1672_v36 = vshll.u32 %v6607_v2, %v1663_v41  ;;  %v1673_v52 = vshrl.u32 %v6616_v24, %v4209_v22  ;;  %v1584_v1 = vsel %vm1578_vm0, %v1581_v7, %v1583_v26  ;;  %v1603_v60 = vadd.s32 1, %v4206_v8 }
 0x19f   : > { %v1656_v3 = vand.u32 8388607, %v6613_v39  ;;  %v1677_v53 = vor.u32 %v1676_v38, %v1675_v43  ;;  %vm1602_vm1 = vc.u32 %v4215_v5, %v4205_v59  ;;  %v1680_v0 = vor.u32 %v1679_v48, %v1678_v12 }
 0x1a0   : > { %vm1684_vm2 = vcmp.lt.s32.totalorder %v4231_v18, 4  ;;  %v3100_v33 = vadd.s32 4294967169, %v1757_v9  ;;  %v1306_v41 = vshll.u32 %v4089_v15, %v4185_v30  ;;  %v1307_v2 = vshrl.u32 %v1289_v6, %v1305_v37 }
 0x1a1   : > { %v1405_v4 = vclz %v3085_v31  ;;  %v1507_v13 = vsub.s32 0, %v4237_v21  ;;  %v1600_v7 = vmul.u32 %v4187_v40, %v1584_v1  ;;  %v1668_v26 = vor.u32 %v1667_v56, %v1666_v63 }
 0x1a2   : > { %v1671_v62 = vor.u32 %v1670_v35, %v1669_v17  ;;  %v1674_v39 = vor.u32 %v1673_v52, %v1672_v36  ;;  %v1604_v43 = vsel %vm1602_vm1, %v1603_v60, %v4206_v8  ;;  %vm1681_vm3 = vcmp.lt.s32.totalorder %v4231_v18, 1 }
 0x1a3   : > { %vm1683_vm4 = vcmp.lt.s32.totalorder %v4231_v18, 3  ;;  %v1690_v38 = vsel %vm1684_vm2, %v1677_v53, 920167782  ;;  %v1311_v12 = vshll.u32 %v1310_v11, 23  ;;  %v1657_v15 = vor.u32 8388608, %v1656_v3 }
 0x1a4   : > { %v1694_v31 = vsel %vm1684_vm2, %v1680_v0, 1326507024  ;;  %v1763_v30 = vadd.s32 1, %v3100_v33  ;;  %v3086_v6 = vadd.s32 4294967294, %v1405_v4  ;;  %v3089_v40 = vmin.u32 %v1507_v13, %v4237_v21 }
 0x1a5   : > { %v1605_v37 = vadd.s32 %v1604_v43, %v1600_v7  ;;  %vm1682_vm5 = vcmp.lt.s32.totalorder %v4231_v18, 2  ;;  %v1689_v52 = vsel %vm1681_vm3, %v1668_v26, %v1671_v62  ;;  %v1691_v8 = vsel %vm1683_vm4, %v1674_v39, %v1690_v38 }
 0x1a6   : > { %v1693_v11 = vsel %vm1681_vm3, %v1671_v62, %v1674_v39  ;;  %v1695_v48 = vsel %vm1683_vm4, %v1677_v53, %v1694_v31  ;;  %v1308_v0 = vor.u32 %v1307_v2, %v1306_v41  ;;  %v1312_v33 = vor.u32 4788187, %v1311_v12 }
 0x1a7   : > { %v4277_v4 = vshll.u32 %v1657_v15, 8  ;;  %vm1764_vm6 = vcmp.gt.s32.totalorder %v1763_v30, 0  ;;  %v1692_v9 = vsel %vm1682_vm5, %v1689_v52, %v1691_v8  ;;  %vm3087_vm7 = vcmp.lt.s32.totalorder %v3086_v6, 0 }
 0x1a8   : > { %v1509_v63 = vclz %v3089_v40  ;;  %v1606_v17 = vadd.s32 536870912, %v1605_v37  ;;  %v1696_v56 = vsel %vm1682_vm5, %v1693_v11, %v1695_v48  ;;  %v1765_v35 = vsel %vm1764_vm6, %v1763_v30, 0  ;;  %v1141_v11 = vpop.permute.xlu0 %1140 }
 0x1a9   : > { %v1313_v36 = vand.u32 2147483647, %v1312_v33  ;;  %v1315_v1 = vcvt.s32.f32 %v1308_v0  ;;  %v4284_v60 = vmul.u32.u64.low %v4277_v4, %v1692_v9  ;;  %v4285_v3 = vmul.u32.u64.high %v4277_v4, %v1692_v9, %v4284_v60 }
 0x1aa   : > { %v4288_v2 = vsel %vm3087_vm7, 0, %v3086_v6  ;;  %v1665_v53 = vshrl.u32 %v6614_v27, %v4209_v22  ;;  %v4293_v41 = vmul.u32.u64.low %v4277_v4, %v1696_v56  ;;  %v4294_v13 = vmul.u32.u64.high %v4277_v4, %v1696_v56, %v4293_v41 }
 0x1ab   : > { %v3090_v7 = vadd.s32 4294967294, %v1509_v63  ;;  %v4296_v43 = vshrl.u32 %v1606_v17, 30  ;;  %v1686_v38 = vsel %vm1684_vm2, %v1674_v39, 2102212464  ;;  %v1767_v12 = vand.u32 31, %v1765_v35 }
 0x1ac   : > { %v1319_v15 = vsub.s32 4, %v4054_v32  ;;  %v4301_v31 = vmul.f32 %v1315_v1, %v1313_v36  ;;  %v1413_v30 = vsub.s32 4294967266, %v4288_v2  ;;  %v1685_v22 = vsel %vm1681_vm3, %v1665_v53, %v1668_v26 }
 0x1ad   : > { %v1687_v6 = vsel %vm1683_vm4, %v1671_v62, %v1686_v38  ;;  %vm1235_vm8 = vcmp.lt.s32.totalorder %v3922_v49, 0  ;;  %vm3091_vm9 = vcmp.lt.s32.totalorder %v3090_v7, 0  ;;  %v1608_v40 = vshll.u32 %v4296_v43, 30 }
 0x1ae   : > { %v4310_v52 = vsub.s32 32, %v1767_v12  ;;  %v4315_v39 = vsel %vm1235_vm8, %v1319_v15, %v4054_v32  ;;  %v1393_v8 = vadd.s32 %v4050_v28, %v4062_v25  ;;  %v1409_v26 = vsub.s32 32, %v4288_v2 }
 0x1af   : > { %v1410_v62 = vshll.u32 %v4195_v45, %v4288_v2  ;;  %v1688_v48 = vsel %vm1682_vm5, %v1685_v22, %v1687_v6  ;;  %v1707_v0 = vadd.s32 1, %v4285_v3  ;;  %v1200_v33 = vmul.f32 %v3913_v47, %v1141_v11 }
 0x1b0   : > { %v1317_v9 = vxor.u32 2147483648, %v4301_v31  ;;  %v1414_v32 = vadd.s32 127, %v1413_v30  ;;  %v4327_v63 = vsel %vm3091_vm9, 0, %v3090_v7  ;;  %vm1706_vm10 = vc.u32 %v4294_v13, %v4284_v60 }
 0x1b1   : > { %v4331_v28 = vsub.s32 %v1605_v37, %v1608_v40  ;;  %v6618_v25 = vand.u32 2147483647, %v4192_v44  ;;  %v1779_v45 = vshll.u32 %v6616_v24, %v1767_v12  ;;  %v6699_v18 = vmov 920167782  }
 0x1b2   : > { %v1780_v17 = vshrl.u32 %v6699_v18, %v4310_v52  ;;  %v1704_v56 = vmul.u32 %v4277_v4, %v1688_v48  ;;  %v4338_v36 = vshrl.u32 %v1765_v35, 5  ;;  %v1782_v1 = vshll.u32 %v6699_v18, %v1767_v12 }
 0x1b3   : > { %v6700_v2 = vmov 1326507024   ;;  %v1708_v41 = vsel %vm1706_vm10, %v1707_v0, %v4285_v3  ;;  %v1770_v37 = vshll.u32 %v6614_v27, %v1767_v12  ;;  %v6701_v7 = vmov 2475754826  }
 0x1b4   : > { %v1783_v53 = vshrl.u32 %v6700_v2, %v4310_v52  ;;  %v1773_v38 = vshll.u32 %v6701_v7, %v1767_v12  ;;  %v4347_v15 = vadd.f32 %v3919_v16, %v1200_v33  ;;  %v1771_v30 = vshrl.u32 %v6701_v7, %v4310_v52 }
 0x1b5   : > { %v6703_v4 = vmov 2131351028   ;;  %v1777_v6 = vshrl.u32 %v6616_v24, %v4310_v52  ;;  %v1411_v40 = vshrl.u32 %v1393_v8, %v1409_v26  ;;  %v1517_v3 = vsub.s32 4294967266, %v4327_v63 }
 0x1b6   : > { %6702 = vst [vmem:[#allocation10_spill] sm:$0xff] %v4347_v15  ;;  %v1774_v35 = vshrl.u32 %v6703_v4, %v4310_v52  ;;  %v1776_v22 = vshll.u32 %v6703_v4, %v1767_v12  ;;  %v1611_v11 = vsub.s32 0, %v4331_v28  ;;  %v1781_v48 = vor.u32 %v1780_v17, %v1779_v45 }
 0x1b7   : > { %v6704_v0 = vand.u32 2147483647, %v3922_v49  ;;  %v4364_v27 = vadd.s32 %v1708_v41, %v1704_v56  ;;  %v1760_v12 = vand.u32 8388607, %v6618_v25  ;;  %vm1788_vm12 = vcmp.lt.s32.totalorder %v4338_v36, 4 }
 0x1b8   : > { %v1415_v8 = vshll.u32 %v1414_v32, 23  ;;  %v1497_v26 = vadd.s32 %v4098_v54, %v4105_v20  ;;  %v1513_v45 = vsub.s32 32, %v4327_v63  ;;  %v1860_v17 = vand.u32 2139095040, %v4347_v15 }
 0x1b9   : > { %vm4360_vm11 = vcmp.le.f32.partialorder %v6704_v0, 0.7853982  ;;  %v1146_v0 = vpop.permute.xlu0 %1145  ;;  %v4373_v24 = vor.u32 %v1771_v30, %v1770_v37  ;;  %v1778_v56 = vor.u32 %v1777_v6, %v1776_v22  ;;  %v1518_v25 = vadd.s32 127, %v1517_v3 }
 0x1ba   : > { %v1201_v41 = vmul.f32 %v3913_v47, %v1146_v0  ;;  %vm1785_vm13 = vcmp.lt.s32.totalorder %v4338_v36, 1  ;;  %vm1787_vm14 = vcmp.lt.s32.totalorder %v4338_v36, 3  ;;  %v1794_v54 = vsel %vm1788_vm12, %v1781_v48, 920167782 }
 0x1bb   : > { %v3093_v20 = vmin.u32 %v1611_v11, %v4331_v28  ;;  %v1710_v32 = vadd.s32 536870912, %v4364_v27  ;;  %v1412_v37 = vor.u32 %v1411_v40, %v1410_v62  ;;  %v1514_v47 = vshll.u32 %v4237_v21, %v4327_v63 }
 0x1bc   : > { %v1861_v30 = vshrl.u32 %v1860_v17, 23  ;;  %vm1339_vm15 = vcmp.lt.s32.totalorder %v3927_v19, 0  ;;  %vm1786_vm0 = vcmp.lt.s32.totalorder %v4338_v36, 2  ;;  %v1795_v22 = vsel %vm1787_vm14, %v1778_v56, %v1794_v54 }
 0x1bd   : > { %v1515_v62 = vshrl.u32 %v1497_v26, %v1513_v45  ;;  %v1519_v6 = vshll.u32 %v1518_v25, 23  ;;  %v1318_v11 = vsel %vm1235_vm8, %v1317_v9, %v4301_v31  ;;  %v6712_v45 = vand.u32 2147483647, %v3927_v19 }
 0x1be   : > { %v3104_v9 = vadd.s32 4294967169, %v1861_v30  ;;  %v1423_v30 = vsub.s32 4, %v4164_v23  ;;  %vm1443_vm2 = vcmp.lt.s32.totalorder %v3939_v34, 0 }
 0x1bf   : > { %vm4424_vm1 = vcmp.le.f32.partialorder %v6712_v45, 0.7853982  ;;  %v1520_v45 = vor.u32 4788187, %v1519_v6 }
 0x1c0   : > { %v1867_v33 = vadd.s32 1, %v3104_v9 }
 0x1c2   : > { %vm1868_vm4 = vcmp.gt.s32.totalorder %v1867_v33, 0 }
 0x1f4   : > { %v4141_v42 = vpop.f32.mrb[0].mxu1  ;;  %v4143_v14 = vpop.f32.mrb[0].mxu0 }
 0x1f5   : > { %v4151_v10 = vpop.f32.mrb[1].mxu1  ;;  %v4153_v51 = vpop.f32.mrb[1].mxu0 }
 0x1f6   : > { %v4155_v55 = vpop.f32.mrb[2].mxu1  ;;  %v4160_v58 = vpop.f32.mrb[2].mxu0 }
 0x1f7   : > { %v4162_v57 = vpop.f32.mrb[3].mxu1  ;;  %v4166_v61 = vpop.f32.mrb[3].mxu0 }
 0x1f8   : > { %6696 = vst [vmem:[#allocation7_spill] sm:$0xff] %v4162_v57  ;;  %6697 = vst [vmem:[#allocation8_spill] sm:$0xff] %v4166_v61  ;;  %v1784_v61 = vor.u32 %v1783_v53, %v1782_v1  ;;  %v4375_v57 = vor.u32 %v1774_v35, %v1773_v38  ;;  %v1761_v1 = vor.u32 8388608, %v1760_v12  ;;  %v1416_v38 = vor.u32 4788187, %v1415_v8 }
 0x1f9   : > { %v1613_v12 = vclz %v3093_v20  ;;  %v1419_v20 = vcvt.s32.f32 %v1412_v37 }
 0x1fa   : > { %v1798_v53 = vsel %vm1788_vm12, %v1784_v61, 1326507024  ;;  %v1793_v35 = vsel %vm1785_vm13, %v4373_v24, %v4375_v57  ;;  %v4397_v61 = vadd.f32 %v3919_v16, %v1201_v41  ;;  %v1797_v21 = vsel %vm1785_vm13, %v4375_v57, %v1778_v56 }
 0x1fb   : > { %v1799_v63 = vsel %vm1787_vm14, %v1781_v48, %v1798_v53  ;;  %v4411_v16 = vshrl.u32 %v1710_v32, 30  ;;  %v4413_v8 = vshll.u32 %v1761_v1, 8  ;;  %v1322_v48 = vsel %vm4360_vm11, 0, %v4315_v39 }
 0x1fc   : > { %6707 = vst [vmem:[#allocation11_spill] sm:$0xff] %v4397_v61  ;;  %v1796_v31 = vsel %vm1786_vm0, %v1793_v35, %v1795_v22  ;;  %v1417_v54 = vand.u32 2147483647, %v1416_v38  ;;  %v1800_v32 = vsel %vm1786_vm0, %v1797_v21, %v1799_v63  ;;  %v1964_v39 = vand.u32 2139095040, %v4397_v61 }
 0x1fd   : > { %v1321_v35 = vsel %vm4360_vm11, %v3922_v49, %v1318_v11  ;;  %v1516_v22 = vor.u32 %v1515_v62, %v1514_v47  ;;  %v1712_v37 = vshll.u32 %v4411_v16, 30  ;;  %v6720_v63 = vmov 683565275  }
 0x1fe   : > { %v4447_v38 = vmul.u32.u64.low %v4413_v8, %v1796_v31  ;;  %v4448_v21 = vmul.u32.u64.high %v4413_v8, %v1796_v31, %v4447_v38  ;;  %v1420_v11 = vmul.f32 %v1419_v20, %v1417_v54  ;;  %v1527_v47 = vsub.s32 4, %v4197_v50 }
 0x1ff   : > { %v1790_v62 = vsel %vm1788_vm12, %v1778_v56, 2102212464  ;;  %v1965_v6 = vshrl.u32 %v1964_v39, 23  ;;  %3398 = vcosq.f32 %v1321_v35  ;;  %v1521_v31 = vand.u32 2147483647, %v1520_v45 }
 0x200   : > { %6719 = vst [vmem:[#allocation20_spill] sm:$0xff] %v4447_v38  ;;  %v4465_v9 = vsub.s32 %v4364_v27, %v1712_v37  ;;  %3400 = vsinq.f32 %v1321_v35  ;;  %v1791_v54 = vsel %vm1787_vm14, %v4375_v57, %v1790_v62  ;;  %v1528_v20 = vsel %vm1443_vm2, %v1527_v47, %v4197_v50 }
 0x201   : > { %v3108_v27 = vadd.s32 4294967169, %v1965_v6  ;;  %v1811_v35 = vadd.s32 1, %v4448_v21 }
 0x202   : > { %v4404_v40 = vpop.f32.mrb[4].mxu1  ;;  %v4406_v3 = vpop.f32.mrb[4].mxu0  ;;  %v1715_v57 = vsub.s32 0, %v4465_v9 }
 0x203   : > { %6708 = vst [vmem:[#allocation12_spill] sm:$0xff] %v4404_v40  ;;  %6709 = vst [vmem:[#allocation13_spill] sm:$0xff] %v4406_v3  ;;  %v4415_v25 = vpop.f32.mrb[5].mxu1  ;;  %v4417_v26 = vpop.f32.mrb[5].mxu0  ;;  %v1971_v37 = vadd.s32 1, %v3108_v27 }
 0x204   : > { %6710 = vst [vmem:[#allocation14_spill] sm:$0xff] %v4415_v25  ;;  %6711 = vst [vmem:[#allocation15_spill] sm:$0xff] %v4417_v26  ;;  %v4430_v0 = vpop.f32.mrb[6].mxu1  ;;  %v4432_v41 = vpop.f32.mrb[6].mxu0  ;;  %v1523_v26 = vcvt.s32.f32 %v1516_v22 }
 0x205   : > { %6715 = vst [vmem:[#allocation16_spill] sm:$0xff] %v4430_v0  ;;  %6716 = vst [vmem:[#allocation17_spill] sm:$0xff] %v4432_v41  ;;  %v4437_v1 = vpop.f32.mrb[7].mxu1  ;;  %v4439_v53 = vpop.f32.mrb[7].mxu0  ;;  %v3094_v41 = vadd.s32 4294967294, %v1613_v12  ;;  %v1424_v12 = vsel %vm1339_vm15, %v1423_v30, %v4164_v23  ;;  %v1421_v23 = vxor.u32 2147483648, %v1420_v11 }
 0x206   : > { %6717 = vst [vmem:[#allocation18_spill] sm:$0xff] %v4437_v1  ;;  %6718 = vst [vmem:[#allocation19_spill] sm:$0xff] %v4439_v53  ;;  %v1769_v1 = vshrl.u32 %v6720_v63, %v4310_v52  ;;  %v4454_v53 = vmul.u32.u64.low %v4413_v8, %v1800_v32  ;;  %v4455_v0 = vmul.u32.u64.high %v4413_v8, %v1800_v32, %v4454_v53  ;;  %v1326_v52 = vadd.s32 3, %v1322_v48 }
 0x207   : > { %vm3095_vm3 = vcmp.lt.s32.totalorder %v3094_v41, 0  ;;  %v1426_v48 = vsel %vm4424_vm1, 0, %v1424_v12  ;;  %v6721_v32 = vand.u32 2147483647, %v3939_v34  ;;  %v1869_v30 = vsel %vm1868_vm4, %v1867_v33, 0 }
 0x208   : > { %v1789_v56 = vsel %vm1785_vm13, %v1769_v1, %v4373_v24  ;;  %v1524_v24 = vmul.f32 %v1523_v26, %v1521_v31  ;;  %v1616_v1 = vsel %vm3095_vm3, 0, %v3094_v41  ;;  %v4488_v22 = vand.u32 3, %v1326_v52 }
 0x209   : > { %vm4480_vm5 = vcmp.le.f32.partialorder %v6721_v32, 0.7853982  ;;  %v1792_v53 = vsel %vm1786_vm0, %v1789_v56, %v1791_v54  ;;  %v1430_v50 = vadd.s32 3, %v1426_v48  ;;  %vm1810_vm6 = vc.u32 %v4455_v0, %v4447_v38  ;;  %v4501_v52 = vpop.eup %3398 }
 0x20a   : > { %v1530_v45 = vsel %vm4480_vm5, 0, %v1528_v20  ;;  %v1422_v26 = vsel %vm1339_vm15, %v1421_v23, %v1420_v11  ;;  %v1601_v41 = vadd.s32 %v4205_v59, %v4215_v5  ;;  %v1617_v36 = vsub.s32 32, %v1616_v1 }
 0x20b   : > { %v1525_v47 = vxor.u32 2147483648, %v1524_v24  ;;  %v1621_v62 = vsub.s32 4294967266, %v1616_v1  ;;  %v1808_v33 = vmul.u32 %v4413_v8, %v1792_v53  ;;  %v1871_v6 = vand.u32 31, %v1869_v30  ;;  %v4510_v8 = vpop.eup %3400 }
 0x20c   : > { %v3097_v12 = vmin.u32 %v1715_v57, %v4465_v9  ;;  %v1812_v31 = vsel %vm1810_vm6, %v1811_v35, %v4448_v21  ;;  %vm1332_vm7 = vcmp.eq.s32.totalorder %v4488_v22, 2  ;;  %v1425_v11 = vsel %vm4424_vm1, %v3927_v19, %v1422_v26 }
 0x20d   : > { %v1534_v59 = vadd.s32 3, %v1530_v45  ;;  %v4507_v5 = vand.u32 3, %v1430_v50  ;;  %v1618_v56 = vshll.u32 %v4331_v28, %v1616_v1  ;;  %v1619_v54 = vshrl.u32 %v1601_v41, %v1617_v36 }
 0x20e   : > { %vm1972_vm8 = vcmp.gt.s32.totalorder %v1971_v37, 0  ;;  %v1526_v21 = vsel %vm1443_vm2, %v1525_v47, %v1524_v24  ;;  %v1622_v23 = vadd.s32 127, %v1621_v62  ;;  %v4514_v48 = vadd.s32 %v1812_v31, %v1808_v33 }
 0x20f   : > { %v4516_v20 = vsub.s32 32, %v1871_v6  ;;  %v1333_v17 = vxor.u32 2147483648, %v4501_v52  ;;  %3402 = vcosq.f32 %v1425_v11  ;;  %v1717_v27 = vclz %v3097_v12 }
 0x210   : > { %v6619_v32 = vand.u32 2147483647, %v4347_v15  ;;  %v4520_v57 = vand.u32 3, %v1534_v59  ;;  %v4522_v28 = vsel %vm1972_vm8, %v1971_v37, 0  ;;  %v4526_v1 = vadd.f32 %v4143_v14, %v4141_v42 }
 0x211   : > { %v4530_v24 = vadd.f32 %v4153_v51, %v4151_v10  ;;  %3404 = vsinq.f32 %v1425_v11  ;;  %v4536_v35 = vsel %vm4480_vm5, %v3939_v34, %v1526_v21  ;;  %v4538_v50 = vor.u32 %v1619_v54, %v1618_v56  ;;  %v1156_v21 = vpop.permute.xlu0 %1155 }
 0x212   : > { %6724 = vst [vmem:[#allocation21_spill] sm:$0xff] %v4526_v1  ;;  %v1623_v45 = vshll.u32 %v1622_v23, 23  ;;  %v1814_v26 = vadd.s32 536870912, %v4514_v48  ;;  %v6726_v41 = vmov 2102212464   ;;  %v1884_v14 = vshrl.u32 %v6699_v18, %v4516_v20  ;;  %857 = vadd.xlane.f32.xlu1 %v4526_v1  ;;  %v4575_v23 = vpop.f32.mrb[8].mxu1 }
 0x213   : > { %6725 = vst [vmem:[#allocation22_spill] sm:$0xff] %v4530_v24  ;;  %v1883_v42 = vshll.u32 %v6726_v41, %v1871_v6  ;;  %v4545_v10 = vadd.s32 4294967294, %v1717_v27  ;;  %v4549_v51 = vand.u32 8388607, %v6619_v32  ;;  %v4551_v39 = vshrl.u32 %v1869_v30, 5  ;;  %6728 = vst [vmem:[#allocation24_spill] sm:$0xff] %v4575_v23 }
 0x214   : > { %v1975_v36 = vand.u32 31, %v4522_v28  ;;  %v1874_v37 = vshll.u32 %v6720_v63, %v1871_v6  ;;  %v1877_v47 = vshll.u32 %v6701_v7, %v1871_v6  ;;  %v1886_v62 = vshll.u32 %v6699_v18, %v1871_v6  ;;  %v4588_v32 = vpop.f32.mrb[8].mxu0 }
 0x215   : > { %v1887_v33 = vshrl.u32 %v6700_v2, %v4516_v20  ;;  %v1875_v12 = vshrl.u32 %v6701_v7, %v4516_v20  ;;  %v1878_v31 = vshrl.u32 %v6703_v4, %v4516_v20  ;;  %v1880_v30 = vshll.u32 %v6703_v4, %v1871_v6  ;;  %6729 = vst [vmem:[#allocation25_spill] sm:$0xff] %v4588_v32  ;;  %v4595_v23 = vpop.f32.mrb[9].mxu0 }
 0x216   : > { %v1881_v11 = vshrl.u32 %v6726_v41, %v4516_v20  ;;  %v4569_v59 = vsel %vm1332_vm7, %v1333_v17, %v4510_v8  ;;  %3406 = vcosq.f32 %v4536_v35  ;;  %v4572_v56 = vshrl.u32 %v1814_v26, 30  ;;  %853 = vadd.xlane.f32.xlu1 %v4530_v24  ;;  %v4585_v17 = vld [vmem:[%s6598_s5] ss:$0 sm:$0xff]  ;;  %6731 = vst [vmem:[#allocation27_spill] sm:$0xff] %v4595_v23  ;;  %v4606_v3 = vpop.f32.mrb[10].mxu0 }
 0x217   : > { %v1885_v54 = vor.u32 %v1884_v14, %v1883_v42  ;;  %v4577_v27 = vor.u32 4788187, %v1623_v45  ;;  %vm1892_vm9 = vcmp.lt.s32.totalorder %v4551_v39, 4  ;;  %v4580_v6 = vsub.s32 32, %v1975_v36  ;;  %v4590_v42 = vpop.f32.mrb[9].mxu1  ;;  %6733 = vst [vmem:[#allocation29_spill] sm:$0xff] %v4606_v3 }
 0x218   : > { %6727 = vst [vmem:[#allocation23_spill] sm:$0xff] %v4572_v56  ;;  %v1203_v26 = vmul.f32 %v4585_v17, %v1156_v21  ;;  %6730 = vst [vmem:[#allocation26_spill] sm:$0xff] %v4590_v42  ;;  %vm3099_vm10 = vcmp.lt.s32.totalorder %v4545_v10, 0  ;;  %v1888_v45 = vor.u32 %v1887_v33, %v1886_v62  ;;  %v4597_v24 = vpop.f32.mrb[10].mxu1  ;;  %v1865_v25 = vor.u32 8388608, %v4549_v51  ;;  %v4615_v53 = vpop.f32.mrb[11].mxu0 }
 0x219   : > { %6732 = vst [vmem:[#allocation28_spill] sm:$0xff] %v4597_v24  ;;  %v4599_v15 = vpop.eup %3402  ;;  %v4602_v21 = vor.u32 %v1875_v12, %v1874_v37  ;;  %v4604_v32 = vor.u32 %v1878_v31, %v1877_v47  ;;  %v1882_v42 = vor.u32 %v1881_v11, %v1880_v30  ;;  %v4608_v14 = vpop.f32.mrb[11].mxu1  ;;  %v1816_v62 = vshll.u32 %v4572_v56, 30  ;;  %6735 = vst [vmem:[#allocation31_spill] sm:$0xff] %v4615_v53  ;;  %v4626_v12 = vld [vmem:[%s6599_s6] ss:$0 sm:$0xff] }
 0x21a   : > { %6734 = vst [vmem:[#allocation30_spill] sm:$0xff] %v4608_v14  ;;  %vm1889_vm11 = vcmp.lt.s32.totalorder %v4551_v39, 1  ;;  %vm1891_vm12 = vcmp.lt.s32.totalorder %v4551_v39, 3  ;;  %v1898_v33 = vsel %vm1892_vm9, %v1885_v54, 920167782  ;;  %vm1890_vm13 = vcmp.lt.s32.totalorder %v4551_v39, 2 }
 0x21b   : > { %v4617_v51 = vpop.eup %3404  ;;  %v1987_v37 = vshll.u32 %v6726_v41, %v1975_v36  ;;  %v1988_v47 = vshrl.u32 %v6699_v18, %v4580_v6  ;;  %v4629_v31 = vadd.f32 %v4626_v12, %v1203_v26  ;;  %v1902_v30 = vsel %vm1892_vm9, %v1888_v45, 1326507024 }
 0x21c   : > { %v4634_v11 = vshrl.u32 %v4522_v28, 5  ;;  %v1990_v53 = vshll.u32 %v6699_v18, %v1975_v36  ;;  %v1991_v14 = vshrl.u32 %v6700_v2, %v4580_v6  ;;  %v1897_v3 = vsel %vm1889_vm11, %v4602_v21, %v4604_v32 }
 0x21d   : > { %6736 = vst [vmem:[#allocation32_spill] sm:$0xff] %v4629_v31  ;;  %v1899_v26 = vsel %vm1891_vm12, %v1882_v42, %v1898_v33  ;;  %v1978_v24 = vshll.u32 %v6720_v63, %v1975_v36  ;;  %v1981_v45 = vshll.u32 %v6701_v7, %v1975_v36  ;;  %v1979_v28 = vshrl.u32 %v6701_v7, %v4580_v6 }
 0x21e   : > { %v1982_v23 = vshrl.u32 %v6703_v4, %v4580_v6  ;;  %v1984_v40 = vshll.u32 %v6703_v4, %v1975_v36  ;;  %v1985_v56 = vshrl.u32 %v6726_v41, %v4580_v6  ;;  %v1901_v34 = vsel %vm1889_vm11, %v4604_v32, %v1882_v42 }
 0x21f   : > { %v1903_v33 = vsel %vm1891_vm12, %v1885_v54, %v1902_v30  ;;  %v1989_v44 = vor.u32 %v1988_v47, %v1987_v37  ;;  %v2172_v1 = vand.u32 2139095040, %v4629_v31  ;;  %v4662_v7 = vshll.u32 %v1865_v25, 8 }
 0x220   : > { %v4660_v2 = vpop.eup %3406  ;;  %v6737_v18 = vand.u32 2147483647, %v4397_v61  ;;  %v1992_v4 = vor.u32 %v1991_v14, %v1990_v53  ;;  %vm1996_vm14 = vcmp.lt.s32.totalorder %v4634_v11, 4  ;;  %v1625_v41 = vand.u32 2147483647, %v4577_v27 }
 0x221   : > { %v4671_v38 = vsel %vm3099_vm10, 0, %v4545_v10  ;;  %v4674_v54 = vsub.s32 %v4514_v48, %v1816_v62  ;;  %v1900_v25 = vsel %vm1890_vm13, %v1897_v3, %v1899_v26  ;;  %v1904_v37 = vsel %vm1890_vm13, %v1901_v34, %v1903_v33 }
 0x222   : > { %v1968_v36 = vand.u32 8388607, %v6737_v18  ;;  %v4680_v18 = vor.u32 %v1979_v28, %v1978_v24  ;;  %v4682_v53 = vor.u32 %v1982_v23, %v1981_v45  ;;  %v4684_v14 = vor.u32 %v1985_v56, %v1984_v40 }
 0x223   : > { %vm1993_vm15 = vcmp.lt.s32.totalorder %v4634_v11, 1  ;;  %vm1995_vm0 = vcmp.lt.s32.totalorder %v4634_v11, 3  ;;  %v2002_v48 = vsel %vm1996_vm14, %v1989_v44, 920167782  ;;  %v2173_v10 = vshrl.u32 %v2172_v1, 23 }
 0x224   : > { %v4691_v27 = vmul.u32.u64.low %v4662_v7, %v1900_v25  ;;  %v4692_v3 = vmul.u32.u64.high %v4662_v7, %v1900_v25, %v4691_v27  ;;  %v1969_v34 = vor.u32 8388608, %v1968_v36  ;;  %v2006_v24 = vsel %vm1996_vm14, %v1992_v4, 1326507024  ;;  %v1161_v36 = vpop.permute.xlu0 %1160 }
 0x225   : > { %vm1547_vm1 = vcmp.lt.s32.totalorder %v3997_v29, 0  ;;  %v1725_v40 = vsub.s32 4294967266, %v4671_v38  ;;  %v1873_v56 = vshrl.u32 %v6720_v63, %v4516_v20  ;;  %vm1329_vm2 = vcmp.eq.s32.totalorder %v4488_v22, 0 }
 0x226   : > { %v4702_v23 = vmul.u32.u64.low %v4662_v7, %v1904_v37  ;;  %v4703_v62 = vmul.u32.u64.high %v4662_v7, %v1904_v37, %v4702_v23  ;;  %v1894_v1 = vsel %vm1892_vm9, %v1882_v42, 2102212464  ;;  %vm1994_vm3 = vcmp.lt.s32.totalorder %v4634_v11, 2 }
 0x227   : > { %v2001_v4 = vsel %vm1993_vm15, %v4680_v18, %v4682_v53  ;;  %v2003_v20 = vsel %vm1995_vm0, %v4684_v14, %v2002_v48  ;;  %vm1433_vm4 = vcmp.eq.s32.totalorder %v4507_v5, 0  ;;  %vm1436_vm5 = vcmp.eq.s32.totalorder %v4507_v5, 2 }
 0x228   : > { %v1819_v47 = vsub.s32 0, %v4674_v54  ;;  %v2005_v42 = vsel %vm1993_vm15, %v4682_v53, %v4684_v14  ;;  %v2007_v30 = vsel %vm1995_vm0, %v1989_v44, %v2006_v24  ;;  %v3116_v26 = vadd.s32 4294967169, %v2173_v10  ;;  %v4742_v10 = vpop.f32.mrb[12].mxu0 }
 0x229   : > { %v1437_v45 = vxor.u32 2147483648, %v4599_v15  ;;  %3408 = vsinq.f32 %v4536_v35  ;;  %v1631_v28 = vsub.s32 4, %v4296_v43  ;;  %v4728_v33 = vshll.u32 %v1969_v34, 8  ;;  %v4740_v35 = vpop.f32.mrb[12].mxu1  ;;  %6739 = vst [vmem:[#allocation34_spill] sm:$0xff] %v4742_v10 }
 0x22a   : > { %v1705_v25 = vadd.s32 %v4284_v60, %v4294_v13  ;;  %v1893_v37 = vsel %vm1889_vm11, %v1873_v56, %v4602_v21  ;;  %v1895_v44 = vsel %vm1891_vm12, %v4604_v32, %v1894_v1  ;;  %v2004_v48 = vsel %vm1994_vm3, %v2001_v4, %v2003_v20  ;;  %6738 = vst [vmem:[#allocation33_spill] sm:$0xff] %v4740_v35  ;;  %v4758_v23 = vpop.f32.mrb[13].mxu1  ;;  %v4760_v1 = vpop.f32.mrb[13].mxu0 }
 0x22b   : > { %vm1328_vm6 = vcmp.lt.s32.totalorder %v4488_v22, 2  ;;  %vm1432_vm7 = vcmp.lt.s32.totalorder %v4507_v5, 2  ;;  %v6740_v60 = vand.u32 2147483647, %v3997_v29  ;;  %v6743_v21 = vcvt.s32.f32 %v4538_v50  ;;  %6744 = vst [vmem:[#allocation35_spill] sm:$0xff] %v4758_v23  ;;  %6745 = vst [vmem:[#allocation36_spill] sm:$0xff] %v4760_v1 }
 0x22c   : > { %v1721_v34 = vsub.s32 32, %v4671_v38  ;;  %v2008_v24 = vsel %vm1994_vm3, %v2005_v42, %v2007_v30  ;;  %v1204_v56 = vmul.f32 %v4585_v17, %v1161_v36  ;;  %v1726_v4 = vadd.s32 127, %v1725_v40  ;;  %v4767_v50 = vpop.f32.mrb[14].mxu1 }
 0x22d   : > { %vm4748_vm8 = vcmp.le.f32.partialorder %v6740_v60, 0.7853982  ;;  %v1628_v32 = vmul.f32 %v6743_v21, %v1625_v41  ;;  %v3101_v20 = vmin.u32 %v1819_v47, %v4674_v54  ;;  %v2179_v60 = vadd.s32 1, %v3116_v26  ;;  %6747 = vst [vmem:[#allocation38_spill] sm:$0xff] %v4767_v50  ;;  %v4769_v41 = vpop.f32.mrb[14].mxu0  ;;  %v4779_v40 = vpop.f32.mrb[15].mxu1 }
 0x22e   : > { %v4765_v10 = vadd.f32 %v4160_v58, %v4155_v55  ;;  %6748 = vst [vmem:[#allocation39_spill] sm:$0xff] %v4769_v41  ;;  %v1896_v42 = vsel %vm1890_vm13, %v1893_v37, %v1895_v44  ;;  %v1915_v30 = vadd.s32 1, %v4692_v3  ;;  %6749 = vst [vmem:[#allocation40_spill] sm:$0xff] %v4779_v40  ;;  %v4781_v47 = vpop.f32.mrb[15].mxu0  ;;  %vm1914_vm9 = vc.u32 %v4703_v62, %v4691_v27 }
 0x22f   : > { %v4775_v36 = vmul.u32.u64.low %v4728_v33, %v2004_v48  ;;  %v4776_v21 = vmul.u32.u64.high %v4728_v33, %v2004_v48, %v4775_v36  ;;  %6750 = vst [vmem:[#allocation41_spill] sm:$0xff] %v4781_v47  ;;  %v1977_v55 = vshrl.u32 %v6720_v63, %v4580_v6  ;;  %vm1325_vm10 = vweird.f32 %v3922_v49 }
 0x230   : > { %6746 = vst [vmem:[#allocation37_spill] sm:$0xff] %v4765_v10  ;;  %v4788_v58 = vmul.u32.u64.low %v4728_v33, %v2008_v24  ;;  %v4789_v39 = vmul.u32.u64.high %v4728_v33, %v2008_v24, %v4788_v58  ;;  %859 = vadd.xlane.f32.xlu0 %v4765_v10  ;;  %vm1429_vm11 = vweird.f32 %v3927_v19  ;;  %v1434_v26 = vxor.u32 2147483648, %v4617_v51 }
 0x231   : > { %v1632_v37 = vsel %vm1547_vm1, %v1631_v28, %v4296_v43  ;;  %v1998_v6 = vsel %vm1996_vm14, %v4684_v14, 2102212464  ;;  %v4802_v44 = vadd.f32 %v4626_v12, %v1204_v56  ;;  %v1629_v48 = vxor.u32 2147483648, %v1628_v32 }
 0x232   : > { %v1821_v24 = vclz %v3101_v20  ;;  %v1912_v58 = vmul.u32 %v4662_v7, %v1896_v42  ;;  %vm2180_vm12 = vcmp.gt.s32.totalorder %v2179_v60, 0  ;;  %vm1537_vm13 = vcmp.eq.s32.totalorder %v4520_v57, 0 }
 0x233   : > { %6751 = vst [vmem:[#allocation42_spill] sm:$0xff] %v4802_v44  ;;  %v1722_v47 = vshll.u32 %v4465_v9, %v4671_v38  ;;  %v1723_v40 = vshrl.u32 %v1705_v25, %v1721_v34  ;;  %v1727_v41 = vshll.u32 %v1726_v4, 23  ;;  %v1916_v43 = vsel %vm1914_vm9, %v1915_v30, %v4692_v3  ;;  %v3409_v9 = vpop.eup %3408 }
 0x234   : > { %v6752_v14 = vxor.u32 2147483648, %v4510_v8  ;;  %vm1540_vm14 = vcmp.eq.s32.totalorder %v4520_v57, 2  ;;  %v1997_v7 = vsel %vm1993_vm15, %v1977_v55, %v4680_v18  ;;  %v1999_v38 = vsel %vm1995_vm0, %v4682_v53, %v1998_v6 }
 0x235   : > { %v1435_v3 = vsel %vm1433_vm4, %v4599_v15, %v1434_v26  ;;  %v1438_v8 = vsel %vm1436_vm5, %v1437_v45, %v4617_v51  ;;  %v2276_v25 = vand.u32 2139095040, %v4802_v44  ;;  %v1630_v34 = vsel %vm1547_vm1, %v1629_v48, %v1628_v32 }
 0x236   : > { %v1331_v28 = vsel %vm1329_vm2, %v4501_v52, %v6752_v14  ;;  %v2181_v52 = vsel %vm2180_vm12, %v2179_v60, 0  ;;  %v1634_v18 = vsel %vm4748_vm8, 0, %v1632_v37  ;;  %vm1651_vm15 = vcmp.lt.s32.totalorder %v4086_v46, 0 }
 0x237   : > { %v3102_v53 = vadd.s32 4294967294, %v1821_v24  ;;  %v4836_v56 = vadd.s32 %v1916_v43, %v1912_v58  ;;  %v1724_v4 = vor.u32 %v1723_v40, %v1722_v47  ;;  %v1728_v15 = vor.u32 4788187, %v1727_v41 }
 0x238   : > { %v2000_v20 = vsel %vm1994_vm3, %v1997_v7, %v1999_v38  ;;  %v2019_v51 = vadd.s32 1, %v4776_v21  ;;  %v1335_v45 = vsel %vm1328_vm6, %v1331_v28, %v4569_v59  ;;  %v1439_v32 = vsel %vm1432_vm7, %v1435_v3, %v1438_v8  ;;  %v6758_v38 = vld [vmem:[#allocation20_spill] sm:$0xff] }
 0x239   : > { %vm2018_vm0 = vc.u32 %v4789_v39, %v4775_v36  ;;  %v2183_v60 = vand.u32 31, %v2181_v52  ;;  %v1541_v42 = vxor.u32 2147483648, %v4660_v2  ;;  %v1633_v11 = vsel %vm4748_vm8, %v3997_v29, %v1630_v34 }
 0x23a   : > { %v1638_v41 = vadd.s32 3, %v1634_v18  ;;  %v2277_v30 = vshrl.u32 %v2276_v25, 23  ;;  %v1538_v40 = vxor.u32 2147483648, %v3409_v9  ;;  %vm3103_vm1 = vcmp.lt.s32.totalorder %v3102_v53, 0 }
 0x23b   : > { %v1918_v22 = vadd.s32 536870912, %v4836_v56  ;;  %v2016_v59 = vmul.u32 %v4728_v33, %v2000_v20  ;;  %v6753_v5 = vand.u32 2147483647, %v4086_v46  ;;  %v1729_v55 = vand.u32 2147483647, %v1728_v15 }
 0x23c   : > { %v1731_v26 = vcvt.s32.f32 %v1724_v4  ;;  %v1735_v37 = vsub.s32 4, %v4411_v16  ;;  %v2020_v13 = vsel %vm2018_vm0, %v2019_v51, %v4776_v21  ;;  %v4864_v6 = vsel %vm1325_vm10, nan, %v1335_v45 }
 0x23d   : > { %vm4856_vm2 = vcmp.le.f32.partialorder %v6753_v5, 0.7853982  ;;  %6756 = vst [vmem:[#allocation43_spill] sm:$0xff] %v4864_v6  ;;  %v4868_v48 = vsel %vm1429_vm11, nan, %v1439_v32  ;;  %3410 = vcosq.f32 %v1633_v11  ;;  %v4870_v33 = vsub.s32 32, %v2183_v60 }
 0x23e   : > { %6757 = vst [vmem:[#allocation44_spill] sm:$0xff] %v4868_v48  ;;  %3412 = vsinq.f32 %v1633_v11  ;;  %v4872_v24 = vand.u32 3, %v1638_v41  ;;  %v4874_v58 = vsel %vm3103_vm1, 0, %v3102_v53  ;;  %v3120_v43 = vadd.s32 4294967169, %v2277_v30 }
 0x23f   : > { %v4879_v21 = vsel %vm1537_vm13, %v4660_v2, %v1538_v40  ;;  %v4883_v49 = vsel %vm1540_vm14, %v1541_v42, %v3409_v9  ;;  %v4885_v19 = vshrl.u32 %v1918_v22, 30  ;;  %v4887_v14 = vadd.s32 %v2020_v13, %v2016_v59  ;;  %v6765_v13 = vld [vmem:[#allocation8_spill] sm:$0xff] }
 0x240   : > { %v4889_v28 = vmul.f32 %v1731_v26, %v1729_v55  ;;  %v4894_v7 = vsel %vm1651_vm15, %v1735_v37, %v4411_v16  ;;  %v1809_v3 = vadd.s32 %v6758_v38, %v4455_v0  ;;  %v1825_v2 = vsub.s32 32, %v4874_v58 }
 0x241   : > { %v1829_v8 = vsub.s32 4294967266, %v4874_v58  ;;  %v6638_v9 = vand.u32 2147483647, %v4629_v31  ;;  %v6759_v25 = vmov 2102212464   ;;  %v4904_v4 = vshrl.u32 %v2181_v52, 5  ;;  %v1166_v31 = vpop.permute.xlu0 %1165 }
 0x242   : > { %v2195_v34 = vshll.u32 %v6759_v25, %v2183_v60  ;;  %v6760_v18 = vmov 920167782   ;;  %v6761_v16 = vmov 1326507024   ;;  %v2283_v51 = vadd.s32 1, %v3120_v43 }
 0x243   : > { %v2196_v53 = vshrl.u32 %v6760_v18, %v4870_v33  ;;  %v2198_v15 = vshll.u32 %v6760_v18, %v2183_v60  ;;  %v2199_v20 = vshrl.u32 %v6761_v16, %v4870_v33  ;;  %v1920_v0 = vshll.u32 %v4885_v19, 30 }
 0x244   : > { %v2022_v45 = vadd.s32 536870912, %v4887_v14  ;;  %v2186_v32 = vshll.u32 %v6720_v63, %v2183_v60  ;;  %v6762_v42 = vmov 2475754826   ;;  %vm1536_vm3 = vcmp.lt.s32.totalorder %v4520_v57, 2 }
 0x245   : > { %v2189_v11 = vshll.u32 %v6762_v42, %v2183_v60  ;;  %v2187_v52 = vshrl.u32 %v6762_v42, %v4870_v33  ;;  %v6763_v41 = vmov 2131351028   ;;  %v2193_v22 = vshrl.u32 %v6759_v25, %v4870_v33 }
 0x246   : > { %v2190_v30 = vshrl.u32 %v6763_v41, %v4870_v33  ;;  %v2192_v40 = vshll.u32 %v6763_v41, %v2183_v60  ;;  %vm1644_vm4 = vcmp.eq.s32.totalorder %v4872_v24, 2  ;;  %v1738_v59 = vsel %vm4856_vm2, 0, %v4894_v7  ;;  %v6764_v60 = vld [vmem:[#allocation7_spill] sm:$0xff] }
 0x247   : > { %v1830_v5 = vadd.s32 127, %v1829_v8  ;;  %v2176_v55 = vand.u32 8388607, %v6638_v9  ;;  %v2197_v26 = vor.u32 %v2196_v53, %v2195_v34  ;;  %vm1641_vm5 = vcmp.eq.s32.totalorder %v4872_v24, 0  ;;  %v3411_v38 = vpop.eup %3410 }
 0x248   : > { %v2200_v37 = vor.u32 %v2199_v20, %v2198_v15  ;;  %vm2204_vm6 = vcmp.lt.s32.totalorder %v4904_v4, 4  ;;  %vm2284_vm7 = vcmp.gt.s32.totalorder %v2283_v51, 0  ;;  %v4931_v43 = vadd.f32 %v6765_v13, %v6764_v60  ;;  %v3413_v53 = vpop.eup %3412 }
 0x249   : > { %v1733_v6 = vxor.u32 2147483648, %v4889_v28  ;;  %v1826_v7 = vshll.u32 %v4674_v54, %v4874_v58  ;;  %v4937_v8 = vsub.s32 %v4836_v56, %v1920_v0  ;;  %v4939_v34 = vshrl.u32 %v2022_v45, 30 }
 0x24a   : > { %6766 = vst [vmem:[#allocation20_spill] sm:$0xff] %v4931_v43  ;;  %v1827_v15 = vshrl.u32 %v1809_v3, %v1825_v2  ;;  %v2188_v20 = vor.u32 %v2187_v52, %v2186_v32  ;;  %v2191_v9 = vor.u32 %v2190_v30, %v2189_v11  ;;  %v2194_v48 = vor.u32 %v2193_v22, %v2192_v40  ;;  %v6768_v22 = vld [vmem:[#allocation21_spill] sm:$0xff] }
 0x24b   : > { %6767 = vst [vmem:[#allocation7_spill] sm:$0xff] %v4939_v34  ;;  %vm2201_vm8 = vcmp.lt.s32.totalorder %v4904_v4, 1  ;;  %vm2203_vm9 = vcmp.lt.s32.totalorder %v4904_v4, 3  ;;  %v2210_v60 = vsel %vm2204_vm6, %v2197_v26, 920167782  ;;  %v2285_v13 = vsel %vm2284_vm7, %v2283_v51, 0 }
 0x24c   : > { %v1831_v54 = vshll.u32 %v1830_v5, 23  ;;  %v2177_v58 = vor.u32 8388608, %v2176_v55  ;;  %v2214_v56 = vsel %vm2204_vm6, %v2200_v37, 1326507024  ;;  %v1205_v0 = vmul.f32 %v4585_v17, %v1166_v31 }
 0x24d   : > { %v1642_v3 = vxor.u32 2147483648, %v3413_v53  ;;  %v1645_v2 = vxor.u32 2147483648, %v3411_v38  ;;  %v1923_v45 = vsub.s32 0, %v4937_v8  ;;  %v2024_v32 = vshll.u32 %v4939_v34, 30 }
 0x24e   : > { %vm2202_vm10 = vcmp.lt.s32.totalorder %v4904_v4, 2  ;;  %v2209_v11 = vsel %vm2201_vm8, %v2188_v20, %v2191_v9  ;;  %v2211_v51 = vsel %vm2203_vm9, %v2194_v48, %v2210_v60  ;;  %v2287_v52 = vand.u32 31, %v2285_v13 }
 0x24f   : > { %v1828_v30 = vor.u32 %v1827_v15, %v1826_v7  ;;  %v2213_v40 = vsel %vm2201_vm8, %v2191_v9, %v2194_v48  ;;  %v2215_v31 = vsel %vm2203_vm9, %v2197_v26, %v2214_v56  ;;  %v903_v5 = vmul.f32 %v6768_v22, %v6768_v22 }
 0x250   : > { %v1734_v55 = vsel %vm1651_vm15, %v1733_v6, %v4889_v28  ;;  %v1832_v37 = vor.u32 4788187, %v1831_v54  ;;  %v4964_v50 = vshll.u32 %v2177_v58, 8  ;;  %v4967_v60 = vadd.f32 %v4626_v12, %v1205_v0 }
 0x251   : > { %v4973_v7 = vsel %vm1536_vm3, %v4879_v21, %v4883_v49  ;;  %v4975_v26 = vadd.s32 3, %v1738_v59  ;;  %v3105_v15 = vmin.u32 %v1923_v45, %v4937_v8  ;;  %v2212_v56 = vsel %vm2202_vm10, %v2209_v11, %v2211_v51  ;;  %921 = vadd.xlane.f32.xlu0 %v903_v5 }
 0x252   : > { %6769 = vst [vmem:[#allocation8_spill] sm:$0xff] %v4967_v60  ;;  %v4982_v6 = vsel %vm1644_vm4, %v1645_v2, %v3413_v53  ;;  %v4985_v28 = vsub.s32 %v4887_v14, %v2024_v32  ;;  %v2216_v57 = vsel %vm2202_vm10, %v2213_v40, %v2215_v31  ;;  %v4989_v21 = vsub.s32 32, %v2287_v52 }
 0x253   : > { %v4993_v49 = vsel %vm1641_vm5, %v3411_v38, %v1642_v3  ;;  %v1737_v59 = vsel %vm4856_vm2, %v4086_v46, %v1734_v55  ;;  %v1835_v54 = vcvt.s32.f32 %v1828_v30  ;;  %v2185_v53 = vshrl.u32 %v6720_v63, %v4870_v33  ;;  %v6770_v30 = vld [vmem:[#allocation9_spill] sm:$0xff] }
 0x254   : > { %v1833_v58 = vand.u32 2147483647, %v1832_v37  ;;  %v5001_v14 = vmul.u32.u64.low %v4964_v50, %v2212_v56  ;;  %v5002_v0 = vmul.u32.u64.high %v4964_v50, %v2212_v56, %v5001_v14  ;;  %v2380_v2 = vand.u32 2139095040, %v4967_v60  ;;  %v6771_v55 = vld [vmem:[#allocation5_spill] sm:$0xff] }
 0x255   : > { %v1925_v45 = vclz %v3105_v15  ;;  %v2206_v38 = vsel %vm2204_vm6, %v2194_v48, 2102212464  ;;  %v5009_v3 = vmul.u32.u64.low %v4964_v50, %v2216_v57  ;;  %v5010_v47 = vmul.u32.u64.high %v4964_v50, %v2216_v57, %v5009_v3  ;;  %855 = vadd.xlane.f32.xlu0 %v4931_v43 }
 0x256   : > { %v2027_v33 = vsub.s32 0, %v4985_v28  ;;  %v2299_v11 = vshll.u32 %v6759_v25, %v2287_v52  ;;  %v2300_v51 = vshrl.u32 %v6760_v18, %v4989_v21  ;;  %vm1755_vm11 = vcmp.lt.s32.totalorder %v6770_v30, 0 }
 0x257   : > { %v2205_v48 = vsel %vm2201_vm8, %v2185_v53, %v2188_v20  ;;  %v5021_v40 = vshrl.u32 %v2285_v13, 5  ;;  %v2302_v31 = vshll.u32 %v6760_v18, %v2287_v52  ;;  %v2303_v5 = vshrl.u32 %v6761_v16, %v4989_v21 }
 0x258   : > { %vm1533_vm12 = vweird.f32 %v6771_v55  ;;  %v2207_v37 = vsel %vm2203_vm9, %v2191_v9, %v2206_v38  ;;  %v2290_v15 = vshll.u32 %v6720_v63, %v2287_v52  ;;  %v2293_v56 = vshll.u32 %v6762_v42, %v2287_v52  ;;  %v6779_v55 = vld [vmem:[#allocation13_spill] sm:$0xff]  ;;  %v6784_v38 = vld [vmem:[#allocation14_spill] sm:$0xff] }
 0x259   : > { %v2381_v57 = vshrl.u32 %v2380_v2, 23  ;;  %v2291_v20 = vshrl.u32 %v6762_v42, %v4989_v21  ;;  %v2294_v13 = vshrl.u32 %v6763_v41, %v4989_v21  ;;  %v2296_v53 = vshll.u32 %v6763_v41, %v2287_v52  ;;  %v6775_v2 = vld [vmem:[#allocation23_spill] sm:$0xff] }
 0x25a   : > { %v2297_v3 = vshrl.u32 %v6759_v25, %v4989_v21  ;;  %vm1640_vm13 = vcmp.lt.s32.totalorder %v4872_v24, 2  ;;  %3414 = vcosq.f32 %v1737_v59  ;;  %v6772_v9 = vand.u32 2147483647, %v6770_v30 }
 0x25b   : > { %v1839_v32 = vsub.s32 4, %v6775_v2  ;;  %v3109_v22 = vmin.u32 %v2027_v33, %v4985_v28  ;;  %v2301_v1 = vor.u32 %v2300_v51, %v2299_v11  ;;  %v3106_v23 = vadd.s32 4294967294, %v1925_v45 }
 0x25c   : > { %vm5041_vm14 = vcmp.le.f32.partialorder %v6772_v9, 0.7853982  ;;  %v6776_v52 = vand.u32 2147483647, %v4802_v44  ;;  %v2304_v34 = vor.u32 %v2303_v5, %v2302_v31  ;;  %vm2308_vm15 = vcmp.lt.s32.totalorder %v5021_v40, 4  ;;  %v6813_v44 = vld [vmem:[#allocation26_spill] sm:$0xff] }
 0x25d   : > { %v1836_v61 = vmul.f32 %v1835_v54, %v1833_v58  ;;  %v2208_v46 = vsel %vm2202_vm10, %v2205_v48, %v2207_v37  ;;  %v2227_v9 = vadd.s32 1, %v5002_v0  ;;  %v3124_v41 = vadd.s32 4294967169, %v2381_v57  ;;  %v6778_v57 = vld [vmem:[#allocation12_spill] sm:$0xff] }
 0x25e   : > { %v2280_v35 = vand.u32 8388607, %v6776_v52  ;;  %vm2226_vm0 = vc.u32 %v5010_v47, %v5001_v14  ;;  %v5055_v42 = vor.u32 %v2291_v20, %v2290_v15  ;;  %v5057_v33 = vor.u32 %v2294_v13, %v2293_v56 }
 0x25f   : > { %v2298_v45 = vor.u32 %v2297_v3, %v2296_v53  ;;  %v2029_v11 = vclz %v3109_v22  ;;  %vm2305_vm1 = vcmp.lt.s32.totalorder %v5021_v40, 1  ;;  %vm2307_vm2 = vcmp.lt.s32.totalorder %v5021_v40, 3 }
 0x260   : > { %v2314_v4 = vsel %vm2308_vm15, %v2301_v1, 920167782  ;;  %vm1637_vm3 = vweird.f32 %v3997_v29  ;;  %vm3107_vm4 = vcmp.lt.s32.totalorder %v3106_v23, 0  ;;  %v2224_v54 = vmul.u32 %v4964_v50, %v2208_v46 }
 0x261   : > { %v2281_v58 = vor.u32 8388608, %v2280_v35  ;;  %v2318_v51 = vsel %vm2308_vm15, %v2304_v34, 1326507024  ;;  %3416 = vsinq.f32 %v1737_v59  ;;  %v1840_v22 = vsel %vm1755_vm11, %v1839_v32, %v6775_v2  ;;  %v1171_v2 = vpop.permute.xlu0 %1170 }
 0x262   : > { %v2228_v48 = vsel %vm2226_vm0, %v2227_v9, %v5002_v0  ;;  %v2387_v31 = vadd.s32 1, %v3124_v41  ;;  %v1837_v5 = vxor.u32 2147483648, %v1836_v61  ;;  %vm2306_vm5 = vcmp.lt.s32.totalorder %v5021_v40, 2 }
 0x263   : > { %v2313_v46 = vsel %vm2305_vm1, %v5055_v42, %v5057_v33  ;;  %v2315_v35 = vsel %vm2307_vm2, %v2298_v45, %v2314_v4  ;;  %v5078_v50 = vsel %vm3107_vm4, 0, %v3106_v23  ;;  %v3110_v34 = vadd.s32 4294967294, %v2029_v11 }
 0x264   : > { %v2317_v59 = vsel %vm2305_vm1, %v5057_v33, %v2298_v45  ;;  %v2319_v41 = vsel %vm2307_vm2, %v2301_v1, %v2318_v51  ;;  %v5088_v0 = vsel %vm1533_vm12, nan, %v4973_v7  ;;  %v1842_v32 = vsel %vm5041_vm14, 0, %v1840_v22  ;;  %v5096_v15 = vpop.eup %3414 }
 0x265   : > { %6777 = vst [vmem:[#allocation5_spill] sm:$0xff] %v5088_v0  ;;  %v5092_v37 = vadd.s32 %v2228_v48, %v2224_v54  ;;  %v5094_v23 = vshll.u32 %v2281_v58, 8  ;;  %v2316_v56 = vsel %vm2306_vm5, %v2313_v46, %v2315_v35  ;;  %vm2388_vm6 = vcmp.gt.s32.totalorder %v2387_v31, 0 }
 0x266   : > { %v904_v1 = vmul.f32 %v4765_v10, %v4765_v10  ;;  %v5104_v7 = vadd.f32 %v6779_v55, %v6778_v57  ;;  %v1647_v20 = vsel %vm1640_vm13, %v4993_v49, %v4982_v6  ;;  %v5111_v13 = vand.u32 3, %v4975_v26  ;;  %v6787_v57 = vld [vmem:[#allocation10_spill] sm:$0xff] }
 0x267   : > { %v1933_v53 = vsub.s32 4294967266, %v5078_v50  ;;  %v2320_v3 = vsel %vm2306_vm5, %v2317_v59, %v2319_v41  ;;  %v1838_v52 = vsel %vm1755_vm11, %v1837_v5, %v1836_v61  ;;  %v1846_v9 = vadd.s32 3, %v1842_v32 }
 0x268   : > { %6780 = vst [vmem:[#allocation23_spill] sm:$0xff] %v5104_v7  ;;  %vm3111_vm7 = vcmp.lt.s32.totalorder %v3110_v34, 0  ;;  %v1206_v11 = vmul.f32 %v4585_v17, %v1171_v2  ;;  %923 = vadd.xlane.f32.xlu1 %v904_v1  ;;  %v2230_v24 = vadd.s32 536870912, %v5092_v37  ;;  %v2389_v49 = vsel %vm2388_vm6, %v2387_v31, 0 }
 0x269   : > { %v5121_v6 = vmul.u32.u64.low %v5094_v23, %v2316_v56  ;;  %v5122_v26 = vmul.u32.u64.high %v5094_v23, %v2316_v56, %v5121_v6  ;;  %v2289_v4 = vshrl.u32 %v6720_v63, %v4989_v21  ;;  %v902_v61 = vmul.f32 %v4931_v43, %v4931_v43  ;;  %v6785_v56 = vld [vmem:[#allocation15_spill] sm:$0xff] }
 0x26a   : > { %v5128_v54 = vmul.u32.u64.low %v5094_v23, %v2320_v3  ;;  %v5129_v58 = vmul.u32.u64.high %v5094_v23, %v2320_v3, %v5128_v54  ;;  %v1913_v51 = vadd.s32 %v4691_v27, %v4703_v62  ;;  %v1929_v22 = vsub.s32 32, %v5078_v50 }
 0x26b   : > { %v1934_v48 = vadd.s32 127, %v1933_v53  ;;  %v2310_v5 = vsel %vm2308_vm15, %v2298_v45, 2102212464  ;;  %v5138_v31 = vpop.eup %3416  ;;  %v5142_v21 = vsel %vm1637_vm3, nan, %v1647_v20  ;;  %vm1748_vm8 = vcmp.eq.s32.totalorder %v5111_v13, 2 }
 0x26c   : > { %6781 = vst [vmem:[#allocation12_spill] sm:$0xff] %v5142_v21  ;;  %v1749_v46 = vxor.u32 2147483648, %v5096_v15  ;;  %v2391_v35 = vand.u32 31, %v2389_v49  ;;  %919 = vadd.xlane.f32.xlu1 %v902_v61  ;;  %v1841_v27 = vsel %vm5041_vm14, %v6770_v30, %v1838_v52  ;;  %v5149_v62 = vand.u32 3, %v1846_v9 }
 0x26d   : > { %v5152_v45 = vsel %vm3111_vm7, 0, %v3110_v34  ;;  %v5154_v59 = vshrl.u32 %v2230_v24, 30  ;;  %v2309_v29 = vsel %vm2305_vm1, %v2289_v4, %v5055_v42  ;;  %v2311_v41 = vsel %vm2307_vm2, %v5057_v33, %v2310_v5 }
 0x26e   : > { %v5163_v32 = vadd.f32 %v4626_v12, %v1206_v11  ;;  %v5167_v1 = vadd.f32 %v6785_v56, %v6784_v38  ;;  %vm1859_vm9 = vcmp.lt.s32.totalorder %v6787_v57, 0  ;;  %v1930_v55 = vshll.u32 %v4937_v8, %v5078_v50 }
 0x26f   : > { %6782 = vst [vmem:[#allocation13_spill] sm:$0xff] %v5154_v59  ;;  %v1931_v20 = vshrl.u32 %v1913_v51, %v1929_v22  ;;  %v1935_v42 = vshll.u32 %v1934_v48, 23  ;;  %v5176_v33 = vsel %vm1748_vm8, %v1749_v46, %v5138_v31  ;;  %3418 = vcosq.f32 %v1841_v27 }
 0x270   : > { %6783 = vst [vmem:[#allocation45_spill] sm:$0xff] %v5163_v32  ;;  %6786 = vst [vmem:[#allocation14_spill] sm:$0xff] %v5167_v1  ;;  %v2037_v53 = vsub.s32 4294967266, %v5152_v45  ;;  %v5179_v3 = vsub.s32 32, %v2391_v35  ;;  %3420 = vsinq.f32 %v1841_v27  ;;  %v1943_v2 = vsub.s32 4, %v4885_v19 }
 0x271   : > { %v2312_v52 = vsel %vm2306_vm5, %v2309_v29, %v2311_v41  ;;  %v2331_v8 = vadd.s32 1, %v5122_v26  ;;  %vm1745_vm10 = vcmp.eq.s32.totalorder %v5111_v13, 0  ;;  %v2017_v50 = vadd.s32 %v4775_v36, %v4789_v39 }
 0x272   : > { %v2232_v9 = vshll.u32 %v5154_v59, 30  ;;  %vm2330_vm11 = vc.u32 %v5129_v58, %v5121_v6  ;;  %v2484_v11 = vand.u32 2139095040, %v5163_v32  ;;  %v1932_v24 = vor.u32 %v1931_v20, %v1930_v55  ;;  %v6817_v59 = vld [vmem:[#allocation29_spill] sm:$0xff] }
 0x273   : > { %v1936_v4 = vor.u32 4788187, %v1935_v42  ;;  %v2033_v54 = vsub.s32 32, %v5152_v45  ;;  %v6651_v40 = vand.u32 2147483647, %v4967_v60  ;;  %v2038_v36 = vadd.s32 127, %v2037_v53 }
 0x274   : > { %v6788_v61 = vand.u32 2147483647, %v6787_v57  ;;  %v2328_v39 = vmul.u32 %v5094_v23, %v2312_v52  ;;  %v2403_v22 = vshll.u32 %v6759_v25, %v2391_v35  ;;  %v2404_v48 = vshrl.u32 %v6760_v18, %v5179_v3 }
 0x275   : > { %v2332_v5 = vsel %vm2330_vm11, %v2331_v8, %v5122_v26  ;;  %v5205_v46 = vshrl.u32 %v2389_v49, 5  ;;  %v2406_v27 = vshll.u32 %v6760_v18, %v2391_v35  ;;  %v2407_v29 = vshrl.u32 %v6761_v16, %v5179_v3 }
 0x276   : > { %vm5196_vm12 = vcmp.le.f32.partialorder %v6788_v61, 0.7853982  ;;  %vm1744_vm13 = vcmp.lt.s32.totalorder %v5111_v13, 2  ;;  %v5212_v41 = vsub.s32 %v5092_v37, %v2232_v9  ;;  %v2394_v23 = vshll.u32 %v6720_v63, %v2391_v35 }
 0x277   : > { %v6791_v38 = vmov 2475754826   ;;  %v2485_v55 = vshrl.u32 %v2484_v11, 23  ;;  %v6792_v49 = vmov 2131351028   ;;  %v2401_v53 = vshrl.u32 %v6759_v25, %v5179_v3 }
 0x278   : > { %v2397_v56 = vshll.u32 %v6791_v38, %v2391_v35  ;;  %v2395_v26 = vshrl.u32 %v6791_v38, %v5179_v3  ;;  %v2398_v20 = vshrl.u32 %v6792_v49, %v5179_v3  ;;  %v2400_v42 = vshll.u32 %v6792_v49, %v2391_v35 }
 0x279   : > { %v1939_v52 = vcvt.s32.f32 %v1932_v24  ;;  %v1944_v37 = vsel %vm1859_vm9, %v1943_v2, %v4885_v19  ;;  %v5226_v8 = vadd.s32 %v2332_v5, %v2328_v39  ;;  %v2405_v9 = vor.u32 %v2404_v48, %v2403_v22  ;;  %v5231_v21 = vpop.eup %3418  ;;  %v6794_v5 = vld [vmem:[#allocation6_spill] sm:$0xff] }
 0x27a   : > { %v1937_v11 = vand.u32 2147483647, %v1936_v4  ;;  %v2384_v61 = vand.u32 8388607, %v6651_v40  ;;  %v2408_v34 = vor.u32 %v2407_v29, %v2406_v27  ;;  %vm2412_vm14 = vcmp.lt.s32.totalorder %v5205_v46, 4  ;;  %v5235_v0 = vpop.eup %3420 }
 0x27b   : > { %v2034_v35 = vshll.u32 %v4985_v28, %v5152_v45  ;;  %v2035_v24 = vshrl.u32 %v2017_v50, %v2033_v54  ;;  %v2039_v43 = vshll.u32 %v2038_v36, 23  ;;  %v3128_v10 = vadd.s32 4294967169, %v2485_v55 }
 0x27c   : > { %v2235_v19 = vsub.s32 0, %v5212_v41  ;;  %v5238_v2 = vor.u32 %v2395_v26, %v2394_v23  ;;  %v5240_v4 = vor.u32 %v2398_v20, %v2397_v56  ;;  %v2402_v39 = vor.u32 %v2401_v53, %v2400_v42  ;;  %v6795_v23 = vld [vmem:[#allocation16_spill] sm:$0xff]  ;;  %v6796_v56 = vld [vmem:[#allocation17_spill] sm:$0xff]  ;;  %v6798_v20 = vld [vmem:[#allocation11_spill] sm:$0xff] }
 0x27d   : > { %v2334_v22 = vadd.s32 536870912, %v5226_v8  ;;  %vm2409_vm15 = vcmp.lt.s32.totalorder %v5205_v46, 1  ;;  %vm2411_vm0 = vcmp.lt.s32.totalorder %v5205_v46, 3  ;;  %v2418_v28 = vsel %vm2412_vm14, %v2405_v9, 920167782 }
 0x27e   : > { %v6793_v45 = vxor.u32 2147483648, %v5138_v31  ;;  %v1946_v54 = vsel %vm5196_vm12, 0, %v1944_v37  ;;  %v2385_v36 = vor.u32 8388608, %v2384_v61  ;;  %v2422_v48 = vsel %vm2412_vm14, %v2408_v34, 1326507024 }
 0x27f   : > { %vm1741_vm1 = vweird.f32 %v6794_v5  ;;  %vm1849_vm2 = vcmp.eq.s32.totalorder %v5149_v62, 0  ;;  %vm1852_vm3 = vcmp.eq.s32.totalorder %v5149_v62, 2  ;;  %v1940_v27 = vmul.f32 %v1939_v52, %v1937_v11 }
 0x280   : > { %v1747_v50 = vsel %vm1745_vm10, %v5096_v15, %v6793_v45  ;;  %v2036_v29 = vor.u32 %v2035_v24, %v2034_v35  ;;  %v2491_v31 = vadd.s32 1, %v3128_v10  ;;  %v5261_v55 = vadd.f32 %v6796_v56, %v6795_v23 }
 0x281   : > { %v3117_v15 = vmin.u32 %v2235_v19, %v5212_v41  ;;  %vm2410_vm4 = vcmp.lt.s32.totalorder %v5205_v46, 2  ;;  %v2417_v34 = vsel %vm2409_vm15, %v5238_v2, %v5240_v4  ;;  %v2419_v26 = vsel %vm2411_vm0, %v2402_v39, %v2418_v28  ;;  %v1181_v19 = vpop.permute.xlu0 %1180 }
 0x282   : > { %6797 = vst [vmem:[#allocation15_spill] sm:$0xff] %v5261_v55  ;;  %vm1963_vm5 = vcmp.lt.s32.totalorder %v6798_v20, 0  ;;  %v2040_v42 = vor.u32 4788187, %v2039_v43  ;;  %v5272_v10 = vshrl.u32 %v2334_v22, 30  ;;  %v2421_v53 = vsel %vm2409_vm15, %v5240_v4, %v2402_v39  ;;  %867 = vadd.xlane.f32.xlu1 %v5261_v55  ;;  %v6800_v22 = vld [vmem:[#allocation18_spill] sm:$0xff] }
 0x283   : > { %v2423_v52 = vsel %vm2411_vm0, %v2405_v9, %v2422_v48  ;;  %v1751_v37 = vsel %vm1744_vm13, %v1747_v50, %v5176_v33  ;;  %v1853_v11 = vxor.u32 2147483648, %v5231_v21  ;;  %v1950_v61 = vadd.s32 3, %v1946_v54  ;;  %v6801_v9 = vld [vmem:[#allocation19_spill] sm:$0xff] }
 0x284   : > { %6799 = vst [vmem:[#allocation10_spill] sm:$0xff] %v5272_v10  ;;  %v5284_v35 = vshll.u32 %v2385_v36, 8  ;;  %v1850_v43 = vxor.u32 2147483648, %v5235_v0  ;;  %v2420_v24 = vsel %vm2410_vm4, %v2417_v34, %v2419_v26  ;;  %vm2492_vm6 = vcmp.gt.s32.totalorder %v2491_v31, 0  ;;  %v6806_v50 = vld [vmem:[#allocation7_spill] sm:$0xff]  ;;  %v6807_v26 = vld [vmem:[#allocation22_spill] sm:$0xff] }
 0x285   : > { %v5291_v28 = vadd.f32 %v6801_v9, %v6800_v22  ;;  %v1941_v45 = vxor.u32 2147483648, %v1940_v27  ;;  %v6803_v13 = vand.u32 2147483647, %v6798_v20  ;;  %v2047_v54 = vsub.s32 4, %v6806_v50 }
 0x286   : > { %v2237_v36 = vclz %v3117_v15  ;;  %v2424_v48 = vsel %vm2410_vm4, %v2421_v53, %v2423_v52  ;;  %v2041_v23 = vand.u32 2147483647, %v2040_v42  ;;  %v2043_v56 = vcvt.s32.f32 %v2036_v29  ;;  %v6810_v42 = vld [vmem:[#allocation24_spill] sm:$0xff]  ;;  %v6811_v52 = vld [vmem:[#allocation25_spill] sm:$0xff] }
 0x287   : > { %6802 = vst [vmem:[#allocation6_spill] sm:$0xff] %v5291_v28  ;;  %vm5295_vm7 = vcmp.le.f32.partialorder %v6803_v13, 0.7853982  ;;  %v2336_v34 = vshll.u32 %v5272_v10, 30  ;;  %v901_v22 = vmul.f32 %v6807_v26, %v6807_v26  ;;  %863 = vadd.xlane.f32.xlu1 %v5291_v28  ;;  %v2493_v40 = vsel %vm2492_vm6, %v2491_v31, 0  ;;  %v6814_v31 = vld [vmem:[#allocation27_spill] sm:$0xff] }
 0x288   : > { %v5307_v9 = vmul.u32.u64.low %v5284_v35, %v2420_v24  ;;  %v5308_v13 = vmul.u32.u64.high %v5284_v35, %v2420_v24, %v5307_v9  ;;  %v1208_v15 = vmul.f32 %v4585_v17, %v1181_v19  ;;  %v908_v29 = vmul.f32 %v5261_v55, %v5261_v55  ;;  %v6816_v19 = vld [vmem:[#allocation28_spill] sm:$0xff] }
 0x289   : > { %v5313_v60 = vmul.u32.u64.low %v5284_v35, %v2424_v48  ;;  %v5314_v53 = vmul.u32.u64.high %v5284_v35, %v2424_v48, %v5313_v60  ;;  %917 = vadd.xlane.f32.xlu0 %v901_v22  ;;  %v5320_v26 = vadd.f32 %v6811_v52, %v6810_v42  ;;  %v3118_v10 = vadd.s32 4294967294, %v2237_v36 }
 0x28a   : > { %6808 = vst [vmem:[#allocation16_spill] sm:$0xff] %v5307_v9  ;;  %v2393_v24 = vshrl.u32 %v6720_v63, %v5179_v3  ;;  %v5326_v30 = vadd.f32 %v6814_v31, %v6813_v44  ;;  %v5330_v48 = vadd.f32 %v6817_v59, %v6816_v19  ;;  %vm1848_vm8 = vcmp.lt.s32.totalorder %v5149_v62, 2 }
 0x28b   : > { %6809 = vst [vmem:[#allocation17_spill] sm:$0xff] %v5314_v53  ;;  %6812 = vst [vmem:[#allocation18_spill] sm:$0xff] %v5320_v26  ;;  %v5334_v60 = vsub.s32 %v5226_v8, %v2336_v34  ;;  %v2414_v22 = vsel %vm2412_vm14, %v2402_v39, 2102212464  ;;  %v2495_v36 = vand.u32 31, %v2493_v40  ;;  %931 = vadd.xlane.f32.xlu1 %v908_v29  ;;  %v5340_v3 = vsel %vm1741_vm1, nan, %v1751_v37 }
 0x28c   : > { %6815 = vst [vmem:[#allocation19_spill] sm:$0xff] %v5326_v30  ;;  %6818 = vst [vmem:[#allocation7_spill] sm:$0xff] %v5330_v48  ;;  %v1851_v44 = vsel %vm1849_vm2, %v5231_v21, %v1850_v43  ;;  %v1854_v59 = vsel %vm1852_vm3, %v1853_v11, %v5235_v0  ;;  %v5351_v8 = vsel %vm1963_vm5, %v2047_v54, %v6806_v50  ;;  %v5355_v34 = vand.u32 3, %v1950_v61  ;;  %v1151_v50 = vpop.permute.xlu1 %1150 }
 0x28d   : > { %6819 = vst [vmem:[#allocation24_spill] sm:$0xff] %v5340_v3  ;;  %v1942_v39 = vsel %vm1859_vm9, %v1941_v45, %v1940_v27  ;;  %v5358_v5 = vadd.f32 %v4626_v12, %v1208_v15  ;;  %865 = vadd.xlane.f32.xlu0 %v5104_v7  ;;  %v906_v21 = vmul.f32 %v5291_v28, %v5291_v28  ;;  %vm3119_vm10 = vcmp.lt.s32.totalorder %v3118_v10, 0 }
 0x28e   : > { %v5363_v37 = vmul.f32 %v2043_v56, %v2041_v23  ;;  %v2413_v0 = vsel %vm2409_vm15, %v2393_v24, %v5238_v2  ;;  %v2415_v27 = vsel %vm2411_vm0, %v5240_v4, %v2414_v22  ;;  %v5373_v11 = vsel %vm1848_vm8, %v1851_v44, %v1854_v59 }
 0x28f   : > { %6820 = vst [vmem:[#allocation25_spill] sm:$0xff] %v5358_v5  ;;  %6821 = vst [vmem:[#allocation26_spill] sm:$0xff] %v5373_v11  ;;  %v2050_v61 = vsel %vm5295_vm7, 0, %v5351_v8  ;;  %v2339_v43 = vsub.s32 0, %v5334_v60  ;;  %v5379_v45 = vsub.s32 32, %v2495_v36  ;;  %927 = vadd.xlane.f32.xlu1 %v906_v21  ;;  %v5384_v2 = vsel %vm5196_vm12, %v6787_v57, %v1942_v39 }
 0x290   : > { %v2225_v62 = vadd.s32 %v5001_v14, %v5010_v47  ;;  %v2435_v4 = vadd.s32 1, %v5308_v13  ;;  %v1202_v54 = vmul.f32 %v4585_v17, %v1151_v50  ;;  %v5390_v23 = vsel %vm3119_vm10, 0, %v3118_v10 }
 0x291   : > { %v2416_v56 = vsel %vm2410_vm4, %v2413_v0, %v2415_v27  ;;  %vm2434_vm9 = vc.u32 %v5314_v53, %v5307_v9  ;;  %v2692_v15 = vand.u32 2139095040, %v5358_v5  ;;  %861 = vadd.xlane.f32.xlu0 %v5167_v1  ;;  %v2241_v14 = vsub.s32 32, %v5390_v23 }
 0x292   : > { %v6661_v17 = vand.u32 2147483647, %v5163_v32  ;;  %v3121_v10 = vmin.u32 %v2339_v43, %v5334_v60  ;;  %v2510_v46 = vshll.u32 %v6760_v18, %v2495_v36  ;;  %v2511_v29 = vshrl.u32 %v6761_v16, %v5379_v45 }
 0x293   : > { %v907_v42 = vmul.f32 %v5104_v7, %v5104_v7  ;;  %875 = vadd.xlane.f32.xlu1 %v5330_v48  ;;  %v2432_v52 = vmul.u32 %v5284_v35, %v2416_v56  ;;  %v2436_v24 = vsel %vm2434_vm9, %v2435_v4, %v5308_v13  ;;  %v5412_v31 = vshrl.u32 %v2493_v40, 5  ;;  %v6823_v13 = vld [vmem:[#allocation30_spill] sm:$0xff] }
 0x294   : > { %v5415_v19 = vadd.f32 %v4626_v12, %v1202_v54  ;;  %v2498_v22 = vshll.u32 %v6720_v63, %v2495_v36  ;;  %v2507_v44 = vshll.u32 %v6759_v25, %v2495_v36  ;;  %v2508_v59 = vshrl.u32 %v6760_v18, %v5379_v45  ;;  %v6824_v12 = vld [vmem:[#allocation31_spill] sm:$0xff] }
 0x295   : > { %v2693_v39 = vshrl.u32 %v2692_v15, 23  ;;  %929 = vadd.xlane.f32.xlu0 %v907_v42  ;;  %v2499_v21 = vshrl.u32 %v6791_v38, %v5379_v45  ;;  %v2501_v35 = vshll.u32 %v6791_v38, %v2495_v36  ;;  %v2502_v40 = vshrl.u32 %v6792_v49, %v5379_v45 }
 0x296   : > { %6822 = vst [vmem:[#allocation27_spill] sm:$0xff] %v5415_v19  ;;  %v5428_v0 = vadd.f32 %v6824_v12, %v6823_v13  ;;  %v2245_v27 = vsub.s32 4294967266, %v5390_v23  ;;  %v2504_v43 = vshll.u32 %v6792_v49, %v2495_v36  ;;  %v2505_v50 = vshrl.u32 %v6759_v25, %v5379_v45 }
 0x297   : > { %v2512_v4 = vor.u32 %v2511_v29, %v2510_v46  ;;  %v2243_v54 = vshrl.u32 %v2225_v62, %v2241_v14  ;;  %vm2516_vm11 = vcmp.lt.s32.totalorder %v5412_v31, 4  ;;  %v2068_v56 = vand.u32 2139095040, %v5415_v19 }
 0x298   : > { %6825 = vst [vmem:[#allocation28_spill] sm:$0xff] %v5428_v0  ;;  %v905_v15 = vmul.f32 %v5167_v1, %v5167_v1  ;;  %871 = vadd.xlane.f32.xlu1 %v5428_v0  ;;  %v5439_v42 = vadd.s32 %v2436_v24, %v2432_v52  ;;  %v2488_v13 = vand.u32 8388607, %v6661_v17  ;;  %v2509_v36 = vor.u32 %v2508_v59, %v2507_v44  ;;  %v1176_v24 = vpop.permute.xlu1 %1175  ;;  %v6829_v59 = vld [vmem:[#allocation35_spill] sm:$0xff] }
 0x299   : > { %v3136_v12 = vadd.s32 4294967169, %v2693_v39  ;;  %v2341_v47 = vclz %v3121_v10  ;;  %v5443_v51 = vor.u32 %v2499_v21, %v2498_v22  ;;  %v5445_v62 = vor.u32 %v2502_v40, %v2501_v35  ;;  %v6826_v10 = vld [vmem:[#allocation33_spill] sm:$0xff]  ;;  %v6827_v22 = vld [vmem:[#allocation34_spill] sm:$0xff]  ;;  %v6830_v39 = vld [vmem:[#allocation36_spill] sm:$0xff] }
 0x29a   : > { %925 = vadd.xlane.f32.xlu0 %v905_v15  ;;  %v912_v14 = vmul.f32 %v5330_v48, %v5330_v48  ;;  %v2506_v46 = vor.u32 %v2505_v50, %v2504_v43  ;;  %vm2513_vm12 = vcmp.lt.s32.totalorder %v5412_v31, 1  ;;  %vm2515_vm13 = vcmp.lt.s32.totalorder %v5412_v31, 3  ;;  %v6832_v35 = vld [vmem:[#allocation38_spill] sm:$0xff]  ;;  %v6833_v40 = vld [vmem:[#allocation39_spill] sm:$0xff] }
 0x29b   : > { %v2526_v29 = vsel %vm2516_vm11, %v2512_v4, 1326507024  ;;  %v2069_v52 = vshrl.u32 %v2068_v56, 23  ;;  %v5455_v44 = vadd.f32 %v6827_v22, %v6826_v10  ;;  %v5459_v21 = vadd.f32 %v6830_v39, %v6829_v59  ;;  %v6835_v22 = vld [vmem:[#allocation40_spill] sm:$0xff]  ;;  %v6836_v59 = vld [vmem:[#allocation41_spill] sm:$0xff] }
 0x29c   : > { %939 = vadd.xlane.f32.xlu1 %v912_v14  ;;  %v5463_v43 = vadd.f32 %v6833_v40, %v6832_v35  ;;  %v2438_v50 = vadd.s32 536870912, %v5439_v42  ;;  %v2489_v15 = vor.u32 8388608, %v2488_v13  ;;  %v2522_v4 = vsel %vm2516_vm11, %v2509_v36, 920167782 }
 0x29d   : > { %6828 = vst [vmem:[#allocation29_spill] sm:$0xff] %v5455_v44  ;;  %6831 = vst [vmem:[#allocation30_spill] sm:$0xff] %v5459_v21  ;;  %v2699_v56 = vadd.s32 1, %v3136_v12  ;;  %v2246_v14 = vadd.s32 127, %v2245_v27  ;;  %v3122_v17 = vadd.s32 4294967294, %v2341_v47  ;;  %v910_v10 = vmul.f32 %v5428_v0, %v5428_v0 }
 0x29e   : > { %6834 = vst [vmem:[#allocation31_spill] sm:$0xff] %v5463_v43  ;;  %873 = vadd.xlane.f32.xlu0 %v5320_v26  ;;  %v5473_v39 = vadd.f32 %v6836_v59, %v6835_v22  ;;  %vm2514_vm14 = vcmp.lt.s32.totalorder %v5412_v31, 2  ;;  %v2525_v13 = vsel %vm2513_vm12, %v5445_v62, %v2506_v46  ;;  %v2527_v12 = vsel %vm2515_vm13, %v2509_v36, %v2526_v29  ;;  %v3496_v47 = vld [vmem:[%s6598_s5] ss:$0 sm:$0xff] }
 0x29f   : > { %v1207_v27 = vmul.f32 %v3496_v47, %v1176_v24  ;;  %v5488_v35 = vadd.s32 3, %v2050_v61  ;;  %v2521_v40 = vsel %vm2513_vm12, %v5443_v51, %v5445_v62  ;;  %v2523_v22 = vsel %vm2515_vm13, %v2506_v46, %v2522_v4  ;;  %v1186_v4 = vpop.permute.xlu1 %1185 }
 0x2a0   : > { %6837 = vst [vmem:[#allocation33_spill] sm:$0xff] %v5473_v39  ;;  %v3112_v36 = vadd.s32 4294967169, %v2069_v52  ;;  %935 = vadd.xlane.f32.xlu1 %v910_v10  ;;  %3422 = vcosq.f32 %v5384_v2  ;;  %v5497_v29 = vshrl.u32 %v2438_v50, 30  ;;  %v5499_v24 = vshll.u32 %v2489_v15, 8 }
 0x2a1   : > { %6838 = vst [vmem:[#allocation34_spill] sm:$0xff] %v5488_v35  ;;  %vm2700_vm15 = vcmp.gt.s32.totalorder %v2699_v56, 0  ;;  %v6840_v8 = vxor.u32 2147483648, %v5363_v37  ;;  %v2247_v59 = vshll.u32 %v2246_v14, 23  ;;  %v2329_v0 = vadd.s32 %v5121_v6, %v5129_v58 }
 0x2a2   : > { %6839 = vst [vmem:[#allocation35_spill] sm:$0xff] %v5497_v29  ;;  %v2528_v52 = vsel %vm2514_vm14, %v2525_v13, %v2527_v12  ;;  %869 = vadd.xlane.f32.xlu0 %v5326_v30  ;;  %v6841_v50 = vshll.u32 %v5212_v41, %v5390_v23  ;;  %vm3123_vm0 = vcmp.lt.s32.totalorder %v3122_v17, 0  ;;  %v2524_v10 = vsel %vm2514_vm14, %v2521_v40, %v2523_v22 }
 0x2a3   : > { %v2046_v61 = vsel %vm1963_vm5, %v6840_v8, %v5363_v37  ;;  %v3497_v37 = vld [vmem:[%s6599_s6] ss:$0 sm:$0xff]  ;;  %v6663_v58 = vand.u32 2147483647, %v5358_v5  ;;  %v2701_v14 = vsel %vm2700_vm15, %v2699_v56, 0  ;;  %v2075_v13 = vadd.s32 1, %v3112_v36 }
 0x2a4   : > { %v5514_v15 = vor.u32 %v2243_v54, %v6841_v50  ;;  %v5521_v6 = vadd.f32 %v3497_v37, %v1207_v27  ;;  %v911_v12 = vmul.f32 %v5320_v26, %v5320_v26  ;;  %883 = vadd.xlane.f32.xlu1 %v5463_v43  ;;  %v2440_v41 = vshll.u32 %v5497_v29, 30 }
 0x2a5   : > { %v5529_v23 = vmul.u32.u64.low %v5499_v24, %v2528_v52  ;;  %v5530_v54 = vmul.u32.u64.high %v5499_v24, %v2528_v52, %v5529_v23  ;;  %v1209_v40 = vmul.f32 %v3496_v47, %v1186_v4  ;;  %v5532_v22 = vor.u32 4788187, %v2247_v59 }
 0x2a6   : > { %6842 = vst [vmem:[#allocation36_spill] sm:$0xff] %v5521_v6  ;;  %v2497_v27 = vshrl.u32 %v6720_v63, %v5379_v45  ;;  %v5537_v56 = vmul.u32.u64.low %v5499_v24, %v2524_v10  ;;  %v5538_v36 = vmul.u32.u64.high %v5499_v24, %v2524_v10, %v5537_v56  ;;  %937 = vadd.xlane.f32.xlu0 %v911_v12  ;;  %v5542_v8 = vsel %vm3123_vm0, 0, %v3122_v17 }
 0x2a7   : > { %6843 = vst [vmem:[#allocation38_spill] sm:$0xff] %v5530_v54  ;;  %v2518_v50 = vsel %vm2516_vm11, %v2506_v46, 2102212464  ;;  %v2703_v52 = vand.u32 31, %v2701_v14  ;;  %v2588_v47 = vand.u32 2139095040, %v5521_v6  ;;  %v2345_v59 = vsub.s32 32, %v5542_v8 }
 0x2a8   : > { %6844 = vst [vmem:[#allocation39_spill] sm:$0xff] %v5537_v56  ;;  %v2696_v45 = vand.u32 8388607, %v6663_v58  ;;  %vm2076_vm1 = vcmp.gt.s32.totalorder %v2075_v13, 0  ;;  %v909_v4 = vmul.f32 %v5326_v30, %v5326_v30  ;;  %879 = vadd.xlane.f32.xlu1 %v5473_v39  ;;  %3424 = vsinq.f32 %v5384_v2 }
 0x2a9   : > { %v5557_v17 = vsel %vm5295_vm7, %v6798_v20, %v2046_v61  ;;  %v5560_v46 = vsub.s32 %v5439_v42, %v2440_v41  ;;  %v5562_v10 = vadd.f32 %v3497_v37, %v1209_v40  ;;  %v2517_v23 = vsel %vm2513_vm12, %v2497_v27, %v5443_v51 }
 0x2aa   : > { %v2519_v2 = vsel %vm2515_vm13, %v5445_v62, %v2518_v50  ;;  %933 = vadd.xlane.f32.xlu0 %v909_v4  ;;  %v914_v33 = vmul.f32 %v5473_v39, %v5473_v39  ;;  %v5573_v61 = vpop.eup %3422  ;;  %v5576_v37 = vsub.s32 32, %v2703_v52  ;;  %v2077_v41 = vsel %vm2076_vm1, %v2075_v13, 0 }
 0x2ab   : > { %6845 = vst [vmem:[#allocation40_spill] sm:$0xff] %v5560_v46  ;;  %v2589_v40 = vshrl.u32 %v2588_v47, 23  ;;  %v5581_v27 = vshrl.u32 %v2329_v0, %v2345_v59  ;;  %v2697_v50 = vor.u32 8388608, %v2696_v45  ;;  %v5587_v58 = vsel %vm2514_vm14, %v2517_v23, %v2519_v2 }
 0x2ac   : > { %943 = vadd.xlane.f32.xlu1 %v914_v33  ;;  %vm2538_vm2 = vc.u32 %v5530_v54, %v5537_v56  ;;  %v2796_v13 = vand.u32 2139095040, %v5562_v10  ;;  %v2539_v47 = vadd.s32 1, %v5538_v36  ;;  %v5593_v12 = vshrl.u32 %v2701_v14, 5 }
 0x2ad   : > { %v2079_v0 = vand.u32 31, %v2077_v41  ;;  %v916_v59 = vmul.f32 %v5463_v43, %v5463_v43  ;;  %v2706_v45 = vshll.u32 %v6720_v63, %v2703_v52  ;;  %v2715_v31 = vshll.u32 %v6759_v25, %v2703_v52 }
 0x2ae   : > { %881 = vadd.xlane.f32.xlu0 %v5455_v44  ;;  %v2716_v23 = vshrl.u32 %v6760_v18, %v5576_v37  ;;  %v3132_v2 = vadd.s32 4294967169, %v2589_v40  ;;  %v2707_v33 = vshrl.u32 %v6791_v38, %v5576_v37  ;;  %v2709_v14 = vshll.u32 %v6791_v38, %v2703_v52 }
 0x2af   : > { %v2710_v42 = vshrl.u32 %v6792_v49, %v5576_v37  ;;  %v2712_v51 = vshll.u32 %v6792_v49, %v2703_v52  ;;  %v2713_v4 = vshrl.u32 %v6759_v25, %v5576_v37  ;;  %v2718_v62 = vshll.u32 %v6760_v18, %v2703_v52 }
 0x2b0   : > { %947 = vadd.xlane.f32.xlu1 %v916_v59  ;;  %v2719_v43 = vshrl.u32 %v6761_v16, %v5576_v37  ;;  %v2797_v40 = vshrl.u32 %v2796_v13, 23  ;;  %v2536_v39 = vmul.u32 %v5499_v24, %v5587_v58  ;;  %v2540_v30 = vsel %vm2538_vm2, %v2539_v47, %v5538_v36 }
 0x2b1   : > { %v5619_v26 = vshll.u32 %v2697_v50, 8  ;;  %v5621_v59 = vsub.s32 32, %v2079_v0  ;;  %v2717_v52 = vor.u32 %v2716_v23, %v2715_v31  ;;  %vm2721_vm3 = vcmp.lt.s32.totalorder %v5593_v12, 1 }
 0x2b2   : > { %877 = vadd.xlane.f32.xlu0 %v5459_v21  ;;  %v5624_v3 = vpop.eup %3424  ;;  %v2595_v48 = vadd.s32 1, %v3132_v2  ;;  %v5628_v24 = vor.u32 %v2707_v33, %v2706_v45  ;;  %v5630_v58 = vor.u32 %v2710_v42, %v2709_v14  ;;  %vm2724_vm4 = vcmp.lt.s32.totalorder %v5593_v12, 4 }
 0x2b3   : > { %6846 = vst [vmem:[#allocation41_spill] sm:$0xff] %v5624_v3  ;;  %v913_v36 = vmul.f32 %v5459_v21, %v5459_v21  ;;  %v2714_v50 = vor.u32 %v2713_v4, %v2712_v51  ;;  %v2720_v47 = vor.u32 %v2719_v43, %v2718_v62  ;;  %vm2723_vm5 = vcmp.lt.s32.totalorder %v5593_v12, 3 }
 0x2b4   : > { %v3140_v1 = vadd.s32 4294967169, %v2797_v40  ;;  %v2091_v31 = vshll.u32 %v6759_v25, %v2079_v0  ;;  %v2092_v23 = vshrl.u32 %v6760_v18, %v5621_v59  ;;  %v2094_v45 = vshll.u32 %v6760_v18, %v2079_v0 }
 0x2b5   : > { %v2095_v42 = vshrl.u32 %v6761_v16, %v5621_v59  ;;  %v2730_v2 = vsel %vm2724_vm4, %v2717_v52, 920167782  ;;  %v5644_v33 = vshrl.u32 %v2077_v41, 5  ;;  %v2082_v43 = vshll.u32 %v6720_v63, %v2079_v0 }
 0x2b6   : > { %941 = vadd.xlane.f32.xlu0 %v913_v36  ;;  %vm2596_vm6 = vcmp.gt.s32.totalorder %v2595_v48, 0  ;;  %v2083_v51 = vshrl.u32 %v6791_v38, %v5621_v59  ;;  %v2085_v62 = vshll.u32 %v6791_v38, %v2079_v0  ;;  %v2086_v4 = vshrl.u32 %v6792_v49, %v5621_v59 }
 0x2b7   : > { %v915_v14 = vmul.f32 %v5455_v44, %v5455_v44  ;;  %v2734_v40 = vsel %vm2724_vm4, %v2720_v47, 1326507024  ;;  %v2088_v41 = vshll.u32 %v6792_v49, %v2079_v0  ;;  %v2089_v36 = vshrl.u32 %v6759_v25, %v5621_v59 }
 0x2b8   : > { %v2803_v13 = vadd.s32 1, %v3140_v1  ;;  %vm2722_vm7 = vcmp.lt.s32.totalorder %v5593_v12, 2  ;;  %v2093_v21 = vor.u32 %v2092_v23, %v2091_v31  ;;  %v2096_v7 = vor.u32 %v2095_v42, %v2094_v45 }
 0x2b9   : > { %v2597_v28 = vsel %vm2596_vm6, %v2595_v48, 0  ;;  %v2729_v44 = vsel %vm2721_vm3, %v5628_v24, %v5630_v58  ;;  %v2731_v47 = vsel %vm2723_vm5, %v2714_v50, %v2730_v2  ;;  %v2733_v0 = vsel %vm2721_vm3, %v5630_v58, %v2714_v50 }
 0x2ba   : > { %945 = vadd.xlane.f32.xlu0 %v915_v14  ;;  %vm2100_vm8 = vcmp.lt.s32.totalorder %v5644_v33, 4  ;;  %v2735_v1 = vsel %vm2723_vm5, %v2717_v52, %v2734_v40  ;;  %v6847_v48 = vand.u32 2147483647, %v5415_v19  ;;  %v5674_v23 = vor.u32 %v2083_v51, %v2082_v43 }
 0x2bb   : > { %v5676_v45 = vor.u32 %v2086_v4, %v2085_v62  ;;  %v2090_v42 = vor.u32 %v2089_v36, %v2088_v41  ;;  %vm2097_vm10 = vcmp.lt.s32.totalorder %v5644_v33, 1  ;;  %v2599_v2 = vand.u32 31, %v2597_v28 }
 0x2bc   : > { %v2072_v31 = vand.u32 8388607, %v6847_v48  ;;  %vm2804_vm9 = vcmp.gt.s32.totalorder %v2803_v13, 0  ;;  %v5679_v14 = vadd.s32 %v2540_v30, %v2536_v39  ;;  %vm2099_vm11 = vcmp.lt.s32.totalorder %v5644_v33, 3 }
 0x2bd   : > { %v2106_v55 = vsel %vm2100_vm8, %v2093_v21, 920167782  ;;  %v2110_v52 = vsel %vm2100_vm8, %v2096_v7, 1326507024  ;;  %v6848_v43 = vsub.s32 4294967266, %v5542_v8  ;;  %v6849_v62 = vsub.s32 0, %v5560_v46 }
 0x2be   : > { %v5697_v30 = vsel %vm2722_vm7, %v2729_v44, %v2731_v47  ;;  %v5701_v39 = vsel %vm2722_vm7, %v2733_v0, %v2735_v1  ;;  %v2073_v40 = vor.u32 8388608, %v2072_v31  ;;  %vm2098_vm12 = vcmp.lt.s32.totalorder %v5644_v33, 2 }
 0x2bf   : > { %v5688_v51 = vadd.s32 127, %v6848_v43  ;;  %v5693_v4 = vmin.u32 %v6849_v62, %v5560_v46  ;;  %v2105_v7 = vsel %vm2097_vm10, %v5674_v23, %v5676_v45  ;;  %v2805_v41 = vsel %vm2804_vm9, %v2803_v13, 0 }
 0x2c0   : > { %v2107_v36 = vsel %vm2099_vm11, %v2090_v42, %v2106_v55  ;;  %v2109_v44 = vsel %vm2097_vm10, %v5676_v45, %v2090_v42  ;;  %v2111_v47 = vsel %vm2099_vm11, %v2093_v21, %v2110_v52  ;;  %v5715_v0 = vsub.s32 32, %v2599_v2 }
 0x2c1   : > { %v5718_v1 = vadd.s32 536870912, %v5679_v14  ;;  %v5722_v48 = vshrl.u32 %v6720_v63, %v5576_v37  ;;  %v5726_v13 = vmul.u32.u64.low %v5619_v26, %v5697_v30  ;;  %v5727_v55 = vmul.u32.u64.high %v5619_v26, %v5697_v30, %v5726_v13 }
 0x2c2   : > { %v5732_v31 = vsel %vm2724_vm4, %v2714_v50, 2102212464  ;;  %v5736_v21 = vmul.u32.u64.low %v5619_v26, %v5701_v39  ;;  %v5737_v52 = vmul.u32.u64.high %v5619_v26, %v5701_v39, %v5736_v21  ;;  %v2807_v43 = vand.u32 31, %v2805_v41 }
 0x2c3   : > { %v2108_v37 = vsel %vm2098_vm12, %v2105_v7, %v2107_v36  ;;  %v2112_v62 = vsel %vm2098_vm12, %v2109_v44, %v2111_v47  ;;  %v5744_v30 = vshll.u32 %v2073_v40, 8  ;;  %v5747_v19 = vshrl.u32 %v2597_v28, 5 }
 0x2c4   : > { %v2602_v50 = vshll.u32 %v6720_v63, %v2599_v2  ;;  %v2611_v32 = vshll.u32 %v6759_v25, %v2599_v2  ;;  %v2612_v39 = vshrl.u32 %v6760_v18, %v5715_v0  ;;  %v2603_v21 = vshrl.u32 %v6791_v38, %v5715_v0 }
 0x2c5   : > { %v2605_v7 = vshll.u32 %v6791_v38, %v2599_v2  ;;  %v2606_v40 = vshrl.u32 %v6792_v49, %v5715_v0  ;;  %v2608_v36 = vshll.u32 %v6792_v49, %v2599_v2  ;;  %v2609_v28 = vshrl.u32 %v6759_v25, %v5715_v0 }
 0x2c6   : > { %v2614_v44 = vshll.u32 %v6760_v18, %v2599_v2  ;;  %v2615_v47 = vshrl.u32 %v6761_v16, %v5715_v0  ;;  %v5764_v5 = vsub.s32 32, %v2807_v43  ;;  %v2081_v56 = vshrl.u32 %v6720_v63, %v5621_v59 }
 0x2c7   : > { %v2102_v54 = vsel %vm2100_vm8, %v2090_v42, 2102212464  ;;  %v5771_v29 = vmul.u32.u64.low %v5744_v30, %v2112_v62  ;;  %v5772_v20 = vmul.u32.u64.high %v5744_v30, %v2112_v62, %v5771_v29  ;;  %v6850_v2 = vand.u32 2147483647, %v5521_v6 }
 0x2c8   : > { %v5775_v46 = vmul.u32.u64.low %v5744_v30, %v2108_v37  ;;  %v5776_v11 = vmul.u32.u64.high %v5744_v30, %v2108_v37, %v5775_v46  ;;  %v2613_v53 = vor.u32 %v2612_v39, %v2611_v32  ;;  %v5781_v35 = vor.u32 %v2603_v21, %v2602_v50 }
 0x2c9   : > { %v2592_v9 = vand.u32 8388607, %v6850_v2  ;;  %v5783_v3 = vor.u32 %v2606_v40, %v2605_v7  ;;  %vm2620_vm13 = vcmp.lt.s32.totalorder %v5747_v19, 4  ;;  %v2793_v59 = vand.u32 2147483647, %v5562_v10 }
 0x2ca   : > { %v2610_v42 = vor.u32 %v2609_v28, %v2608_v36  ;;  %v2616_v62 = vor.u32 %v2615_v47, %v2614_v44  ;;  %v2819_v29 = vshll.u32 %v6759_v25, %v2807_v43  ;;  %v2820_v37 = vshrl.u32 %v6760_v18, %v5764_v5 }
 0x2cb   : > { %vm2617_vm14 = vcmp.lt.s32.totalorder %v5747_v19, 1  ;;  %v5791_v6 = vshrl.u32 %v2805_v41, 5  ;;  %v2822_v32 = vshll.u32 %v6760_v18, %v2807_v43  ;;  %v2823_v50 = vshrl.u32 %v6761_v16, %v5764_v5 }
 0x2cc   : > { %vm2619_vm15 = vcmp.lt.s32.totalorder %v5747_v19, 3  ;;  %v2626_v39 = vsel %vm2620_vm13, %v2613_v53, 920167782  ;;  %v2810_v21 = vshll.u32 %v6720_v63, %v2807_v43  ;;  %v2813_v7 = vshll.u32 %v6791_v38, %v2807_v43 }
 0x2cd   : > { %v2811_v40 = vshrl.u32 %v6791_v38, %v5764_v5  ;;  %v2814_v41 = vshrl.u32 %v6792_v49, %v5764_v5  ;;  %v2816_v18 = vshll.u32 %v6792_v49, %v2807_v43  ;;  %v2817_v16 = vshrl.u32 %v6759_v25, %v5764_v5 }
 0x2ce   : > { %v2101_v36 = vsel %vm2097_vm10, %v2081_v56, %v5674_v23  ;;  %v2593_v28 = vor.u32 8388608, %v2592_v9  ;;  %v2630_v44 = vsel %vm2620_vm13, %v2616_v62, 1326507024  ;;  %v2821_v47 = vor.u32 %v2820_v37, %v2819_v29 }
 0x2cf   : > { %v2103_v38 = vsel %vm2099_vm11, %v5676_v45, %v2102_v54  ;;  %v2800_v2 = vand.u32 8388607, %v2793_v59  ;;  %v2824_v49 = vor.u32 %v2823_v50, %v2822_v32  ;;  %vm2828_vm0 = vcmp.lt.s32.totalorder %v5791_v6, 4 }
 0x2d0   : > { %vm2618_vm1 = vcmp.lt.s32.totalorder %v5747_v19, 2  ;;  %v2625_v25 = vsel %vm2617_vm14, %v5781_v35, %v5783_v3  ;;  %v2627_v9 = vsel %vm2619_vm15, %v2610_v42, %v2626_v39  ;;  %v2629_v54 = vsel %vm2617_vm14, %v5783_v3, %v2610_v42  ;;  %v6856_v19 = vld [vmem:[#allocation13_spill] sm:$0xff] }
 0x2d1   : > { %v2631_v56 = vsel %vm2619_vm15, %v2613_v53, %v2630_v44  ;;  %v5831_v23 = vor.u32 %v2811_v40, %v2810_v21  ;;  %v5833_v45 = vor.u32 %v2814_v41, %v2813_v7  ;;  %v2818_v43 = vor.u32 %v2817_v16, %v2816_v18 }
 0x2d2   : > { %v5835_v62 = vshll.u32 %v2593_v28, 8  ;;  %vm2825_vm2 = vcmp.lt.s32.totalorder %v5791_v6, 1  ;;  %vm2827_vm4 = vcmp.lt.s32.totalorder %v5791_v6, 3  ;;  %v2834_v29 = vsel %vm2828_vm0, %v2821_v47, 920167782 }
 0x2d3   : > { %v2725_v37 = vsel %vm2721_vm3, %v5722_v48, %v5628_v24  ;;  %v2628_v53 = vsel %vm2618_vm1, %v2625_v25, %v2627_v9  ;;  %v2801_v32 = vor.u32 8388608, %v2800_v2  ;;  %v2838_v50 = vsel %vm2828_vm0, %v2824_v49, 1326507024 }
 0x2d4   : > { %v2727_v39 = vsel %vm2723_vm5, %v5630_v58, %v5732_v31  ;;  %v2104_v21 = vsel %vm2098_vm12, %v2101_v36, %v2103_v38  ;;  %vm2122_vm6 = vc.u32 %v5772_v20, %v5775_v46  ;;  %v2632_v24 = vsel %vm2618_vm1, %v2629_v54, %v2631_v56 }
 0x2d5   : > { %v2123_v48 = vadd.s32 1, %v5776_v11  ;;  %vm2826_vm3 = vcmp.lt.s32.totalorder %v5791_v6, 2  ;;  %v2833_v7 = vsel %vm2825_vm2, %v5831_v23, %v5833_v45  ;;  %v2835_v58 = vsel %vm2827_vm4, %v2818_v43, %v2834_v29  ;;  %v858_v29 = vpop.xlane.xlu1 %857  ;;  %v6861_v6 = vld [vmem:[#allocation41_spill] sm:$0xff] }
 0x2d6   : > { %v5868_v33 = vmul.u32.u64.low %v5835_v62, %v2628_v53  ;;  %v5869_v31 = vmul.u32.u64.high %v5835_v62, %v2628_v53, %v5868_v33  ;;  %v2837_v40 = vsel %vm2825_vm2, %v5833_v45, %v2818_v43  ;;  %v2839_v41 = vsel %vm2827_vm4, %v2821_v47, %v2838_v50 }
 0x2d7   : > { %v2601_v18 = vshrl.u32 %v6720_v63, %v5715_v0  ;;  %v5880_v16 = vmul.u32.u64.low %v5835_v62, %v2632_v24  ;;  %v5881_v36 = vmul.u32.u64.high %v5835_v62, %v2632_v24, %v5880_v16  ;;  %v5883_v28 = vshll.u32 %v2801_v32, 8 }
 0x2d8   : > { %v6851_v44 = vshll.u32 %v5334_v60, %v5542_v8  ;;  %v2120_v2 = vmul.u32 %v5744_v30, %v2104_v21  ;;  %v2622_v47 = vsel %vm2620_vm13, %v2610_v42, 2102212464  ;;  %v2836_v0 = vsel %vm2826_vm3, %v2833_v7, %v2835_v58 }
 0x2d9   : > { %v2351_v49 = vshll.u32 %v5688_v51, 23  ;;  %v2445_v25 = vclz %v5693_v4  ;;  %v2124_v60 = vsel %vm2122_vm6, %v2123_v48, %v5776_v11  ;;  %v2840_v8 = vsel %vm2826_vm3, %v2837_v40, %v2839_v41  ;;  %v6857_v41 = vld [vmem:[#allocation9_spill] sm:$0xff] }
 0x2da   : > { %v5889_v38 = vor.u32 %v5581_v27, %v6851_v44  ;;  %v5905_v27 = vshrl.u32 %v5718_v1, 30  ;;  %v2728_v30 = vsel %vm2722_vm7, %v2725_v37, %v2727_v39  ;;  %vm2746_vm5 = vc.u32 %v5737_v52, %v5726_v13 }
 0x2db   : > { %v2747_v51 = vadd.s32 1, %v5727_v55  ;;  %v2621_v4 = vsel %vm2617_vm14, %v2601_v18, %v5781_v35  ;;  %v2623_v11 = vsel %vm2619_vm15, %v5783_v3, %v2622_v47  ;;  %v5923_v12 = vadd.s32 %v2124_v60, %v2120_v2  ;;  %v5931_v35 = vpop.xlane.xlu0 %859  ;;  %v6852_v3 = vld [vmem:[#allocation32_spill] sm:$0xff] }
 0x2dc   : > { %v5919_v42 = vmul.u32.u64.low %v5883_v28, %v2836_v0  ;;  %v5920_v1 = vmul.u32.u64.high %v5883_v28, %v2836_v0, %v5919_v42  ;;  %v2809_v9 = vshrl.u32 %v6720_v63, %v5764_v5  ;;  %vm1956_vm7 = vcmp.eq.s32.totalorder %v5355_v34, 2 }
 0x2dd   : > { %v5928_v54 = vmul.u32.u64.low %v5883_v28, %v2840_v8  ;;  %v5929_v56 = vmul.u32.u64.high %v5883_v28, %v2840_v8, %v5928_v54  ;;  %vm2171_vm8 = vcmp.lt.s32.totalorder %v6852_v3, 0  ;;  %v2352_v37 = vor.u32 4788187, %v2351_v49 }
 0x2de   : > { %v3126_v53 = vadd.s32 4294967294, %v2445_v25  ;;  %v2744_v32 = vmul.u32 %v5619_v26, %v2728_v30  ;;  %v2830_v50 = vsel %vm2828_vm0, %v2818_v43, 2102212464  ;;  %v2544_v63 = vshll.u32 %v5905_v27, 30 }
 0x2df   : > { %v2748_v5 = vsel %vm2746_vm5, %v2747_v51, %v5727_v55  ;;  %v2624_v39 = vsel %vm2618_vm1, %v2621_v4, %v2623_v11  ;;  %v2643_v21 = vadd.s32 1, %v5869_v31  ;;  %vm1953_vm10 = vcmp.eq.s32.totalorder %v5355_v34, 0 }
 0x2e0   : > { %v1957_v24 = vxor.u32 2147483648, %v5573_v61  ;;  %3426 = vcosq.f32 %v5557_v17  ;;  %vm2642_vm9 = vc.u32 %v5881_v36, %v5868_v33  ;;  %v5951_v26 = vmul.f32 0.0078125, %v858_v29 }
 0x2e1   : > { %v6853_v43 = vand.u32 2147483647, %v6852_v3  ;;  %v2255_v48 = vsub.s32 4, %v6856_v19  ;;  %v2126_v7 = vadd.s32 536870912, %v5923_v12  ;;  %v2829_v58 = vsel %vm2825_vm2, %v2809_v9, %v5831_v23 }
 0x2e2   : > { %v2831_v40 = vsel %vm2827_vm4, %v5833_v45, %v2830_v50  ;;  %vm1845_vm12 = vweird.f32 %v6857_v41  ;;  %v6858_v18 = vand.u32 2147483647, %v5532_v22  ;;  %v6859_v16 = vcvt.s32.f32 %v5514_v15  ;;  %v922_v15 = vpop.xlane.xlu0 %921 }
 0x2e3   : > { %vm5955_vm11 = vcmp.le.f32.partialorder %v6853_v43, 0.7853982  ;;  %vm3127_vm13 = vcmp.lt.s32.totalorder %v3126_v53, 0  ;;  %v5972_v2 = vadd.s32 %v2748_v5, %v2744_v32  ;;  %v2640_v47 = vmul.u32 %v5835_v62, %v2624_v39 }
 0x2e4   : > { %v2252_v44 = vmul.f32 %v6859_v16, %v6858_v18  ;;  %vm1952_vm14 = vcmp.lt.s32.totalorder %v5355_v34, 2  ;;  %v2353_v0 = vand.u32 2147483647, %v2352_v37  ;;  %v2355_v23 = vcvt.s32.f32 %v5889_v38  ;;  %v6860_v38 = vld [vmem:[#allocation42_spill] sm:$0xff]  ;;  %v6866_v16 = vld [vmem:[#allocation17_spill] sm:$0xff] }
 0x2e5   : > { %v5978_v49 = vsub.s32 %v5679_v14, %v2544_v63  ;;  %v2644_v22 = vsel %vm2642_vm9, %v2643_v21, %v5869_v31  ;;  %v2832_v45 = vsel %vm2826_vm3, %v2829_v58, %v2831_v40  ;;  %v2851_v25 = vadd.s32 1, %v5920_v1  ;;  %v6862_v63 = vld [vmem:[#allocation34_spill] sm:$0xff] }
 0x2e6   : > { %v967_v62 = vmul.f32 %v5951_v26, %v5951_v26  ;;  %v951_v60 = vmul.f32 0.0078125, %v922_v15  ;;  %3428 = vsinq.f32 %v5557_v17  ;;  %vm2275_vm15 = vcmp.lt.s32.totalorder %v6860_v38, 0  ;;  %v6868_v15 = vld [vmem:[#allocation26_spill] sm:$0xff] }
 0x2e7   : > { %v5991_v14 = vsel %vm3127_vm13, 0, %v3126_v53  ;;  %v5993_v8 = vshrl.u32 %v2126_v7, 30  ;;  %vm2850_vm0 = vc.u32 %v5929_v56, %v5919_v42  ;;  %vm1949_vm1 = vweird.f32 %v6787_v57 }
 0x2e8   : > { %v1954_v31 = vxor.u32 2147483648, %v6861_v6  ;;  %v2750_v30 = vadd.s32 536870912, %v5972_v2  ;;  %v6000_v51 = vadd.s32 %v2644_v22, %v2640_v47  ;;  %v983_v4 = vsub.f32 %v951_v60, %v967_v62  ;;  %v6867_v47 = vld [vmem:[#allocation16_spill] sm:$0xff] }
 0x2e9   : > { %v2253_v11 = vxor.u32 2147483648, %v2252_v44  ;;  %v2256_v17 = vsel %vm2171_vm8, %v2255_v48, %v6856_v19  ;;  %v2547_v9 = vsub.s32 0, %v5978_v49  ;;  %v2848_v54 = vmul.u32 %v5883_v28, %v2832_v45 }
 0x2ea   : > { %v2356_v29 = vmul.f32 %v2355_v23, %v2353_v0  ;;  %v2453_v37 = vsub.s32 4294967266, %v5991_v14  ;;  %v2852_v53 = vsel %vm2850_vm0, %v2851_v25, %v5920_v1  ;;  %v999_v32 = vadd.f32 1e-05, %v983_v4  ;;  %v6022_v43 = vpop.eup %3426  ;;  %v6869_v25 = vld [vmem:[#allocation10_spill] sm:$0xff] }
 0x2eb   : > { %v1958_v50 = vsel %vm1956_vm7, %v1957_v24, %v6861_v6  ;;  %v6013_v5 = vand.u32 3, %v6862_v63  ;;  %v6863_v39 = vand.u32 2147483647, %v6860_v38  ;;  %v2128_v28 = vshll.u32 %v5993_v8, 30  ;;  %v6080_v63 = vpop.xlane.xlu1 %853 }
 0x2ec   : > { %v2258_v1 = vsel %vm5955_vm11, 0, %v2256_v17  ;;  %v6026_v19 = vshrl.u32 %v2750_v30, 30  ;;  %v2646_v24 = vadd.s32 536870912, %v6000_v51  ;;  %3430 = vrsqrt.f32 %v999_v32 }
 0x2ed   : > { %vm6017_vm2 = vcmp.le.f32.partialorder %v6863_v39, 0.7853982  ;;  %v1955_v48 = vsel %vm1953_vm10, %v5573_v61, %v1954_v31  ;;  %v2254_v7 = vsel %vm2171_vm8, %v2253_v11, %v2252_v44  ;;  %v3129_v58 = vmin.u32 %v2547_v9, %v5978_v49  ;;  %v6870_v11 = vld [vmem:[#allocation40_spill] sm:$0xff]  ;;  %v6085_v39 = vld [vmem:[%s6596_s3] ss:$0 sm:$0xff] }
 0x2ee   : > { %v6035_v40 = vadd.s32 %v2852_v53, %v2848_v54  ;;  %v2357_v18 = vxor.u32 2147483648, %v2356_v29  ;;  %v2433_v0 = vadd.s32 %v6867_v47, %v6866_v16  ;;  %v2449_v23 = vsub.s32 32, %v5991_v14  ;;  %v856_v16 = vpop.xlane.xlu0 %855 }
 0x2ef   : > { %v2454_v22 = vadd.s32 127, %v2453_v37  ;;  %v6043_v45 = vsel %vm1845_vm12, nan, %v6868_v15  ;;  %v2262_v61 = vadd.s32 3, %v2258_v1  ;;  %v2359_v62 = vsub.s32 4, %v6869_v25 }
 0x2f0   : > { %v6047_v44 = vsub.s32 %v5923_v12, %v2128_v28  ;;  %v1959_v60 = vsel %vm1952_vm14, %v1955_v48, %v1958_v50  ;;  %vm2057_vm4 = vcmp.eq.s32.totalorder %v6013_v5, 0  ;;  %v2752_v6 = vshll.u32 %v6026_v19, 30  ;;  %v3429_v30 = vpop.eup %3428 }
 0x2f1   : > { %v6053_v31 = vshrl.u32 %v2646_v24, 30  ;;  %vm2060_vm6 = vcmp.eq.s32.totalorder %v6013_v5, 2  ;;  %v2257_v41 = vsel %vm5955_vm11, %v6852_v3, %v2254_v7  ;;  %v2549_v4 = vclz %v3129_v58 }
 0x2f2   : > { %v2854_v12 = vadd.s32 536870912, %v6035_v40  ;;  %v2358_v34 = vsel %vm2275_vm15, %v2357_v18, %v2356_v29  ;;  %v2450_v17 = vshll.u32 %v6870_v11, %v5991_v14  ;;  %v2451_v9 = vshrl.u32 %v2433_v0, %v2449_v23  ;;  %v6872_v0 = vld [vmem:[#allocation21_spill] sm:$0xff] }
 0x2f3   : > { %v2455_v54 = vshll.u32 %v2454_v22, 23  ;;  %v6066_v37 = vsel %vm1949_vm1, nan, %v1959_v60  ;;  %vm2056_vm3 = vcmp.lt.s32.totalorder %v6013_v5, 2  ;;  %v6069_v53 = vand.u32 3, %v2262_v61 }
 0x2f4   : > { %v2360_v55 = vsel %vm2275_vm15, %v2359_v62, %v6869_v25  ;;  %v2131_v32 = vsub.s32 0, %v6047_v44  ;;  %v2058_v29 = vxor.u32 2147483648, %v3429_v30  ;;  %v2061_v14 = vxor.u32 2147483648, %v6022_v43  ;;  %v6112_v62 = vld [vmem:[%s6597_s4] ss:$0 sm:$0xff] }
 0x2f5   : > { %v6077_v50 = vsub.s32 %v5972_v2, %v2752_v6  ;;  %v2648_v57 = vshll.u32 %v6053_v31, 30  ;;  %3432 = vcosq.f32 %v2257_v41  ;;  %v2361_v28 = vsel %vm6017_vm2, %v6860_v38, %v2358_v34  ;;  %v6871_v2 = vld [vmem:[#allocation11_spill] sm:$0xff] }
 0x2f6   : > { %v3130_v1 = vadd.s32 4294967294, %v2549_v4  ;;  %v6090_v24 = vshrl.u32 %v2854_v12, 30  ;;  %v3431_v48 = vpop.eup %3430  ;;  %vm2053_vm5 = vweird.f32 %v6871_v2  ;;  %3434 = vsinq.f32 %v2257_v41  ;;  %v924_v4 = vpop.xlane.xlu1 %923  ;;  %v6873_v12 = vld [vmem:[#allocation8_spill] sm:$0xff] }
 0x2f7   : > { %v2362_v7 = vsel %vm6017_vm2, 0, %v2360_v55  ;;  %v2452_v58 = vor.u32 %v2451_v9, %v2450_v17  ;;  %v2456_v18 = vor.u32 4788187, %v2455_v54  ;;  %v3113_v47 = vmin.u32 %v2131_v32, %v6047_v44 }
 0x2f8   : > { %v1031_v23 = vsub.f32 %v6872_v0, %v5951_v26  ;;  %v6100_v22 = vmul.f32 0.0078125, %v5931_v35  ;;  %v1054_v15 = vmul.f32 %v3431_v48, %v6085_v39  ;;  %v2062_v61 = vsel %vm2060_vm6, %v2061_v14, %v3429_v30 }
 0x2f9   : > { %3436 = vcosq.f32 %v2361_v28  ;;  %v2755_v21 = vsub.s32 0, %v6077_v50  ;;  %v6107_v25 = vsub.s32 %v6000_v51, %v2648_v57  ;;  %vm3131_vm7 = vcmp.lt.s32.totalorder %v3130_v1, 0 }
 0x2fa   : > { %v2856_v35 = vshll.u32 %v6090_v24, 30  ;;  %v1070_v26 = vmul.f32 %v1054_v15, %v1031_v23  ;;  %v6117_v60 = vmul.f32 0.0078125, %v856_v16  ;;  %v2059_v6 = vsel %vm2057_vm4, %v6022_v43, %v2058_v29  ;;  %v6874_v29 = vld [vmem:[#allocation5_spill] sm:$0xff] }
 0x2fb   : > { %v2366_v30 = vadd.s32 3, %v2362_v7  ;;  %v2457_v51 = vand.u32 2147483647, %v2456_v18  ;;  %v2459_v41 = vcvt.s32.f32 %v2452_v58  ;;  %vm2379_vm8 = vcmp.lt.s32.totalorder %v6873_v12, 0  ;;  %v920_v18 = vpop.xlane.xlu1 %919 }
 0x2fc   : > { %v2133_v34 = vclz %v3113_v47  ;;  %v968_v11 = vmul.f32 %v6100_v22, %v6100_v22  ;;  %v1093_v17 = vadd.f32 %v6112_v62, %v1070_v26  ;;  %v952_v9 = vmul.f32 0.0078125, %v924_v4  ;;  %v6879_v4 = vld [vmem:[#allocation38_spill] sm:$0xff] }
 0x2fd   : > { %3438 = vsinq.f32 %v2361_v28  ;;  %v6127_v54 = vsel %vm3131_vm7, 0, %v3130_v1  ;;  %v3137_v55 = vmin.u32 %v2755_v21, %v6077_v50  ;;  %v2651_v43 = vsub.s32 0, %v6107_v25 }
 0x2fe   : > { %v6132_v32 = vsub.s32 %v6035_v40, %v2856_v35  ;;  %v2899_v14 = vadd.f32 %v6874_v29, %v1093_v17  ;;  %v984_v57 = vsub.f32 %v952_v9, %v968_v11  ;;  %v966_v48 = vmul.f32 %v6117_v60, %v6117_v60 }
 0x2ff   : > { %v2063_v7 = vsel %vm2056_vm3, %v2059_v6, %v2062_v61  ;;  %vm2265_vm10 = vcmp.eq.s32.totalorder %v6069_v53, 0  ;;  %v6140_v28 = vand.u32 3, %v2366_v30  ;;  %v6875_v1 = vand.u32 2147483647, %v6873_v12  ;;  %v3433_v16 = vpop.eup %3432  ;;  %v6878_v61 = vld [vmem:[#allocation35_spill] sm:$0xff] }
 0x300   : > { %v2460_v40 = vmul.f32 %v2459_v41, %v2457_v51  ;;  %v2557_v47 = vsub.s32 4294967266, %v6127_v54  ;;  %v3114_v0 = vadd.s32 4294967294, %v2133_v34  ;;  %2915 = vst [vmem:[%s6149_s18 + $0x10] sm:$0xff] %v2899_v14  ;;  %v1000_v5 = vadd.f32 1e-05, %v984_v57  ;;  %v3435_v15 = vpop.eup %3434  ;;  %v6880_v34 = vld [vmem:[#allocation39_spill] sm:$0xff] }
 0x301   : > { %vm6144_vm9 = vcmp.le.f32.partialorder %v6875_v1, 0.7853982  ;;  %v950_v23 = vmul.f32 0.0078125, %v920_v18  ;;  %vm2268_vm11 = vcmp.eq.s32.totalorder %v6069_v53, 2  ;;  %v2463_v21 = vsub.s32 4, %v6878_v61 }
 0x302   : > { %v2757_v35 = vclz %v3137_v55  ;;  %v3133_v26 = vmin.u32 %v2651_v43, %v6107_v25  ;;  %v6157_v6 = vsel %vm2053_vm5, nan, %v2063_v7  ;;  %v2859_v30 = vsub.s32 0, %v6132_v32  ;;  %v6881_v7 = vld [vmem:[#allocation45_spill] sm:$0xff] }
 0x303   : > { %3440 = vrsqrt.f32 %v1000_v5  ;;  %v982_v51 = vsub.f32 %v950_v23, %v966_v48  ;;  %v3437_v41 = vpop.eup %3436  ;;  %vm2369_vm12 = vcmp.eq.s32.totalorder %v6140_v28, 0  ;;  %vm2372_vm13 = vcmp.eq.s32.totalorder %v6140_v28, 2 }
 0x304   : > { %v2537_v11 = vadd.s32 %v6880_v34, %v6879_v4  ;;  %v2553_v17 = vsub.s32 32, %v6127_v54  ;;  %v2461_v9 = vxor.u32 2147483648, %v2460_v40  ;;  %v2558_v55 = vadd.s32 127, %v2557_v47 }
 0x305   : > { %vm3115_vm14 = vcmp.lt.s32.totalorder %v3114_v0, 0  ;;  %v998_v2 = vadd.f32 1e-05, %v982_v51  ;;  %v2269_v43 = vxor.u32 2147483648, %v3433_v16  ;;  %v2464_v29 = vsel %vm2379_vm8, %v2463_v21, %v6878_v61 }
 0x306   : > { %v3138_v14 = vadd.s32 4294967294, %v2757_v35  ;;  %v2653_v57 = vclz %v3133_v26  ;;  %v2266_v48 = vxor.u32 2147483648, %v3435_v15  ;;  %v6882_v1 = vand.u32 2147483647, %v6881_v7 }
 0x307   : > { %v3141_v5 = vmin.u32 %v2859_v30, %v6132_v32  ;;  %3442 = vrsqrt.f32 %v998_v2  ;;  %v3439_v47 = vpop.eup %3438  ;;  %vm2264_vm0 = vcmp.lt.s32.totalorder %v6069_v53, 2  ;;  %v2373_v23 = vxor.u32 2147483648, %v3437_v41 }
 0x308   : > { %vm6170_vm15 = vcmp.le.f32.partialorder %v6882_v1, 0.7853982  ;;  %v2554_v51 = vshll.u32 %v5978_v49, %v6127_v54  ;;  %v2555_v61 = vshrl.u32 %v2537_v11, %v2553_v17  ;;  %v2136_v21 = vsel %vm3115_vm14, 0, %v3114_v0  ;;  %v6885_v1 = vld [vmem:[#allocation37_spill] sm:$0xff] }
 0x309   : > { %vm2368_vm1 = vcmp.lt.s32.totalorder %v6140_v28, 2  ;;  %v2462_v35 = vsel %vm2379_vm8, %v2461_v9, %v2460_v40  ;;  %v2466_v26 = vsel %vm6144_vm9, 0, %v2464_v29  ;;  %v2559_v4 = vshll.u32 %v2558_v55, 23 }
 0x30a   : > { %v2567_v30 = vsub.s32 4, %v5905_v27  ;;  %v2270_v34 = vsel %vm2268_vm11, %v2269_v43, %v3435_v15  ;;  %vm2483_vm2 = vcmp.lt.s32.totalorder %v6881_v7, 0  ;;  %vm3139_vm4 = vcmp.lt.s32.totalorder %v3138_v14, 0 }
 0x30b   : > { %v3134_v49 = vadd.s32 4294967294, %v2653_v57  ;;  %v2267_v54 = vsel %vm2265_vm10, %v3433_v16, %v2266_v48  ;;  %v2370_v0 = vxor.u32 2147483648, %v3439_v47  ;;  %v2141_v11 = vsub.s32 4294967266, %v2136_v21 }
 0x30c   : > { %v2861_v17 = vclz %v3141_v5  ;;  %vm2261_vm6 = vweird.f32 %v6852_v3  ;;  %vm2365_vm3 = vweird.f32 %v6860_v38  ;;  %v2374_v40 = vsel %vm2372_vm13, %v2373_v23, %v3439_v47 }
 0x30d   : > { %v2465_v15 = vsel %vm6144_vm9, %v6873_v12, %v2462_v35  ;;  %v2470_v9 = vadd.s32 3, %v2466_v26  ;;  %v2556_v55 = vor.u32 %v2555_v61, %v2554_v51  ;;  %v3441_v2 = vpop.eup %3440  ;;  %v2560_v43 = vor.u32 4788187, %v2559_v4 }
 0x30e   : > { %v2568_v16 = vsel %vm2483_vm2, %v2567_v30, %v5905_v27  ;;  %v6199_v29 = vsel %vm3139_vm4, 0, %v3138_v14  ;;  %v2121_v57 = vadd.s32 %v5775_v46, %v5772_v20  ;;  %v2137_v48 = vsub.s32 32, %v2136_v21  ;;  %v6886_v30 = vld [vmem:[#allocation20_spill] sm:$0xff] }
 0x30f   : > { %vm3135_vm5 = vcmp.lt.s32.totalorder %v3134_v49, 0  ;;  %v1032_v5 = vsub.f32 %v6885_v1, %v6100_v22  ;;  %v1055_v58 = vmul.f32 %v3441_v2, %v6085_v39  ;;  %v2371_v47 = vsel %vm2369_vm12, %v3437_v41, %v2370_v0 }
 0x310   : > { %3444 = vcosq.f32 %v2465_v15  ;;  %v2142_v23 = vadd.s32 127, %v2141_v11  ;;  %v3142_v51 = vadd.s32 4294967294, %v2861_v17  ;;  %v2563_v27 = vcvt.s32.f32 %v2556_v55 }
 0x311   : > { %3446 = vsinq.f32 %v2465_v15  ;;  %v2570_v14 = vsel %vm6170_vm15, 0, %v2568_v16  ;;  %v1071_v61 = vmul.f32 %v1055_v58, %v1032_v5  ;;  %v3443_v20 = vpop.eup %3442  ;;  %v2561_v46 = vand.u32 2147483647, %v2560_v43  ;;  %v868_v16 = vpop.xlane.xlu1 %867 }
 0x312   : > { %v2765_v35 = vsub.s32 4294967266, %v6199_v29  ;;  %v2138_v22 = vshll.u32 %v6047_v44, %v2136_v21  ;;  %v6212_v26 = vsel %vm3135_vm5, 0, %v3134_v49  ;;  %v2139_v4 = vshrl.u32 %v2121_v57, %v2137_v48  ;;  %v6887_v49 = vld [vmem:[#allocation12_spill] sm:$0xff] }
 0x313   : > { %v1094_v41 = vadd.f32 %v6112_v62, %v1071_v61  ;;  %v1030_v0 = vsub.f32 %v6886_v30, %v6117_v60  ;;  %v1053_v11 = vmul.f32 %v3443_v20, %v6085_v39  ;;  %v2271_v17 = vsel %vm2264_vm0, %v2267_v54, %v2270_v34 }
 0x314   : > { %v6220_v15 = vand.u32 3, %v2470_v9  ;;  %v2143_v55 = vshll.u32 %v2142_v23, 23  ;;  %vm3143_vm7 = vcmp.lt.s32.totalorder %v3142_v51, 0  ;;  %v2375_v44 = vsel %vm2368_vm1, %v2371_v47, %v2374_v40  ;;  %v6888_v47 = vld [vmem:[#allocation44_spill] sm:$0xff] }
 0x315   : > { %v2661_v21 = vsub.s32 4294967266, %v6212_v26  ;;  %v2900_v2 = vadd.f32 %v6887_v49, %v1094_v41  ;;  %v1069_v43 = vmul.f32 %v1053_v11, %v1030_v0  ;;  %v2564_v60 = vmul.f32 %v2563_v27, %v2561_v46  ;;  %v864_v38 = vpop.xlane.xlu1 %863 }
 0x316   : > { %v2574_v57 = vadd.s32 3, %v2570_v14  ;;  %v2745_v53 = vadd.s32 %v5726_v13, %v5737_v52  ;;  %v2761_v34 = vsub.s32 32, %v6199_v29  ;;  %v2766_v54 = vadd.s32 127, %v2765_v35 }
 0x317   : > { %v2140_v9 = vor.u32 %v2139_v4, %v2138_v22  ;;  %v6229_v48 = vsel %vm3143_vm7, 0, %v3142_v51  ;;  %2916 = vst [vmem:[%s6149_s18 + $0x18] sm:$0xff] %v2900_v2  ;;  %v1092_v28 = vadd.f32 %v6112_v62, %v1069_v43  ;;  %v6235_v40 = vsel %vm2261_vm6, nan, %v2271_v17  ;;  %v918_v22 = vpop.xlane.xlu0 %917 }
 0x318   : > { %v6239_v1 = vsel %vm2365_vm3, nan, %v2375_v44  ;;  %v2144_v5 = vor.u32 4788187, %v2143_v55  ;;  %v6242_v13 = vmul.f32 0.0078125, %v6080_v63  ;;  %vm2473_vm8 = vcmp.eq.s32.totalorder %v6220_v15, 0  ;;  %v6889_v44 = vld [vmem:[#allocation27_spill] sm:$0xff] }
 0x319   : > { %vm2476_vm10 = vcmp.eq.s32.totalorder %v6220_v15, 2  ;;  %v2641_v52 = vadd.s32 %v5868_v33, %v5881_v36  ;;  %v2657_v3 = vsub.s32 32, %v6212_v26  ;;  %v2662_v58 = vadd.s32 127, %v2661_v21  ;;  %v932_v55 = vpop.xlane.xlu1 %931 }
 0x31a   : > { %v2898_v23 = vadd.f32 %v6888_v47, %v1092_v28  ;;  %v3445_v51 = vpop.eup %3444  ;;  %v2565_v27 = vxor.u32 2147483648, %v2564_v60  ;;  %v6250_v14 = vand.u32 3, %v2574_v57  ;;  %v2869_v63 = vsub.s32 4294967266, %v6229_v48 }
 0x31b   : > { %v6253_v61 = vmul.f32 0.0078125, %v868_v16  ;;  %v3447_v20 = vpop.eup %3446  ;;  %v2762_v46 = vshll.u32 %v6077_v50, %v6199_v29  ;;  %v2763_v35 = vshrl.u32 %v2745_v53, %v2761_v34  ;;  %v2767_v33 = vshll.u32 %v2766_v54, 23  ;;  %v866_v57 = vpop.xlane.xlu0 %865 }
 0x31c   : > { %v2147_v36 = vcvt.s32.f32 %v2140_v9  ;;  %2914 = vst [vmem:[%s6149_s18 + $0x8] sm:$0xff] %v2898_v23  ;;  %v2145_v4 = vand.u32 2147483647, %v2144_v5  ;;  %v2658_v41 = vshll.u32 %v6107_v25, %v6212_v26  ;;  %v965_v30 = vmul.f32 %v6242_v13, %v6242_v13 }
 0x31d   : > { %v949_v0 = vmul.f32 0.0078125, %v918_v22  ;;  %vm2472_vm9 = vcmp.lt.s32.totalorder %v6220_v15, 2  ;;  %v2659_v11 = vshrl.u32 %v2641_v52, %v2657_v3  ;;  %v2663_v17 = vshll.u32 %v2662_v58, 23  ;;  %v928_v3 = vpop.xlane.xlu1 %927  ;;  %v6890_v58 = vld [vmem:[#allocation25_spill] sm:$0xff] }
 0x31e   : > { %v2849_v50 = vadd.s32 %v5919_v42, %v5929_v56  ;;  %v2865_v29 = vsub.s32 32, %v6229_v48  ;;  %vm2067_vm11 = vcmp.lt.s32.totalorder %v6889_v44, 0  ;;  %v2870_v21 = vadd.s32 127, %v2869_v63 }
 0x31f   : > { %v981_v49 = vsub.f32 %v949_v0, %v965_v30  ;;  %v972_v25 = vmul.f32 %v6253_v61, %v6253_v61  ;;  %v956_v26 = vmul.f32 0.0078125, %v932_v55  ;;  %v2477_v2 = vxor.u32 2147483648, %v3445_v51 }
 0x320   : > { %v2764_v43 = vor.u32 %v2763_v35, %v2762_v46  ;;  %v2768_v16 = vor.u32 4788187, %v2767_v33  ;;  %v6269_v53 = vmul.f32 0.0078125, %v864_v38  ;;  %v2474_v34 = vxor.u32 2147483648, %v3447_v20 }
 0x321   : > { %v2566_v42 = vsel %vm2483_vm2, %v2565_v27, %v2564_v60  ;;  %v997_v56 = vadd.f32 1e-05, %v981_v49  ;;  %v988_v54 = vsub.f32 %v956_v26, %v972_v25  ;;  %v2148_v9 = vmul.f32 %v2147_v36, %v2145_v4  ;;  %v862_v27 = vpop.xlane.xlu0 %861  ;;  %v876_v30 = vpop.xlane.xlu1 %875 }
 0x322   : > { %v2660_v28 = vor.u32 %v2659_v11, %v2658_v41  ;;  %v2664_v5 = vor.u32 4788187, %v2663_v17  ;;  %v2866_v52 = vshll.u32 %v6132_v32, %v6229_v48  ;;  %vm2691_vm12 = vcmp.lt.s32.totalorder %v6890_v58, 0 }
 0x323   : > { %v2867_v47 = vshrl.u32 %v2849_v50, %v2865_v29  ;;  %v2871_v23 = vshll.u32 %v2870_v21, 23  ;;  %3448 = vrsqrt.f32 %v997_v56  ;;  %v1004_v38 = vadd.f32 1e-05, %v988_v54 }
 0x324   : > { %v2769_v63 = vand.u32 2147483647, %v2768_v16  ;;  %v2771_v46 = vcvt.s32.f32 %v2764_v43  ;;  %v970_v60 = vmul.f32 %v6269_v53, %v6269_v53  ;;  %v954_v35 = vmul.f32 0.0078125, %v928_v3 }
 0x325   : > { %v2475_v33 = vsel %vm2473_vm8, %v3445_v51, %v2474_v34  ;;  %v2478_v32 = vsel %vm2476_vm10, %v2477_v2, %v3447_v20  ;;  %v6282_v48 = vmul.f32 0.0078125, %v866_v57  ;;  %3450 = vrsqrt.f32 %v1004_v38  ;;  %v930_v18 = vpop.xlane.xlu0 %929  ;;  %v872_v56 = vpop.xlane.xlu1 %871 }
 0x326   : > { %v2569_v36 = vsel %vm6170_vm15, %v6881_v7, %v2566_v42  ;;  %v2149_v22 = vxor.u32 2147483648, %v2148_v9  ;;  %v2151_v4 = vsub.s32 4, %v5993_v8  ;;  %v986_v41 = vsub.f32 %v954_v35, %v970_v60  ;;  %v6901_v60 = vld [vmem:[#allocation22_spill] sm:$0xff] }
 0x327   : > { %v2665_v0 = vand.u32 2147483647, %v2664_v5  ;;  %v2667_v11 = vcvt.s32.f32 %v2660_v28  ;;  %v2868_v17 = vor.u32 %v2867_v47, %v2866_v52  ;;  %v2872_v50 = vor.u32 4788187, %v2871_v23 }
 0x328   : > { %v2772_v51 = vmul.f32 %v2771_v46, %v2769_v63  ;;  %v2775_v29 = vsub.s32 4, %v6026_v19  ;;  %v6891_v20 = vand.u32 2147483647, %v6889_v44  ;;  %v1002_v21 = vadd.f32 1e-05, %v986_v41  ;;  %v6902_v41 = vld [vmem:[#allocation15_spill] sm:$0xff] }
 0x329   : > { %v6297_v49 = vsel %vm2472_vm9, %v2475_v33, %v2478_v32  ;;  %3452 = vcosq.f32 %v2569_v36  ;;  %v971_v25 = vmul.f32 %v6282_v48, %v6282_v48  ;;  %v955_v26 = vmul.f32 0.0078125, %v930_v18  ;;  %v926_v63 = vpop.xlane.xlu0 %925 }
 0x32a   : > { %vm6291_vm13 = vcmp.le.f32.partialorder %v6891_v20, 0.7853982  ;;  %v2150_v2 = vsel %vm2067_vm11, %v2149_v22, %v2148_v9  ;;  %v2152_v43 = vsel %vm2067_vm11, %v2151_v4, %v5993_v8  ;;  %v6306_v16 = vmul.f32 0.0078125, %v862_v27  ;;  %v6894_v9 = vld [vmem:[#allocation36_spill] sm:$0xff] }
 0x32b   : > { %3454 = vrsqrt.f32 %v1002_v21  ;;  %v2668_v57 = vmul.f32 %v2667_v11, %v2665_v0  ;;  %v2873_v34 = vand.u32 2147483647, %v2872_v50  ;;  %v2875_v15 = vcvt.s32.f32 %v2868_v17  ;;  %v940_v11 = vpop.xlane.xlu1 %939 }
 0x32c   : > { %v987_v42 = vsub.f32 %v955_v26, %v971_v25  ;;  %3456 = vsinq.f32 %v2569_v36  ;;  %v2773_v54 = vxor.u32 2147483648, %v2772_v51  ;;  %v6311_v28 = vsel %vm2691_vm12, %v2775_v29, %v6026_v19 }
 0x32d   : > { %vm2587_vm14 = vcmp.lt.s32.totalorder %v6894_v9, 0  ;;  %v3449_v5 = vpop.eup %3448  ;;  %v6895_v8 = vand.u32 2147483647, %v6890_v58  ;;  %v2153_v3 = vsel %vm6291_vm13, %v6889_v44, %v2150_v2  ;;  %v2154_v47 = vsel %vm6291_vm13, 0, %v2152_v43  ;;  %v874_v18 = vpop.xlane.xlu0 %873 }
 0x32e   : > { %v6898_v23 = vand.u32 2147483647, %v6894_v9  ;;  %v1003_v38 = vadd.f32 1e-05, %v987_v42  ;;  %v6331_v46 = vmul.f32 0.0078125, %v876_v30  ;;  %v1029_v27 = vsub.f32 %v6901_v60, %v6242_v13 }
 0x32f   : > { %vm6316_vm15 = vcmp.le.f32.partialorder %v6895_v8, 0.7853982  ;;  %v1052_v35 = vmul.f32 %v3449_v5, %v6085_v39  ;;  %v969_v33 = vmul.f32 %v6306_v16, %v6306_v16  ;;  %v953_v32 = vmul.f32 0.0078125, %v926_v63  ;;  %v3451_v36 = vpop.eup %3450  ;;  %v936_v42 = vpop.xlane.xlu1 %935  ;;  %v6903_v5 = vld [vmem:[#allocation43_spill] sm:$0xff]  ;;  %v6904_v8 = vld [vmem:[#allocation6_spill] sm:$0xff] }
 0x330   : > { %vm6327_vm0 = vcmp.le.f32.partialorder %v6898_v23, 0.7853982  ;;  %v2669_v22 = vxor.u32 2147483648, %v2668_v57  ;;  %v2876_v4 = vmul.f32 %v2875_v15, %v2873_v34  ;;  %v1036_v0 = vsub.f32 %v6902_v41, %v6253_v61 }
 0x331   : > { %3458 = vrsqrt.f32 %v1003_v38  ;;  %vm2469_vm1 = vweird.f32 %v6873_v12  ;;  %v1068_v30 = vmul.f32 %v1052_v35, %v1029_v27  ;;  %v1059_v17 = vmul.f32 %v3451_v36, %v6085_v39  ;;  %v870_v60 = vpop.xlane.xlu0 %869 }
 0x332   : > { %v985_v13 = vsub.f32 %v953_v32, %v969_v33  ;;  %v960_v50 = vmul.f32 0.0078125, %v940_v11  ;;  %v2774_v29 = vsel %vm2691_vm12, %v2773_v54, %v2772_v51  ;;  %v2158_v20 = vadd.s32 3, %v2154_v47 }
 0x333   : > { %v976_v55 = vmul.f32 %v6331_v46, %v6331_v46  ;;  %v6346_v21 = vmul.f32 0.0078125, %v872_v56  ;;  %v2671_v61 = vsub.s32 4, %v6053_v31  ;;  %v1091_v25 = vadd.f32 %v6112_v62, %v1068_v30  ;;  %v6350_v43 = vpop.eup %3452  ;;  %v884_v41 = vpop.xlane.xlu1 %883 }
 0x334   : > { %v1075_v26 = vmul.f32 %v1059_v17, %v1036_v0  ;;  %v1001_v2 = vadd.f32 1e-05, %v985_v13  ;;  %3460 = vcosq.f32 %v2153_v3  ;;  %v2670_v34 = vsel %vm2587_vm14, %v2669_v22, %v2668_v57  ;;  %v6907_v17 = vld [vmem:[#allocation23_spill] sm:$0xff] }
 0x335   : > { %v2877_v51 = vxor.u32 2147483648, %v2876_v4  ;;  %v992_v15 = vsub.f32 %v960_v50, %v976_v55  ;;  %v3455_v54 = vpop.eup %3454  ;;  %v2897_v56 = vadd.f32 %v6903_v5, %v1091_v25  ;;  %v1034_v47 = vsub.f32 %v6904_v8, %v6269_v53 }
 0x336   : > { %v1098_v23 = vadd.f32 %v6112_v62, %v1075_v26  ;;  %3462 = vrsqrt.f32 %v1001_v2  ;;  %v1057_v38 = vmul.f32 %v3455_v54, %v6085_v39  ;;  %v974_v63 = vmul.f32 %v6346_v21, %v6346_v21  ;;  %v6361_v35 = vpop.eup %3456 }
 0x337   : > { %v1008_v57 = vadd.f32 1e-05, %v992_v15  ;;  %v958_v27 = vmul.f32 0.0078125, %v936_v42  ;;  %3464 = vsinq.f32 %v2153_v3  ;;  %vm2795_vm2 = vcmp.lt.s32.totalorder %v5562_v10, 0  ;;  %2913 = vst [vmem:[%s6149_s18] sm:$0xff] %v2897_v56  ;;  %v880_v26 = vpop.xlane.xlu1 %879 }
 0x338   : > { %v2904_v53 = vadd.f32 %v6157_v6, %v1098_v23  ;;  %v6366_v33 = vmul.f32 0.0078125, %v874_v18  ;;  %vm6370_vm4 = vcmp.le.f32.partialorder %v2793_v59, 0.7853982  ;;  %v1073_v36 = vmul.f32 %v1057_v38, %v1034_v47  ;;  %v6908_v47 = vld [vmem:[#allocation14_spill] sm:$0xff] }
 0x339   : > { %3466 = vrsqrt.f32 %v1008_v57  ;;  %v990_v22 = vsub.f32 %v958_v27, %v974_v63  ;;  %v6377_v3 = vsel %vm6316_vm15, %v6890_v58, %v2774_v29  ;;  %v6379_v0 = vand.u32 3, %v2158_v20  ;;  %v938_v29 = vpop.xlane.xlu0 %937 }
 0x33a   : > { %v2672_v6 = vsel %vm2587_vm14, %v2671_v61, %v6053_v31  ;;  %v2673_v59 = vsel %vm6327_vm0, %v6894_v9, %v2670_v34  ;;  %2920 = vst [vmem:[%s6149_s18 + $0x38] sm:$0xff] %v2904_v53  ;;  %v2878_v30 = vsel %vm2795_vm2, %v2877_v51, %v2876_v4  ;;  %v1035_v13 = vsub.f32 %v6907_v17, %v6282_v48 }
 0x33b   : > { %v3459_v11 = vpop.eup %3458  ;;  %v1096_v50 = vadd.f32 %v6112_v62, %v1073_v36  ;;  %v1006_v20 = vadd.f32 1e-05, %v990_v22  ;;  %v975_v31 = vmul.f32 %v6366_v33, %v6366_v33  ;;  %v6396_v18 = vmul.f32 0.0078125, %v870_v60  ;;  %v944_v60 = vpop.xlane.xlu1 %943 }
 0x33c   : > { %v1058_v55 = vmul.f32 %v3459_v11, %v6085_v39  ;;  %v959_v61 = vmul.f32 0.0078125, %v938_v29  ;;  %v6401_v4 = vsel %vm2469_vm1, nan, %v6297_v49  ;;  %v2778_v48 = vsel %vm6316_vm15, 0, %v6311_v28 }
 0x33d   : > { %v2902_v25 = vadd.f32 %v6043_v45, %v1096_v50  ;;  %3468 = vrsqrt.f32 %v1006_v20  ;;  %v6408_v51 = vmul.f32 0.0078125, %v880_v26  ;;  %v2674_v12 = vsel %vm6327_vm0, 0, %v2672_v6  ;;  %v934_v42 = vpop.xlane.xlu0 %933 }
 0x33e   : > { %3470 = vcosq.f32 %v6377_v3  ;;  %v1074_v2 = vmul.f32 %v1058_v55, %v1035_v13  ;;  %v991_v34 = vsub.f32 %v959_v61, %v975_v31  ;;  %v6410_v15 = vpop.eup %3460  ;;  %v2879_v49 = vsub.s32 4, %v6090_v24 }
 0x33f   : > { %3472 = vcosq.f32 %v2673_v59  ;;  %v2881_v45 = vsel %vm6370_vm4, %v5562_v10, %v2878_v30  ;;  %2918 = vst [vmem:[%s6149_s18 + $0x28] sm:$0xff] %v2902_v25  ;;  %vm2161_vm6 = vcmp.eq.s32.totalorder %v6379_v0, 0  ;;  %vm2164_vm3 = vcmp.eq.s32.totalorder %v6379_v0, 2  ;;  %v6909_v30 = vld [vmem:[#allocation7_spill] sm:$0xff] }
 0x340   : > { %v3463_v54 = vpop.eup %3462  ;;  %v1097_v5 = vadd.f32 %v6112_v62, %v1074_v2  ;;  %v973_v19 = vmul.f32 %v6396_v18, %v6396_v18  ;;  %v1007_v56 = vadd.f32 1e-05, %v991_v34  ;;  %v957_v8 = vmul.f32 0.0078125, %v934_v42  ;;  %v6911_v42 = vld [vmem:[#allocation28_spill] sm:$0xff] }
 0x341   : > { %3474 = vsinq.f32 %v2673_v59  ;;  %v1033_v23 = vsub.f32 %v6908_v47, %v6306_v16  ;;  %v1056_v38 = vmul.f32 %v3463_v54, %v6085_v39  ;;  %v978_v63 = vmul.f32 %v6408_v51, %v6408_v51  ;;  %v3465_v57 = vpop.eup %3464  ;;  %v882_v11 = vpop.xlane.xlu0 %881 }
 0x342   : > { %v2903_v27 = vadd.f32 %v6066_v37, %v1097_v5  ;;  %3476 = vrsqrt.f32 %v1007_v56  ;;  %v989_v53 = vsub.f32 %v957_v8, %v973_v19  ;;  %v962_v36 = vmul.f32 0.0078125, %v944_v60 }
 0x343   : > { %v3467_v22 = vpop.eup %3466  ;;  %v2880_v6 = vsel %vm2795_vm2, %v2879_v49, %v6090_v24  ;;  %3478 = vcosq.f32 %v2881_v45  ;;  %v1072_v59 = vmul.f32 %v1056_v38, %v1033_v23  ;;  %v6433_v16 = vmul.f32 0.0078125, %v884_v41  ;;  %v948_v24 = vpop.xlane.xlu1 %947 }
 0x344   : > { %2919 = vst [vmem:[%s6149_s18 + $0x30] sm:$0xff] %v2903_v27  ;;  %v1040_v17 = vsub.f32 %v6909_v30, %v6331_v46  ;;  %v1063_v13 = vmul.f32 %v3467_v22, %v6085_v39  ;;  %v1005_v37 = vadd.f32 1e-05, %v989_v53  ;;  %v994_v50 = vsub.f32 %v962_v36, %v978_v63  ;;  %v6910_v46 = vld [vmem:[#allocation24_spill] sm:$0xff] }
 0x345   : > { %v2165_v29 = vxor.u32 2147483648, %v6410_v15  ;;  %v2678_v20 = vadd.s32 3, %v2674_v12  ;;  %3480 = vsinq.f32 %v2881_v45  ;;  %v1095_v55 = vadd.f32 %v6112_v62, %v1072_v59  ;;  %v878_v34 = vpop.xlane.xlu0 %877 }
 0x346   : > { %v2162_v31 = vxor.u32 2147483648, %v3465_v57  ;;  %v2882_v41 = vsel %vm6370_vm4, 0, %v2880_v6  ;;  %v1079_v61 = vmul.f32 %v1063_v13, %v1040_v17  ;;  %3482 = vrsqrt.f32 %v1005_v37 }
 0x347   : > { %v3469_v25 = vpop.eup %3468  ;;  %v2901_v26 = vadd.f32 %v6910_v46, %v1095_v55  ;;  %v980_v2 = vmul.f32 %v6433_v16, %v6433_v16  ;;  %v1010_v49 = vadd.f32 1e-05, %v994_v50  ;;  %v964_v12 = vmul.f32 0.0078125, %v948_v24 }
 0x348   : > { %v6446_v45 = vpop.eup %3470  ;;  %v1038_v54 = vsub.f32 %v6911_v42, %v6346_v21  ;;  %v1102_v32 = vadd.f32 %v6112_v62, %v1079_v61  ;;  %v1061_v5 = vmul.f32 %v3469_v25, %v6085_v39  ;;  %v6452_v19 = vmul.f32 0.0078125, %v878_v34 }
 0x349   : > { %v3473_v56 = vpop.eup %3472  ;;  %v2782_v8 = vadd.s32 3, %v2778_v48  ;;  %v2886_v47 = vadd.s32 3, %v2882_v41  ;;  %2917 = vst [vmem:[%s6149_s18 + $0x20] sm:$0xff] %v2901_v26  ;;  %3484 = vrsqrt.f32 %v1010_v49  ;;  %v996_v23 = vsub.f32 %v964_v12, %v980_v2  ;;  %v942_v60 = vpop.xlane.xlu0 %941 }
 0x34a   : > { %3486 = vsinq.f32 %v6377_v3  ;;  %vm2160_vm5 = vcmp.lt.s32.totalorder %v6379_v0, 2  ;;  %v2908_v21 = vadd.f32 %v6401_v4, %v1102_v32  ;;  %v1077_v38 = vmul.f32 %v1061_v5, %v1038_v54 }
 0x34b   : > { %v3475_v63 = vpop.eup %3474  ;;  %vm2157_vm7 = vweird.f32 %v6889_v44  ;;  %v2163_v28 = vsel %vm2161_vm6, %v6410_v15, %v2162_v31  ;;  %v2166_v52 = vsel %vm2164_vm3, %v2165_v29, %v3465_v57  ;;  %v2679_v48 = vand.u32 3, %v2678_v20  ;;  %v6912_v15 = vld [vmem:[#allocation18_spill] sm:$0xff]  ;;  %v6915_v44 = vld [vmem:[#allocation31_spill] sm:$0xff] }
 0x34c   : > { %v1012_v27 = vadd.f32 1e-05, %v996_v23  ;;  %v3477_v53 = vpop.eup %3476  ;;  %2924 = vst [vmem:[%s6149_s18 + $0x58] sm:$0xff] %v2908_v21  ;;  %v1100_v3 = vadd.f32 %v6112_v62, %v1077_v38  ;;  %v6470_v36 = vmul.f32 0.0078125, %v882_v11  ;;  %v977_v4 = vmul.f32 %v6452_v19, %v6452_v19 }
 0x34d   : > { %v961_v22 = vmul.f32 0.0078125, %v942_v60  ;;  %v3479_v6 = vpop.eup %3478  ;;  %v6474_v59 = vand.u32 3, %v2886_v47  ;;  %v1039_v30 = vsub.f32 %v6912_v15, %v6366_v33  ;;  %v1062_v57 = vmul.f32 %v3477_v53, %v6085_v39  ;;  %v946_v20 = vpop.xlane.xlu0 %945 }
 0x34e   : > { %3488 = vrsqrt.f32 %v1012_v27  ;;  %v2682_v17 = vxor.u32 2147483648, %v3475_v63  ;;  %v2685_v13 = vxor.u32 2147483648, %v3473_v56  ;;  %v2906_v37 = vadd.f32 %v6235_v40, %v1100_v3  ;;  %v6913_v40 = vld [vmem:[#allocation19_spill] sm:$0xff] }
 0x34f   : > { %v993_v11 = vsub.f32 %v961_v22, %v977_v4  ;;  %v3481_v50 = vpop.eup %3480  ;;  %vm2680_vm8 = vcmp.lt.s32.totalorder %v2679_v48, 2  ;;  %vm2681_vm10 = vcmp.eq.s32.totalorder %v2679_v48, 0  ;;  %vm2684_vm9 = vcmp.eq.s32.totalorder %v2679_v48, 2 }
 0x350   : > { %v1078_v29 = vmul.f32 %v1062_v57, %v1039_v30  ;;  %v3483_v55 = vpop.eup %3482  ;;  %vm2580_vm11 = vcmp.eq.s32.totalorder %v6250_v14, 2  ;;  %v2167_v33 = vsel %vm2160_vm5, %v2163_v28, %v2166_v52  ;;  %2922 = vst [vmem:[%s6149_s18 + $0x48] sm:$0xff] %v2906_v37  ;;  %v979_v24 = vmul.f32 %v6470_v36, %v6470_v36 }
 0x351   : > { %v1009_v31 = vadd.f32 1e-05, %v993_v11  ;;  %v963_v41 = vmul.f32 0.0078125, %v946_v20  ;;  %vm2889_vm12 = vcmp.eq.s32.totalorder %v6474_v59, 0  ;;  %v1037_v61 = vsub.f32 %v6913_v40, %v6396_v18  ;;  %v6914_v18 = vld [vmem:[#allocation33_spill] sm:$0xff] }
 0x352   : > { %v1101_v25 = vadd.f32 %v6112_v62, %v1078_v29  ;;  %v1060_v46 = vmul.f32 %v3483_v55, %v6085_v39  ;;  %v2683_v26 = vsel %vm2681_vm10, %v3473_v56, %v2682_v17  ;;  %v2686_v2 = vsel %vm2684_vm9, %v2685_v13, %v3475_v63  ;;  %v6916_v13 = vld [vmem:[#allocation30_spill] sm:$0xff]  ;;  %v6917_v55 = vld [vmem:[#allocation29_spill] sm:$0xff] }
 0x353   : > { %3490 = vrsqrt.f32 %v1009_v31  ;;  %v995_v0 = vsub.f32 %v963_v41, %v979_v24  ;;  %v3485_v34 = vpop.eup %3484  ;;  %v2890_v49 = vxor.u32 2147483648, %v3481_v50  ;;  %v2893_v12 = vxor.u32 2147483648, %v3479_v6 }
 0x354   : > { %v2907_v42 = vadd.f32 %v6239_v1, %v1101_v25  ;;  %v1076_v54 = vmul.f32 %v1060_v46, %v1037_v61  ;;  %v3487_v32 = vpop.eup %3486  ;;  %vm2892_vm13 = vcmp.eq.s32.totalorder %v6474_v59, 2  ;;  %v1042_v5 = vsub.f32 %v6914_v18, %v6408_v51 }
 0x355   : > { %v1065_v47 = vmul.f32 %v3485_v34, %v6085_v39  ;;  %v1011_v23 = vadd.f32 1e-05, %v995_v0  ;;  %v2581_v56 = vxor.u32 2147483648, %v6350_v43  ;;  %v2783_v21 = vand.u32 3, %v2782_v8 }
 0x356   : > { %vm2677_vm14 = vweird.f32 %v6894_v9  ;;  %2923 = vst [vmem:[%s6149_s18 + $0x50] sm:$0xff] %v2907_v42  ;;  %v1099_v38 = vadd.f32 %v6112_v62, %v1076_v54  ;;  %v2168_v1 = vsel %vm2157_vm7, nan, %v2167_v33  ;;  %v2687_v63 = vsel %vm2680_vm8, %v2683_v26, %v2686_v2 }
 0x357   : > { %v1081_v28 = vmul.f32 %v1065_v47, %v1042_v5  ;;  %3492 = vrsqrt.f32 %v1011_v23  ;;  %vm2888_vm15 = vcmp.lt.s32.totalorder %v6474_v59, 2  ;;  %v2891_v52 = vsel %vm2889_vm12, %v3479_v6, %v2890_v49 }
 0x358   : > { %v3489_v51 = vpop.eup %3488  ;;  %v2894_v8 = vsel %vm2892_vm13, %v2893_v12, %v3481_v50  ;;  %v2905_v60 = vadd.f32 %v2168_v1, %v1099_v38  ;;  %v2578_v27 = vxor.u32 2147483648, %v6361_v35  ;;  %v1044_v53 = vsub.f32 %v6915_v44, %v6433_v16 }
 0x359   : > { %v1104_v48 = vadd.f32 %v6112_v62, %v1081_v28  ;;  %v1067_v3 = vmul.f32 %v3489_v51, %v6085_v39  ;;  %vm2577_vm0 = vcmp.eq.s32.totalorder %v6250_v14, 0  ;;  %v2688_v4 = vsel %vm2677_vm14, nan, %v2687_v63 }
 0x35a   : > { %2921 = vst [vmem:[%s6149_s18 + $0x40] sm:$0xff] %v2905_v60  ;;  %vm2885_vm1 = vweird.f32 %v5562_v10  ;;  %v2895_v22 = vsel %vm2888_vm15, %v2891_v52, %v2894_v8  ;;  %vm2576_vm2 = vcmp.lt.s32.totalorder %v6250_v14, 2  ;;  %v2582_v16 = vsel %vm2580_vm11, %v2581_v56, %v6361_v35 }
 0x35b   : > { %v2910_v6 = vadd.f32 %v2688_v4, %v1104_v48  ;;  %v1083_v59 = vmul.f32 %v1067_v3, %v1044_v53  ;;  %vm2785_vm4 = vcmp.eq.s32.totalorder %v2783_v21, 0  ;;  %v2579_v30 = vsel %vm2577_vm0, %v6350_v43, %v2578_v27 }
 0x35c   : > { %v2786_v57 = vxor.u32 2147483648, %v3487_v32  ;;  %v2789_v9 = vxor.u32 2147483648, %v6446_v45  ;;  %vm2788_vm6 = vcmp.eq.s32.totalorder %v2783_v21, 2  ;;  %v2896_v17 = vsel %vm2885_vm1, nan, %v2895_v22 }
 0x35d   : > { %v3491_v15 = vpop.eup %3490  ;;  %2926 = vst [vmem:[%s6149_s18 + $0x68] sm:$0xff] %v2910_v6  ;;  %v1106_v10 = vadd.f32 %v6112_v62, %v1083_v59  ;;  %v1041_v37 = vsub.f32 %v6916_v13, %v6452_v19  ;;  %vm2573_vm3 = vweird.f32 %v6881_v7  ;;  %v2583_v35 = vsel %vm2576_vm2, %v2579_v30, %v2582_v16 }
 0x35e   : > { %v1064_v11 = vmul.f32 %v3491_v15, %v6085_v39  ;;  %vm2784_vm5 = vcmp.lt.s32.totalorder %v2783_v21, 2  ;;  %v2787_v29 = vsel %vm2785_vm4, %v6446_v45, %v2786_v57  ;;  %v2790_v20 = vsel %vm2788_vm6, %v2789_v9, %v3487_v32 }
 0x35f   : > { %v2912_v14 = vadd.f32 %v2896_v17, %v1106_v10  ;;  %v1043_v19 = vsub.f32 %v6917_v55, %v6470_v36  ;;  %v2584_v24 = vsel %vm2573_vm3, nan, %v2583_v35  ;;  %vm2781_vm7 = vweird.f32 %v6890_v58 }
 0x360   : > { %v1080_v43 = vmul.f32 %v1064_v11, %v1041_v37  ;;  %v2791_v31 = vsel %vm2784_vm5, %v2787_v29, %v2790_v20 }
 0x361   : > { %v3493_v50 = vpop.eup %3492  ;;  %2928 = vst [vmem:[%s6149_s18 + $0x78] sm:$0xff] %v2912_v14  ;;  %v2792_v61 = vsel %vm2781_vm7, nan, %v2791_v31 }
 0x362   : > { %v1103_v33 = vadd.f32 %v6112_v62, %v1080_v43  ;;  %v1066_v7 = vmul.f32 %v3493_v50, %v6085_v39 }
 0x364   : > { %v2909_v41 = vadd.f32 %v2584_v24, %v1103_v33  ;;  %v1082_v40 = vmul.f32 %v1066_v7, %v1043_v19 }
 0x366   : > { %2925 = vst [vmem:[%s6149_s18 + $0x60] sm:$0xff] %v2909_v41  ;;  %v1105_v45 = vadd.f32 %v6112_v62, %v1082_v40 }
 0x368   : > { %v2911_v39 = vadd.f32 %v2792_v61, %v1105_v45 }
 0x36a   : > { %2927 = vst [vmem:[%s6149_s18 + $0x70] sm:$0xff] %v2911_v39 }
 0x36b   : > { %3511 = shalt.err (!%p3508_p3)
}
 0x36c   : > { %s3512_s8 = scalar_lea.hbm %s6545_s20, 2048  ;;  %s3516_s14 = scalar_lea.hbm %s6600_s7, 4096 }
 0x36d   : > { %p3513_p4 = scmp.ne.s32.totalorder %s6545_s20, %s3512_s8  ;;  %p3517_p9 = scmp.lt.u32.totalorder %s6545_s20, %s6600_s7 }
 0x36e   : > { %p3518_p10 = scmp.lt.u32.totalorder %s3516_s14, %s3512_s8  ;;  %p3520_p12 = scmp.lt.u32.totalorder %s3512_s8, %s6545_s20 }
 0x36f   : > { %p3514_p7 = pnand %p3513_p4, %p3654_p5 }
 0x370   : > { %p3519_p11 = por %p3518_p10, %p3517_p9 }
 0x371   : > { %p3515_p8 = pneg %p3514_p7 }
 0x372   : > { %p3521_p13 = por %p3520_p12, %p3519_p11 }
 0x374   : > { %p3522_p0 = pnand %p3521_p13, %p3515_p8 }
 0x376   : > { %3525 = shalt.err (!%p3522_p0)
}
 0x377   : > { %s3574_s17 = smov 128   ;;  %s3575_s19 = smov 8  }
 0x378   : > { %3326 = dma.vmem_to_hbm [thread:$0]  (%p3654_p5), %s6547_s16, 2048, %s6545_s20, %s6552_s21, %s3574_s17, %s3574_s17, %s3575_s19  }
 0x379 PF: > { %p3332_p1 = scmp.ge.s32.totalorder %s3560_s27, 2  ;;  %s2958_s28 = sand.u32 1, %s3548_s24  }
 0x37a   : > { %s2959_s22 = scalar_lea.sflag [#allocation3], %s2958_s28 }
 0x37b   : > { %p3329_p2 = pnand %p3332_p1, %p3658_p6 }
 0x37d   : > { %3543 = dma.done.wait (!%p3329_p2), %s2959_s22, 2048  }
 0x37e   : > { %3545 = vsyncadd (!%p3329_p2), %s2959_s22, 4294965248  ;;  %p17_p3 = scmp.ge.s32.totalorder %s3641_s30, 4   ;;  %s6918_s24 = smov %s3552_s25 }
 0x37f   : > { %s6919_s25 = smov %s3556_s26  ;;  %s6920_s26 = smov %s3652_s10 }
 0x380   : > { %s6921_s27 = smov %s3641_s30  ;;  %19 = sbr.rel (!%p17_p3) target bundleno = 3 (0x3), region = 83 }
 0x387   :  { %2964 = vsyncpa [#allocation3], 1 }
 0x388   :  { %2966 = vsyncpa [#allocation3 + $0x1], 1 }

</bundles_post_ra>
